<compile_context>
chip_gen: v5e
topology: v5e:2x2
jax: 0.10.0
libtpu: 0.0.40
codegen_flags: <defaults>
</compile_context>

<pallas_src>
import jax
import jax.numpy as jnp
from jax.experimental import pallas as pl
from jax.experimental.pallas import tpu as pltpu

K = 7
PAD = (K - 1) // 2
_VMEM_LIMIT = 32 * 1024 * 1024  # explicit scoped-VMEM ceiling, safe on v5e/v6e/v7x


def _channel_tile(C, HW, budget_bytes=2 * 1024 * 1024):
    """Largest channel tile that divides C, keeps a (tile, HW) f32 block under
    `budget_bytes`, and satisfies the TPU block constraint (second-to-last block
    dim must be a multiple of 8 or equal to the full C)."""
    cap = max(1, min(budget_bytes // (HW * 4), 512))
    if C <= cap:
        return C
    best = 0
    d = 8
    while d <= cap:
        if C % d == 0:
            best = d
        d += 8
    return best if best else C


@jax.jit
def spatial_attention(x, conv_weight):
    """x: (N, C, H, W); conv_weight: (1, 2, K, K) -> (N, C, H, W)."""
    N, C, H, W = x.shape
    HW = H * W
    Hp, Wp = H + 2 * PAD, W + 2 * PAD

    c_tile = _channel_tile(C, HW)
    n_ct = C // c_tile
    sub = 8 if c_tile % 8 == 0 else c_tile      # channel slab streamed per step
    n_slab = c_tile // sub

    # Free (layout-preserving) reshape: trailing dims collapse -> lane-dense H*W.
    x3 = x.reshape(N, C, HW)

    # ----------------- Pass 1: fused channel mean + max reduction -----------------
    def reduce_kernel(x_ref, stats_ref, sum_sc, max_sc):
        c_idx = pl.program_id(1)

        @pl.when(c_idx == 0)
        def _init():
            sum_sc[...] = jnp.zeros_like(sum_sc)
            max_sc[...] = jnp.full_like(max_sc, -jnp.inf)

        # One fused pass: each (sub, HW) slab is read once and updates BOTH
        # running stats elementwise (pure VPU, no cross-sublane reduce here).
        for i in range(n_slab):
            slab = x_ref[0, pl.ds(i * sub, sub), :].astype(jnp.float32)
            sum_sc[...] = sum_sc[...] + slab
            max_sc[...] = jnp.maximum(max_sc[...], slab)

        @pl.when(c_idx == pl.num_programs(1) - 1)
        def _finalize():
            # Single cross-sublane reduce of the (sub, HW) accumulators.
            stats_ref[0, 0:1] = (
                jnp.sum(sum_sc[...], axis=0, keepdims=True) * (1.0 / C))
            stats_ref[0, 1:2] = jnp.max(max_sc[...], axis=0, keepdims=True)

    stats = pl.pallas_call(
        reduce_kernel,
        out_shape=jax.ShapeDtypeStruct((N, 2, HW), jnp.float32),
        grid_spec=pltpu.PrefetchScalarGridSpec(
            num_scalar_prefetch=0,
            grid=(N, n_ct),
            in_specs=[pl.BlockSpec((1, c_tile, HW), lambda n, c: (n, c, 0))],
            out_specs=pl.BlockSpec((1, 2, HW), lambda n, c: (n, 0, 0)),
            scratch_shapes=[pltpu.VMEM((sub, HW), jnp.float32),
                            pltpu.VMEM((sub, HW), jnp.float32)],
        ),
        compiler_params=pltpu.CompilerParams(
            dimension_semantics=("parallel", "arbitrary"),
            vmem_limit_bytes=_VMEM_LIMIT),
    )(x3)

    # ------------- Pass 2: 7x7 conv + sigmoid on the tiny stat maps -------------
    stats4 = stats.reshape(N, 2, H, W)                    # free reshape
    w_flat = conv_weight.reshape(2, K * K).astype(jnp.float32)

    def conv_sigmoid_kernel(w_ref, s_ref, y_ref, pad_sc):
        # In-kernel zero padding of the (avg, max) maps (only 2*Hp*Wp elements);
        # reproduces the conv's zero padding exactly.
        pad_sc[...] = jnp.zeros_like(pad_sc)
        pad_sc[0, PAD:PAD + H, PAD:PAD + W] = s_ref[0, 0]
        pad_sc[1, PAD:PAD + H, PAD:PAD + W] = s_ref[0, 1]

        ap = pad_sc[0]                                    # (Hp, Wp)
        mp = pad_sc[1]
        acc = jnp.zeros((H, W), jnp.float32)
        # Hoist the 7 lane-direction (kj) shifts; inner ki loop uses sublane-only
        # offsets (14 lane-offset slices total instead of 98 2-D-offset ones).
        for kj in range(K):
            a_kj = ap[:, kj:kj + W]                       # (Hp, W)
            m_kj = mp[:, kj:kj + W]
            for ki in range(K):
                acc = (acc
                       + w_ref[0, ki * K + kj] * a_kj[ki:ki + H, :]
                       + w_ref[1, ki * K + kj] * m_kj[ki:ki + H, :])

        # sigmoid(acc) = 1 / (1 + exp(-acc)); exp runs on the EUP.
        # (approx=True would also be EUP-only but adds ~1e-4 rel error; exact
        #  reciprocal keeps the strict test tolerance.)
        y_ref[0] = pl.reciprocal(1.0 + jnp.exp(-acc), approx=False)

    y_map = pl.pallas_call(
        conv_sigmoid_kernel,
        out_shape=jax.ShapeDtypeStruct((N, H, W), jnp.float32),
        grid_spec=pltpu.PrefetchScalarGridSpec(
            num_scalar_prefetch=0,
            grid=(N,),
            in_specs=[pl.BlockSpec(memory_space=pltpu.SMEM),           # conv weights
                      pl.BlockSpec((1, 2, H, W), lambda n: (n, 0, 0, 0))],
            out_specs=pl.BlockSpec((1, H, W), lambda n: (n, 0, 0)),
            scratch_shapes=[pltpu.VMEM((2, Hp, Wp), jnp.float32)],
        ),
        compiler_params=pltpu.CompilerParams(
            dimension_semantics=("parallel",),
            vmem_limit_bytes=_VMEM_LIMIT),
    )(w_flat, stats4)

    # ---------------- Pass 3: lane-dense broadcast multiply x * y ----------------
    y3 = y_map.reshape(N, 1, HW)                          # free reshape

    def apply_kernel(x_ref, y_ref, o_ref):
        # Hoist the attention-row broadcast out of the slab loop.
        yb = jnp.broadcast_to(y_ref[0], (sub, HW))
        for i in range(n_slab):
            sl = pl.ds(i * sub, sub)
            o_ref[0, sl, :] = (x_ref[0, sl, :] * yb).astype(o_ref.dtype)

    out3 = pl.pallas_call(
        apply_kernel,
        out_shape=jax.ShapeDtypeStruct((N, C, HW), x.dtype),
        grid_spec=pltpu.PrefetchScalarGridSpec(
            num_scalar_prefetch=0,
            grid=(N, n_ct),
            in_specs=[pl.BlockSpec((1, c_tile, HW), lambda n, c: (n, c, 0)),
                      pl.BlockSpec((1, 1, HW), lambda n, c: (n, 0, 0))],
            out_specs=pl.BlockSpec((1, c_tile, HW), lambda n, c: (n, c, 0)),
        ),
        compiler_params=pltpu.CompilerParams(
            dimension_semantics=("parallel", "parallel"),
            vmem_limit_bytes=_VMEM_LIMIT),
    )(x3, y3)

    return out3.reshape(N, C, H, W)


def spatial_attention_ref(x, conv_weight):
    """Pure-JAX reference mirroring the PyTorch forward."""
    avg_out = jnp.mean(x, axis=1, keepdims=True)
    max_out = jnp.max(x, axis=1, keepdims=True)
    y = jnp.concatenate([avg_out, max_out], axis=1)       # (N, 2, H, W)
    y = jax.lax.conv_general_dilated(
        y, conv_weight, window_strides=(1, 1),
        padding=((PAD, PAD), (PAD, PAD)),
        dimension_numbers=("NCHW", "OIHW", "NCHW"))
    y = jax.nn.sigmoid(y)
    return x * y


if __name__ == "__main__":
    key = jax.random.PRNGKey(0)
    kx, kw = jax.random.split(key)

    N, C, H, W = 2, 4, 16, 16
    x = jax.random.normal(kx, (N, C, H, W), dtype=jnp.float32)

    # Deterministic conv weight init (PyTorch kaiming_uniform-style bound).
    fan_in = 2 * K * K
    bound = 1.0 / float(fan_in) ** 0.5
    conv_weight = jax.random.uniform(
        kw, (1, 2, K, K), dtype=jnp.float32, minval=-bound, maxval=bound)

    out = jax.block_until_ready(spatial_attention(x, conv_weight))
    ref = spatial_attention_ref(x, conv_weight)

    assert out.shape == (N, C, H, W)
    assert out.dtype == x.dtype
    assert jnp.allclose(out, ref, atol=1e-5, rtol=1e-5), (
        "mismatch vs reference, max abs diff = "
        f"{float(jnp.max(jnp.abs(out - ref)))}")

    print("KERNEL_OK")
</pallas_src>

<mosaic_0001>
module attributes {stable_mosaic.version = 11 : i64} {
  func.func @reduce_kernel(%arg0: i32, %arg1: i32, %arg2: memref<1x4x256xf32, #tpu.memory_space<vmem>>, %arg3: memref<1x2x256xf32, #tpu.memory_space<vmem>>, %arg4: memref<4x256xf32, #tpu.memory_space<vmem>>, %arg5: memref<4x256xf32, #tpu.memory_space<vmem>>) attributes {dimension_semantics = [#tpu.dimension_semantics<parallel>, #tpu.dimension_semantics<arbitrary>], iteration_bounds = array<i64: 2, 1>, scalar_prefetch = 0 : i64, scratch_operands = 2 : i64, tpu.core_type = #tpu.core_type<tc>, window_params = [{transform_indices = @transform_0, window_bounds = array<i64: 1, 4, 256>}, {transform_indices = @transform_1, window_bounds = array<i64: 1, 2, 256>}]} {
    %c0_i32 = arith.constant 0 : i32
    %0 = arith.cmpi eq, %arg1, %c0_i32 : i32
    %1 = arith.extui %0 : i1 to i32
    %c0_i32_0 = arith.constant 0 : i32
    %2 = arith.cmpi ne, %1, %c0_i32_0 : i32
    scf.if %2 {
      %cst = arith.constant 0.000000e+00 : f32
      %14 = vector.broadcast %cst : f32 to vector<4x256xf32>
      %c0_13 = arith.constant 0 : index
      %c0_14 = arith.constant 0 : index
      %15 = vector.load %arg4[%c0_13, %c0_14] : memref<4x256xf32, #tpu.memory_space<vmem>>, vector<4x256xf32>
      tpu.vector_store %arg4[%c0_13, %c0_14], %14 {strides = array<i32>} : memref<4x256xf32, #tpu.memory_space<vmem>>, vector<4x256xf32>,
      %cst_15 = arith.constant 0xFF800000 : f32
      %16 = vector.broadcast %cst_15 : f32 to vector<4x256xf32>
      %c0_16 = arith.constant 0 : index
      %c0_17 = arith.constant 0 : index
      %17 = vector.load %arg5[%c0_16, %c0_17] : memref<4x256xf32, #tpu.memory_space<vmem>>, vector<4x256xf32>
      tpu.vector_store %arg5[%c0_16, %c0_17], %16 {strides = array<i32>} : memref<4x256xf32, #tpu.memory_space<vmem>>, vector<4x256xf32>,
    } else {
    }
    %c0 = arith.constant 0 : index
    %c0_1 = arith.constant 0 : index
    %c0_2 = arith.constant 0 : index
    %3 = vector.load %arg2[%c0, %c0_1, %c0_2] : memref<1x4x256xf32, #tpu.memory_space<vmem>>, vector<1x4x256xf32>
    %4 = vector.shape_cast %3 : vector<1x4x256xf32> to vector<4x256xf32>
    %c0_3 = arith.constant 0 : index
    %c0_4 = arith.constant 0 : index
    %5 = vector.load %arg4[%c0_3, %c0_4] : memref<4x256xf32, #tpu.memory_space<vmem>>, vector<4x256xf32>
    %6 = arith.addf %5, %4 : vector<4x256xf32>
    %c0_5 = arith.constant 0 : index
    %c0_6 = arith.constant 0 : index
    %7 = vector.load %arg4[%c0_5, %c0_6] : memref<4x256xf32, #tpu.memory_space<vmem>>, vector<4x256xf32>
    tpu.vector_store %arg4[%c0_5, %c0_6], %6 {strides = array<i32>} : memref<4x256xf32, #tpu.memory_space<vmem>>, vector<4x256xf32>,
    %c0_7 = arith.constant 0 : index
    %c0_8 = arith.constant 0 : index
    %8 = vector.load %arg5[%c0_7, %c0_8] : memref<4x256xf32, #tpu.memory_space<vmem>>, vector<4x256xf32>
    %9 = arith.maximumf %8, %4 : vector<4x256xf32>
    %c0_9 = arith.constant 0 : index
    %c0_10 = arith.constant 0 : index
    %10 = vector.load %arg5[%c0_9, %c0_10] : memref<4x256xf32, #tpu.memory_space<vmem>>, vector<4x256xf32>
    tpu.vector_store %arg5[%c0_9, %c0_10], %9 {strides = array<i32>} : memref<4x256xf32, #tpu.memory_space<vmem>>, vector<4x256xf32>,
    %c0_i32_11 = arith.constant 0 : i32
    %11 = arith.cmpi eq, %arg1, %c0_i32_11 : i32
    %12 = arith.extui %11 : i1 to i32
    %c0_i32_12 = arith.constant 0 : i32
    %13 = arith.cmpi ne, %12, %c0_i32_12 : i32
    scf.if %13 {
      %c0_13 = arith.constant 0 : index
      %c0_14 = arith.constant 0 : index
      %14 = vector.load %arg4[%c0_13, %c0_14] : memref<4x256xf32, #tpu.memory_space<vmem>>, vector<4x256xf32>
      %cst = arith.constant dense<0.000000e+00> : vector<256xf32>
      %15 = vector.multi_reduction <add>, %14, %cst [0] : vector<4x256xf32> to vector<256xf32>
      %16 = vector.shape_cast %15 : vector<256xf32> to vector<1x256xf32>
      %cst_15 = arith.constant 2.500000e-01 : f32
      %17 = vector.broadcast %cst_15 : f32 to vector<1x256xf32>
      %18 = arith.mulf %16, %17 : vector<1x256xf32>
      %c0_16 = arith.constant 0 : index
      %c0_17 = arith.constant 0 : index
      %c0_18 = arith.constant 0 : index
      %19 = vector.load %arg3[%c0_16, %c0_17, %c0_18] : memref<1x2x256xf32, #tpu.memory_space<vmem>>, vector<1x1x256xf32>
      %20 = vector.shape_cast %19 : vector<1x1x256xf32> to vector<1x256xf32>
      %21 = vector.shape_cast %18 : vector<1x256xf32> to vector<1x1x256xf32>
      tpu.vector_store %arg3[%c0_16, %c0_17, %c0_18], %21 {strides = array<i32>} : memref<1x2x256xf32, #tpu.memory_space<vmem>>, vector<1x1x256xf32>,
      %c0_19 = arith.constant 0 : index
      %c0_20 = arith.constant 0 : index
      %22 = vector.load %arg5[%c0_19, %c0_20] : memref<4x256xf32, #tpu.memory_space<vmem>>, vector<4x256xf32>
      %cst_21 = arith.constant dense<0xFF800000> : vector<256xf32>
      %23 = vector.multi_reduction <maximumf>, %22, %cst_21 [0] : vector<4x256xf32> to vector<256xf32>
      %24 = vector.shape_cast %23 : vector<256xf32> to vector<1x256xf32>
      %c0_22 = arith.constant 0 : index
      %c1 = arith.constant 1 : index
      %c0_23 = arith.constant 0 : index
      %25 = vector.load %arg3[%c0_22, %c1, %c0_23] : memref<1x2x256xf32, #tpu.memory_space<vmem>>, vector<1x1x256xf32>
      %26 = vector.shape_cast %25 : vector<1x1x256xf32> to vector<1x256xf32>
      %27 = vector.shape_cast %24 : vector<1x256xf32> to vector<1x1x256xf32>
      tpu.vector_store %arg3[%c0_22, %c1, %c0_23], %27 {strides = array<i32>} : memref<1x2x256xf32, #tpu.memory_space<vmem>>, vector<1x1x256xf32>,
    } else {
    }
    return
  }
  func.func @transform_0(%arg0: i32, %arg1: i32) -> (i32, i32, i32) {
    %c0_i32 = arith.constant 0 : i32
    %c0_i32_0 = arith.constant 0 : i32
    return %arg0, %arg1, %c0_i32 : i32, i32, i32
  }
  func.func @transform_1(%arg0: i32, %arg1: i32) -> (i32, i32, i32) {
    %c0_i32 = arith.constant 0 : i32
    %c0_i32_0 = arith.constant 0 : i32
    %c0_i32_1 = arith.constant 0 : i32
    return %arg0, %c0_i32, %c0_i32_0 : i32, i32, i32
  }
}

module attributes {stable_mosaic.version = 11 : i64} {
  func.func @apply_kernel(%arg0: i32, %arg1: i32, %arg2: memref<1x4x256xf32, #tpu.memory_space<vmem>>, %arg3: memref<1x1x256xf32, #tpu.memory_space<vmem>>, %arg4: memref<1x4x256xf32, #tpu.memory_space<vmem>>) attributes {dimension_semantics = [#tpu.dimension_semantics<parallel>, #tpu.dimension_semantics<parallel>], iteration_bounds = array<i64: 2, 1>, scalar_prefetch = 0 : i64, scratch_operands = 0 : i64, tpu.core_type = #tpu.core_type<tc>, window_params = [{transform_indices = @transform_0, window_bounds = array<i64: 1, 4, 256>}, {transform_indices = @transform_1, window_bounds = array<i64: 1, 1, 256>}, {transform_indices = @transform_2, window_bounds = array<i64: 1, 4, 256>}]} {
    %c0 = arith.constant 0 : index
    %c0_0 = arith.constant 0 : index
    %c0_1 = arith.constant 0 : index
    %0 = vector.load %arg3[%c0, %c0_0, %c0_1] : memref<1x1x256xf32, #tpu.memory_space<vmem>>, vector<1x1x256xf32>
    %1 = vector.shape_cast %0 : vector<1x1x256xf32> to vector<1x256xf32>
    %2 = vector.shape_cast %1 : vector<1x256xf32> to vector<1x256xf32>
    %3 = vector.broadcast %2 : vector<1x256xf32> to vector<4x256xf32>
    %c0_2 = arith.constant 0 : index
    %c0_3 = arith.constant 0 : index
    %c0_4 = arith.constant 0 : index
    %4 = vector.load %arg2[%c0_2, %c0_3, %c0_4] : memref<1x4x256xf32, #tpu.memory_space<vmem>>, vector<1x4x256xf32>
    %5 = vector.shape_cast %4 : vector<1x4x256xf32> to vector<4x256xf32>
    %6 = arith.mulf %5, %3 : vector<4x256xf32>
    %c0_5 = arith.constant 0 : index
    %c0_6 = arith.constant 0 : index
    %c0_7 = arith.constant 0 : index
    %7 = vector.load %arg4[%c0_5, %c0_6, %c0_7] : memref<1x4x256xf32, #tpu.memory_space<vmem>>, vector<1x4x256xf32>
    %8 = vector.shape_cast %7 : vector<1x4x256xf32> to vector<4x256xf32>
    %9 = vector.shape_cast %6 : vector<4x256xf32> to vector<1x4x256xf32>
    tpu.vector_store %arg4[%c0_5, %c0_6, %c0_7], %9 {strides = array<i32>} : memref<1x4x256xf32, #tpu.memory_space<vmem>>, vector<1x4x256xf32>,
    return
  }
  func.func @transform_0(%arg0: i32, %arg1: i32) -> (i32, i32, i32) {
    %c0_i32 = arith.constant 0 : i32
    %c0_i32_0 = arith.constant 0 : i32
    return %arg0, %arg1, %c0_i32 : i32, i32, i32
  }
  func.func @transform_1(%arg0: i32, %arg1: i32) -> (i32, i32, i32) {
    %c0_i32 = arith.constant 0 : i32
    %c0_i32_0 = arith.constant 0 : i32
    %c0_i32_1 = arith.constant 0 : i32
    return %arg0, %c0_i32, %c0_i32_0 : i32, i32, i32
  }
  func.func @transform_2(%arg0: i32, %arg1: i32) -> (i32, i32, i32) {
    %c0_i32 = arith.constant 0 : i32
    %c0_i32_0 = arith.constant 0 : i32
    return %arg0, %arg1, %c0_i32 : i32, i32, i32
  }
}

module attributes {stable_mosaic.version = 11 : i64} {
  func.func @conv_sigmoid_kernel(%arg0: i32, %arg1: memref<2x49xf32, #tpu.memory_space<smem>>, %arg2: memref<1x2x16x16xf32, #tpu.memory_space<vmem>>, %arg3: memref<1x16x16xf32, #tpu.memory_space<vmem>>, %arg4: memref<2x22x22xf32, #tpu.memory_space<vmem>>) attributes {dimension_semantics = [#tpu.dimension_semantics<parallel>], iteration_bounds = array<i64: 2>, scalar_prefetch = 0 : i64, scratch_operands = 1 : i64, tpu.core_type = #tpu.core_type<tc>, window_params = [{transform_indices = @transform_0, window_bounds = array<i64: 2, 49>}, {transform_indices = @transform_1, window_bounds = array<i64: 1, 2, 16, 16>}, {transform_indices = @transform_2, window_bounds = array<i64: 1, 16, 16>}]} {
    %cst = arith.constant 0.000000e+00 : f32
    %0 = vector.broadcast %cst : f32 to vector<2x22x22xf32>
    %c0 = arith.constant 0 : index
    %c0_0 = arith.constant 0 : index
    %c0_1 = arith.constant 0 : index
    %1 = vector.load %arg4[%c0, %c0_0, %c0_1] : memref<2x22x22xf32, #tpu.memory_space<vmem>>, vector<2x22x22xf32>
    tpu.vector_store %arg4[%c0, %c0_0, %c0_1], %0 {strides = array<i32>} : memref<2x22x22xf32, #tpu.memory_space<vmem>>, vector<2x22x22xf32>,
    %c0_2 = arith.constant 0 : index
    %c0_3 = arith.constant 0 : index
    %c0_4 = arith.constant 0 : index
    %c0_5 = arith.constant 0 : index
    %2 = vector.load %arg2[%c0_2, %c0_3, %c0_4, %c0_5] : memref<1x2x16x16xf32, #tpu.memory_space<vmem>>, vector<1x1x16x16xf32>
    %3 = vector.shape_cast %2 : vector<1x1x16x16xf32> to vector<16x16xf32>
    %c0_6 = arith.constant 0 : index
    %c3 = arith.constant 3 : index
    %c3_7 = arith.constant 3 : index
    %4 = vector.load %arg4[%c0_6, %c3, %c3_7] : memref<2x22x22xf32, #tpu.memory_space<vmem>>, vector<1x16x16xf32>
    %5 = vector.shape_cast %4 : vector<1x16x16xf32> to vector<16x16xf32>
    %6 = vector.shape_cast %3 : vector<16x16xf32> to vector<1x16x16xf32>
    tpu.vector_store %arg4[%c0_6, %c3, %c3_7], %6 {strides = array<i32>} : memref<2x22x22xf32, #tpu.memory_space<vmem>>, vector<1x16x16xf32>,
    %c0_8 = arith.constant 0 : index
    %c1 = arith.constant 1 : index
    %c0_9 = arith.constant 0 : index
    %c0_10 = arith.constant 0 : index
    %7 = vector.load %arg2[%c0_8, %c1, %c0_9, %c0_10] : memref<1x2x16x16xf32, #tpu.memory_space<vmem>>, vector<1x1x16x16xf32>
    %8 = vector.shape_cast %7 : vector<1x1x16x16xf32> to vector<16x16xf32>
    %c1_11 = arith.constant 1 : index
    %c3_12 = arith.constant 3 : index
    %c3_13 = arith.constant 3 : index
    %9 = vector.load %arg4[%c1_11, %c3_12, %c3_13] : memref<2x22x22xf32, #tpu.memory_space<vmem>>, vector<1x16x16xf32>
    %10 = vector.shape_cast %9 : vector<1x16x16xf32> to vector<16x16xf32>
    %11 = vector.shape_cast %8 : vector<16x16xf32> to vector<1x16x16xf32>
    tpu.vector_store %arg4[%c1_11, %c3_12, %c3_13], %11 {strides = array<i32>} : memref<2x22x22xf32, #tpu.memory_space<vmem>>, vector<1x16x16xf32>,
    %c0_14 = arith.constant 0 : index
    %c0_15 = arith.constant 0 : index
    %c0_16 = arith.constant 0 : index
    %12 = vector.load %arg4[%c0_14, %c0_15, %c0_16] : memref<2x22x22xf32, #tpu.memory_space<vmem>>, vector<1x22x22xf32>
    %13 = vector.shape_cast %12 : vector<1x22x22xf32> to vector<22x22xf32>
    %c1_17 = arith.constant 1 : index
    %c0_18 = arith.constant 0 : index
    %c0_19 = arith.constant 0 : index
    %14 = vector.load %arg4[%c1_17, %c0_18, %c0_19] : memref<2x22x22xf32, #tpu.memory_space<vmem>>, vector<1x22x22xf32>
    %15 = vector.shape_cast %14 : vector<1x22x22xf32> to vector<22x22xf32>
    %cst_20 = arith.constant 0.000000e+00 : f32
    %16 = vector.broadcast %cst_20 : f32 to vector<16x16xf32>
    %17 = vector.extract_strided_slice %13 {offsets = [0, 0], sizes = [22, 16], strides = [1, 1]} : vector<22x22xf32> to vector<22x16xf32>
    %18 = vector.extract_strided_slice %15 {offsets = [0, 0], sizes = [22, 16], strides = [1, 1]} : vector<22x22xf32> to vector<22x16xf32>
    %c0_21 = arith.constant 0 : index
    %c0_22 = arith.constant 0 : index
    %19 = memref.load %arg1[%c0_21, %c0_22] : memref<2x49xf32, #tpu.memory_space<smem>>
    %20 = vector.extract_strided_slice %17 {offsets = [0, 0], sizes = [16, 16], strides = [1, 1]} : vector<22x16xf32> to vector<16x16xf32>
    %21 = vector.broadcast %19 : f32 to vector<16x16xf32>
    %22 = arith.mulf %21, %20 : vector<16x16xf32>
    %23 = arith.addf %16, %22 : vector<16x16xf32>
    %c1_23 = arith.constant 1 : index
    %c0_24 = arith.constant 0 : index
    %24 = memref.load %arg1[%c1_23, %c0_24] : memref<2x49xf32, #tpu.memory_space<smem>>
    %25 = vector.extract_strided_slice %18 {offsets = [0, 0], sizes = [16, 16], strides = [1, 1]} : vector<22x16xf32> to vector<16x16xf32>
    %26 = vector.broadcast %24 : f32 to vector<16x16xf32>
    %27 = arith.mulf %26, %25 : vector<16x16xf32>
    %28 = arith.addf %23, %27 : vector<16x16xf32>
    %c0_25 = arith.constant 0 : index
    %c7 = arith.constant 7 : index
    %29 = memref.load %arg1[%c0_25, %c7] : memref<2x49xf32, #tpu.memory_space<smem>>
    %30 = vector.extract_strided_slice %17 {offsets = [1, 0], sizes = [16, 16], strides = [1, 1]} : vector<22x16xf32> to vector<16x16xf32>
    %31 = vector.broadcast %29 : f32 to vector<16x16xf32>
    %32 = arith.mulf %31, %30 : vector<16x16xf32>
    %33 = arith.addf %28, %32 : vector<16x16xf32>
    %c1_26 = arith.constant 1 : index
    %c7_27 = arith.constant 7 : index
    %34 = memref.load %arg1[%c1_26, %c7_27] : memref<2x49xf32, #tpu.memory_space<smem>>
    %35 = vector.extract_strided_slice %18 {offsets = [1, 0], sizes = [16, 16], strides = [1, 1]} : vector<22x16xf32> to vector<16x16xf32>
    %36 = vector.broadcast %34 : f32 to vector<16x16xf32>
    %37 = arith.mulf %36, %35 : vector<16x16xf32>
    %38 = arith.addf %33, %37 : vector<16x16xf32>
    %c0_28 = arith.constant 0 : index
    %c14 = arith.constant 14 : index
    %39 = memref.load %arg1[%c0_28, %c14] : memref<2x49xf32, #tpu.memory_space<smem>>
    %40 = vector.extract_strided_slice %17 {offsets = [2, 0], sizes = [16, 16], strides = [1, 1]} : vector<22x16xf32> to vector<16x16xf32>
    %41 = vector.broadcast %39 : f32 to vector<16x16xf32>
    %42 = arith.mulf %41, %40 : vector<16x16xf32>
    %43 = arith.addf %38, %42 : vector<16x16xf32>
    %c1_29 = arith.constant 1 : index
    %c14_30 = arith.constant 14 : index
    %44 = memref.load %arg1[%c1_29, %c14_30] : memref<2x49xf32, #tpu.memory_space<smem>>
    %45 = vector.extract_strided_slice %18 {offsets = [2, 0], sizes = [16, 16], strides = [1, 1]} : vector<22x16xf32> to vector<16x16xf32>
    %46 = vector.broadcast %44 : f32 to vector<16x16xf32>
    %47 = arith.mulf %46, %45 : vector<16x16xf32>
    %48 = arith.addf %43, %47 : vector<16x16xf32>
    %c0_31 = arith.constant 0 : index
    %c21 = arith.constant 21 : index
    %49 = memref.load %arg1[%c0_31, %c21] : memref<2x49xf32, #tpu.memory_space<smem>>
    %50 = vector.extract_strided_slice %17 {offsets = [3, 0], sizes = [16, 16], strides = [1, 1]} : vector<22x16xf32> to vector<16x16xf32>
    %51 = vector.broadcast %49 : f32 to vector<16x16xf32>
    %52 = arith.mulf %51, %50 : vector<16x16xf32>
    %53 = arith.addf %48, %52 : vector<16x16xf32>
    %c1_32 = arith.constant 1 : index
    %c21_33 = arith.constant 21 : index
    %54 = memref.load %arg1[%c1_32, %c21_33] : memref<2x49xf32, #tpu.memory_space<smem>>
    %55 = vector.extract_strided_slice %18 {offsets = [3, 0], sizes = [16, 16], strides = [1, 1]} : vector<22x16xf32> to vector<16x16xf32>
    %56 = vector.broadcast %54 : f32 to vector<16x16xf32>
    %57 = arith.mulf %56, %55 : vector<16x16xf32>
    %58 = arith.addf %53, %57 : vector<16x16xf32>
    %c0_34 = arith.constant 0 : index
    %c28 = arith.constant 28 : index
    %59 = memref.load %arg1[%c0_34, %c28] : memref<2x49xf32, #tpu.memory_space<smem>>
    %60 = vector.extract_strided_slice %17 {offsets = [4, 0], sizes = [16, 16], strides = [1, 1]} : vector<22x16xf32> to vector<16x16xf32>
    %61 = vector.broadcast %59 : f32 to vector<16x16xf32>
    %62 = arith.mulf %61, %60 : vector<16x16xf32>
    %63 = arith.addf %58, %62 : vector<16x16xf32>
    %c1_35 = arith.constant 1 : index
    %c28_36 = arith.constant 28 : index
    %64 = memref.load %arg1[%c1_35, %c28_36] : memref<2x49xf32, #tpu.memory_space<smem>>
    %65 = vector.extract_strided_slice %18 {offsets = [4, 0], sizes = [16, 16], strides = [1, 1]} : vector<22x16xf32> to vector<16x16xf32>
    %66 = vector.broadcast %64 : f32 to vector<16x16xf32>
    %67 = arith.mulf %66, %65 : vector<16x16xf32>
    %68 = arith.addf %63, %67 : vector<16x16xf32>
    %c0_37 = arith.constant 0 : index
    %c35 = arith.constant 35 : index
    %69 = memref.load %arg1[%c0_37, %c35] : memref<2x49xf32, #tpu.memory_space<smem>>
    %70 = vector.extract_strided_slice %17 {offsets = [5, 0], sizes = [16, 16], strides = [1, 1]} : vector<22x16xf32> to vector<16x16xf32>
    %71 = vector.broadcast %69 : f32 to vector<16x16xf32>
    %72 = arith.mulf %71, %70 : vector<16x16xf32>
    %73 = arith.addf %68, %72 : vector<16x16xf32>
    %c1_38 = arith.constant 1 : index
    %c35_39 = arith.constant 35 : index
    %74 = memref.load %arg1[%c1_38, %c35_39] : memref<2x49xf32, #tpu.memory_space<smem>>
    %75 = vector.extract_strided_slice %18 {offsets = [5, 0], sizes = [16, 16], strides = [1, 1]} : vector<22x16xf32> to vector<16x16xf32>
    %76 = vector.broadcast %74 : f32 to vector<16x16xf32>
    %77 = arith.mulf %76, %75 : vector<16x16xf32>
    %78 = arith.addf %73, %77 : vector<16x16xf32>
    %c0_40 = arith.constant 0 : index
    %c42 = arith.constant 42 : index
    %79 = memref.load %arg1[%c0_40, %c42] : memref<2x49xf32, #tpu.memory_space<smem>>
    %80 = vector.extract_strided_slice %17 {offsets = [6, 0], sizes = [16, 16], strides = [1, 1]} : vector<22x16xf32> to vector<16x16xf32>
    %81 = vector.broadcast %79 : f32 to vector<16x16xf32>
    %82 = arith.mulf %81, %80 : vector<16x16xf32>
    %83 = arith.addf %78, %82 : vector<16x16xf32>
    %c1_41 = arith.constant 1 : index
    %c42_42 = arith.constant 42 : index
    %84 = memref.load %arg1[%c1_41, %c42_42] : memref<2x49xf32, #tpu.memory_space<smem>>
    %85 = vector.extract_strided_slice %18 {offsets = [6, 0], sizes = [16, 16], strides = [1, 1]} : vector<22x16xf32> to vector<16x16xf32>
    %86 = vector.broadcast %84 : f32 to vector<16x16xf32>
    %87 = arith.mulf %86, %85 : vector<16x16xf32>
    %88 = arith.addf %83, %87 : vector<16x16xf32>
    %89 = vector.extract_strided_slice %13 {offsets = [0, 1], sizes = [22, 16], strides = [1, 1]} : vector<22x22xf32> to vector<22x16xf32>
    %90 = vector.extract_strided_slice %15 {offsets = [0, 1], sizes = [22, 16], strides = [1, 1]} : vector<22x22xf32> to vector<22x16xf32>
    %c0_43 = arith.constant 0 : index
    %c1_44 = arith.constant 1 : index
    %91 = memref.load %arg1[%c0_43, %c1_44] : memref<2x49xf32, #tpu.memory_space<smem>>
    %92 = vector.extract_strided_slice %89 {offsets = [0, 0], sizes = [16, 16], strides = [1, 1]} : vector<22x16xf32> to vector<16x16xf32>
    %93 = vector.broadcast %91 : f32 to vector<16x16xf32>
    %94 = arith.mulf %93, %92 : vector<16x16xf32>
    %95 = arith.addf %88, %94 : vector<16x16xf32>
    %c1_45 = arith.constant 1 : index
    %c1_46 = arith.constant 1 : index
    %96 = memref.load %arg1[%c1_45, %c1_46] : memref<2x49xf32, #tpu.memory_space<smem>>
    %97 = vector.extract_strided_slice %90 {offsets = [0, 0], sizes = [16, 16], strides = [1, 1]} : vector<22x16xf32> to vector<16x16xf32>
    %98 = vector.broadcast %96 : f32 to vector<16x16xf32>
    %99 = arith.mulf %98, %97 : vector<16x16xf32>
    %100 = arith.addf %95, %99 : vector<16x16xf32>
    %c0_47 = arith.constant 0 : index
    %c8 = arith.constant 8 : index
    %101 = memref.load %arg1[%c0_47, %c8] : memref<2x49xf32, #tpu.memory_space<smem>>
    %102 = vector.extract_strided_slice %89 {offsets = [1, 0], sizes = [16, 16], strides = [1, 1]} : vector<22x16xf32> to vector<16x16xf32>
    %103 = vector.broadcast %101 : f32 to vector<16x16xf32>
    %104 = arith.mulf %103, %102 : vector<16x16xf32>
    %105 = arith.addf %100, %104 : vector<16x16xf32>
    %c1_48 = arith.constant 1 : index
    %c8_49 = arith.constant 8 : index
    %106 = memref.load %arg1[%c1_48, %c8_49] : memref<2x49xf32, #tpu.memory_space<smem>>
    %107 = vector.extract_strided_slice %90 {offsets = [1, 0], sizes = [16, 16], strides = [1, 1]} : vector<22x16xf32> to vector<16x16xf32>
    %108 = vector.broadcast %106 : f32 to vector<16x16xf32>
    %109 = arith.mulf %108, %107 : vector<16x16xf32>
    %110 = arith.addf %105, %109 : vector<16x16xf32>
    %c0_50 = arith.constant 0 : index
    %c15 = arith.constant 15 : index
    %111 = memref.load %arg1[%c0_50, %c15] : memref<2x49xf32, #tpu.memory_space<smem>>
    %112 = vector.extract_strided_slice %89 {offsets = [2, 0], sizes = [16, 16], strides = [1, 1]} : vector<22x16xf32> to vector<16x16xf32>
    %113 = vector.broadcast %111 : f32 to vector<16x16xf32>
    %114 = arith.mulf %113, %112 : vector<16x16xf32>
    %115 = arith.addf %110, %114 : vector<16x16xf32>
    %c1_51 = arith.constant 1 : index
    %c15_52 = arith.constant 15 : index
    %116 = memref.load %arg1[%c1_51, %c15_52] : memref<2x49xf32, #tpu.memory_space<smem>>
    %117 = vector.extract_strided_slice %90 {offsets = [2, 0], sizes = [16, 16], strides = [1, 1]} : vector<22x16xf32> to vector<16x16xf32>
    %118 = vector.broadcast %116 : f32 to vector<16x16xf32>
    %119 = arith.mulf %118, %117 : vector<16x16xf32>
    %120 = arith.addf %115, %119 : vector<16x16xf32>
    %c0_53 = arith.constant 0 : index
    %c22 = arith.constant 22 : index
    %121 = memref.load %arg1[%c0_53, %c22] : memref<2x49xf32, #tpu.memory_space<smem>>
    %122 = vector.extract_strided_slice %89 {offsets = [3, 0], sizes = [16, 16], strides = [1, 1]} : vector<22x16xf32> to vector<16x16xf32>
    %123 = vector.broadcast %121 : f32 to vector<16x16xf32>
    %124 = arith.mulf %123, %122 : vector<16x16xf32>
    %125 = arith.addf %120, %124 : vector<16x16xf32>
    %c1_54 = arith.constant 1 : index
    %c22_55 = arith.constant 22 : index
    %126 = memref.load %arg1[%c1_54, %c22_55] : memref<2x49xf32, #tpu.memory_space<smem>>
    %127 = vector.extract_strided_slice %90 {offsets = [3, 0], sizes = [16, 16], strides = [1, 1]} : vector<22x16xf32> to vector<16x16xf32>
    %128 = vector.broadcast %126 : f32 to vector<16x16xf32>
    %129 = arith.mulf %128, %127 : vector<16x16xf32>
    %130 = arith.addf %125, %129 : vector<16x16xf32>
    %c0_56 = arith.constant 0 : index
    %c29 = arith.constant 29 : index
    %131 = memref.load %arg1[%c0_56, %c29] : memref<2x49xf32, #tpu.memory_space<smem>>
    %132 = vector.extract_strided_slice %89 {offsets = [4, 0], sizes = [16, 16], strides = [1, 1]} : vector<22x16xf32> to vector<16x16xf32>
    %133 = vector.broadcast %131 : f32 to vector<16x16xf32>
    %134 = arith.mulf %133, %132 : vector<16x16xf32>
    %135 = arith.addf %130, %134 : vector<16x16xf32>
    %c1_57 = arith.constant 1 : index
    %c29_58 = arith.constant 29 : index
    %136 = memref.load %arg1[%c1_57, %c29_58] : memref<2x49xf32, #tpu.memory_space<smem>>
    %137 = vector.extract_strided_slice %90 {offsets = [4, 0], sizes = [16, 16], strides = [1, 1]} : vector<22x16xf32> to vector<16x16xf32>
    %138 = vector.broadcast %136 : f32 to vector<16x16xf32>
    %139 = arith.mulf %138, %137 : vector<16x16xf32>
    %140 = arith.addf %135, %139 : vector<16x16xf32>
    %c0_59 = arith.constant 0 : index
    %c36 = arith.constant 36 : index
    %141 = memref.load %arg1[%c0_59, %c36] : memref<2x49xf32, #tpu.memory_space<smem>>
    %142 = vector.extract_strided_slice %89 {offsets = [5, 0], sizes = [16, 16], strides = [1, 1]} : vector<22x16xf32> to vector<16x16xf32>
    %143 = vector.broadcast %141 : f32 to vector<16x16xf32>
    %144 = arith.mulf %143, %142 : vector<16x16xf32>
    %145 = arith.addf %140, %144 : vector<16x16xf32>
    %c1_60 = arith.constant 1 : index
    %c36_61 = arith.constant 36 : index
    %146 = memref.load %arg1[%c1_60, %c36_61] : memref<2x49xf32, #tpu.memory_space<smem>>
    %147 = vector.extract_strided_slice %90 {offsets = [5, 0], sizes = [16, 16], strides = [1, 1]} : vector<22x16xf32> to vector<16x16xf32>
    %148 = vector.broadcast %146 : f32 to vector<16x16xf32>
    %149 = arith.mulf %148, %147 : vector<16x16xf32>
    %150 = arith.addf %145, %149 : vector<16x16xf32>
    %c0_62 = arith.constant 0 : index
    %c43 = arith.constant 43 : index
    %151 = memref.load %arg1[%c0_62, %c43] : memref<2x49xf32, #tpu.memory_space<smem>>
    %152 = vector.extract_strided_slice %89 {offsets = [6, 0], sizes = [16, 16], strides = [1, 1]} : vector<22x16xf32> to vector<16x16xf32>
    %153 = vector.broadcast %151 : f32 to vector<16x16xf32>
    %154 = arith.mulf %153, %152 : vector<16x16xf32>
    %155 = arith.addf %150, %154 : vector<16x16xf32>
    %c1_63 = arith.constant 1 : index
    %c43_64 = arith.constant 43 : index
    %156 = memref.load %arg1[%c1_63, %c43_64] : memref<2x49xf32, #tpu.memory_space<smem>>
    %157 = vector.extract_strided_slice %90 {offsets = [6, 0], sizes = [16, 16], strides = [1, 1]} : vector<22x16xf32> to vector<16x16xf32>
    %158 = vector.broadcast %156 : f32 to vector<16x16xf32>
    %159 = arith.mulf %158, %157 : vector<16x16xf32>
    %160 = arith.addf %155, %159 : vector<16x16xf32>
    %161 = vector.extract_strided_slice %13 {offsets = [0, 2], sizes = [22, 16], strides = [1, 1]} : vector<22x22xf32> to vector<22x16xf32>
    %162 = vector.extract_strided_slice %15 {offsets = [0, 2], sizes = [22, 16], strides = [1, 1]} : vector<22x22xf32> to vector<22x16xf32>
    %c0_65 = arith.constant 0 : index
    %c2 = arith.constant 2 : index
    %163 = memref.load %arg1[%c0_65, %c2] : memref<2x49xf32, #tpu.memory_space<smem>>
    %164 = vector.extract_strided_slice %161 {offsets = [0, 0], sizes = [16, 16], strides = [1, 1]} : vector<22x16xf32> to vector<16x16xf32>
    %165 = vector.broadcast %163 : f32 to vector<16x16xf32>
    %166 = arith.mulf %165, %164 : vector<16x16xf32>
    %167 = arith.addf %160, %166 : vector<16x16xf32>
    %c1_66 = arith.constant 1 : index
    %c2_67 = arith.constant 2 : index
    %168 = memref.load %arg1[%c1_66, %c2_67] : memref<2x49xf32, #tpu.memory_space<smem>>
    %169 = vector.extract_strided_slice %162 {offsets = [0, 0], sizes = [16, 16], strides = [1, 1]} : vector<22x16xf32> to vector<16x16xf32>
    %170 = vector.broadcast %168 : f32 to vector<16x16xf32>
    %171 = arith.mulf %170, %169 : vector<16x16xf32>
    %172 = arith.addf %167, %171 : vector<16x16xf32>
    %c0_68 = arith.constant 0 : index
    %c9 = arith.constant 9 : index
    %173 = memref.load %arg1[%c0_68, %c9] : memref<2x49xf32, #tpu.memory_space<smem>>
    %174 = vector.extract_strided_slice %161 {offsets = [1, 0], sizes = [16, 16], strides = [1, 1]} : vector<22x16xf32> to vector<16x16xf32>
    %175 = vector.broadcast %173 : f32 to vector<16x16xf32>
    %176 = arith.mulf %175, %174 : vector<16x16xf32>
    %177 = arith.addf %172, %176 : vector<16x16xf32>
    %c1_69 = arith.constant 1 : index
    %c9_70 = arith.constant 9 : index
    %178 = memref.load %arg1[%c1_69, %c9_70] : memref<2x49xf32, #tpu.memory_space<smem>>
    %179 = vector.extract_strided_slice %162 {offsets = [1, 0], sizes = [16, 16], strides = [1, 1]} : vector<22x16xf32> to vector<16x16xf32>
    %180 = vector.broadcast %178 : f32 to vector<16x16xf32>
    %181 = arith.mulf %180, %179 : vector<16x16xf32>
    %182 = arith.addf %177, %181 : vector<16x16xf32>
    %c0_71 = arith.constant 0 : index
    %c16 = arith.constant 16 : index
    %183 = memref.load %arg1[%c0_71, %c16] : memref<2x49xf32, #tpu.memory_space<smem>>
    %184 = vector.extract_strided_slice %161 {offsets = [2, 0], sizes = [16, 16], strides = [1, 1]} : vector<22x16xf32> to vector<16x16xf32>
    %185 = vector.broadcast %183 : f32 to vector<16x16xf32>
    %186 = arith.mulf %185, %184 : vector<16x16xf32>
    %187 = arith.addf %182, %186 : vector<16x16xf32>
    %c1_72 = arith.constant 1 : index
    %c16_73 = arith.constant 16 : index
    %188 = memref.load %arg1[%c1_72, %c16_73] : memref<2x49xf32, #tpu.memory_space<smem>>
    %189 = vector.extract_strided_slice %162 {offsets = [2, 0], sizes = [16, 16], strides = [1, 1]} : vector<22x16xf32> to vector<16x16xf32>
    %190 = vector.broadcast %188 : f32 to vector<16x16xf32>
    %191 = arith.mulf %190, %189 : vector<16x16xf32>
    %192 = arith.addf %187, %191 : vector<16x16xf32>
    %c0_74 = arith.constant 0 : index
    %c23 = arith.constant 23 : index
    %193 = memref.load %arg1[%c0_74, %c23] : memref<2x49xf32, #tpu.memory_space<smem>>
    %194 = vector.extract_strided_slice %161 {offsets = [3, 0], sizes = [16, 16], strides = [1, 1]} : vector<22x16xf32> to vector<16x16xf32>
    %195 = vector.broadcast %193 : f32 to vector<16x16xf32>
    %196 = arith.mulf %195, %194 : vector<16x16xf32>
    %197 = arith.addf %192, %196 : vector<16x16xf32>
    %c1_75 = arith.constant 1 : index
    %c23_76 = arith.constant 23 : index
    %198 = memref.load %arg1[%c1_75, %c23_76] : memref<2x49xf32, #tpu.memory_space<smem>>
    %199 = vector.extract_strided_slice %162 {offsets = [3, 0], sizes = [16, 16], strides = [1, 1]} : vector<22x16xf32> to vector<16x16xf32>
    %200 = vector.broadcast %198 : f32 to vector<16x16xf32>
    %201 = arith.mulf %200, %199 : vector<16x16xf32>
    %202 = arith.addf %197, %201 : vector<16x16xf32>
    %c0_77 = arith.constant 0 : index
    %c30 = arith.constant 30 : index
    %203 = memref.load %arg1[%c0_77, %c30] : memref<2x49xf32, #tpu.memory_space<smem>>
    %204 = vector.extract_strided_slice %161 {offsets = [4, 0], sizes = [16, 16], strides = [1, 1]} : vector<22x16xf32> to vector<16x16xf32>
    %205 = vector.broadcast %203 : f32 to vector<16x16xf32>
    %206 = arith.mulf %205, %204 : vector<16x16xf32>
    %207 = arith.addf %202, %206 : vector<16x16xf32>
    %c1_78 = arith.constant 1 : index
    %c30_79 = arith.constant 30 : index
    %208 = memref.load %arg1[%c1_78, %c30_79] : memref<2x49xf32, #tpu.memory_space<smem>>
    %209 = vector.extract_strided_slice %162 {offsets = [4, 0], sizes = [16, 16], strides = [1, 1]} : vector<22x16xf32> to vector<16x16xf32>
    %210 = vector.broadcast %208 : f32 to vector<16x16xf32>
    %211 = arith.mulf %210, %209 : vector<16x16xf32>
    %212 = arith.addf %207, %211 : vector<16x16xf32>
    %c0_80 = arith.constant 0 : index
    %c37 = arith.constant 37 : index
    %213 = memref.load %arg1[%c0_80, %c37] : memref<2x49xf32, #tpu.memory_space<smem>>
    %214 = vector.extract_strided_slice %161 {offsets = [5, 0], sizes = [16, 16], strides = [1, 1]} : vector<22x16xf32> to vector<16x16xf32>
    %215 = vector.broadcast %213 : f32 to vector<16x16xf32>
    %216 = arith.mulf %215, %214 : vector<16x16xf32>
    %217 = arith.addf %212, %216 : vector<16x16xf32>
    %c1_81 = arith.constant 1 : index
    %c37_82 = arith.constant 37 : index
    %218 = memref.load %arg1[%c1_81, %c37_82] : memref<2x49xf32, #tpu.memory_space<smem>>
    %219 = vector.extract_strided_slice %162 {offsets = [5, 0], sizes = [16, 16], strides = [1, 1]} : vector<22x16xf32> to vector<16x16xf32>
    %220 = vector.broadcast %218 : f32 to vector<16x16xf32>
    %221 = arith.mulf %220, %219 : vector<16x16xf32>
    %222 = arith.addf %217, %221 : vector<16x16xf32>
    %c0_83 = arith.constant 0 : index
    %c44 = arith.constant 44 : index
    %223 = memref.load %arg1[%c0_83, %c44] : memref<2x49xf32, #tpu.memory_space<smem>>
    %224 = vector.extract_strided_slice %161 {offsets = [6, 0], sizes = [16, 16], strides = [1, 1]} : vector<22x16xf32> to vector<16x16xf32>
    %225 = vector.broadcast %223 : f32 to vector<16x16xf32>
    %226 = arith.mulf %225, %224 : vector<16x16xf32>
    %227 = arith.addf %222, %226 : vector<16x16xf32>
    %c1_84 = arith.constant 1 : index
    %c44_85 = arith.constant 44 : index
    %228 = memref.load %arg1[%c1_84, %c44_85] : memref<2x49xf32, #tpu.memory_space<smem>>
    %229 = vector.extract_strided_slice %162 {offsets = [6, 0], sizes = [16, 16], strides = [1, 1]} : vector<22x16xf32> to vector<16x16xf32>
    %230 = vector.broadcast %228 : f32 to vector<16x16xf32>
    %231 = arith.mulf %230, %229 : vector<16x16xf32>
    %232 = arith.addf %227, %231 : vector<16x16xf32>
    %233 = vector.extract_strided_slice %13 {offsets = [0, 3], sizes = [22, 16], strides = [1, 1]} : vector<22x22xf32> to vector<22x16xf32>
    %234 = vector.extract_strided_slice %15 {offsets = [0, 3], sizes = [22, 16], strides = [1, 1]} : vector<22x22xf32> to vector<22x16xf32>
    %c0_86 = arith.constant 0 : index
    %c3_87 = arith.constant 3 : index
    %235 = memref.load %arg1[%c0_86, %c3_87] : memref<2x49xf32, #tpu.memory_space<smem>>
    %236 = vector.extract_strided_slice %233 {offsets = [0, 0], sizes = [16, 16], strides = [1, 1]} : vector<22x16xf32> to vector<16x16xf32>
    %237 = vector.broadcast %235 : f32 to vector<16x16xf32>
    %238 = arith.mulf %237, %236 : vector<16x16xf32>
    %239 = arith.addf %232, %238 : vector<16x16xf32>
    %c1_88 = arith.constant 1 : index
    %c3_89 = arith.constant 3 : index
    %240 = memref.load %arg1[%c1_88, %c3_89] : memref<2x49xf32, #tpu.memory_space<smem>>
    %241 = vector.extract_strided_slice %234 {offsets = [0, 0], sizes = [16, 16], strides = [1, 1]} : vector<22x16xf32> to vector<16x16xf32>
    %242 = vector.broadcast %240 : f32 to vector<16x16xf32>
    %243 = arith.mulf %242, %241 : vector<16x16xf32>
    %244 = arith.addf %239, %243 : vector<16x16xf32>
    %c0_90 = arith.constant 0 : index
    %c10 = arith.constant 10 : index
    %245 = memref.load %arg1[%c0_90, %c10] : memref<2x49xf32, #tpu.memory_space<smem>>
    %246 = vector.extract_strided_slice %233 {offsets = [1, 0], sizes = [16, 16], strides = [1, 1]} : vector<22x16xf32> to vector<16x16xf32>
    %247 = vector.broadcast %245 : f32 to vector<16x16xf32>
    %248 = arith.mulf %247, %246 : vector<16x16xf32>
    %249 = arith.addf %244, %248 : vector<16x16xf32>
    %c1_91 = arith.constant 1 : index
    %c10_92 = arith.constant 10 : index
    %250 = memref.load %arg1[%c1_91, %c10_92] : memref<2x49xf32, #tpu.memory_space<smem>>
    %251 = vector.extract_strided_slice %234 {offsets = [1, 0], sizes = [16, 16], strides = [1, 1]} : vector<22x16xf32> to vector<16x16xf32>
    %252 = vector.broadcast %250 : f32 to vector<16x16xf32>
    %253 = arith.mulf %252, %251 : vector<16x16xf32>
    %254 = arith.addf %249, %253 : vector<16x16xf32>
    %c0_93 = arith.constant 0 : index
    %c17 = arith.constant 17 : index
    %255 = memref.load %arg1[%c0_93, %c17] : memref<2x49xf32, #tpu.memory_space<smem>>
    %256 = vector.extract_strided_slice %233 {offsets = [2, 0], sizes = [16, 16], strides = [1, 1]} : vector<22x16xf32> to vector<16x16xf32>
    %257 = vector.broadcast %255 : f32 to vector<16x16xf32>
    %258 = arith.mulf %257, %256 : vector<16x16xf32>
    %259 = arith.addf %254, %258 : vector<16x16xf32>
    %c1_94 = arith.constant 1 : index
    %c17_95 = arith.constant 17 : index
    %260 = memref.load %arg1[%c1_94, %c17_95] : memref<2x49xf32, #tpu.memory_space<smem>>
    %261 = vector.extract_strided_slice %234 {offsets = [2, 0], sizes = [16, 16], strides = [1, 1]} : vector<22x16xf32> to vector<16x16xf32>
    %262 = vector.broadcast %260 : f32 to vector<16x16xf32>
    %263 = arith.mulf %262, %261 : vector<16x16xf32>
    %264 = arith.addf %259, %263 : vector<16x16xf32>
    %c0_96 = arith.constant 0 : index
    %c24 = arith.constant 24 : index
    %265 = memref.load %arg1[%c0_96, %c24] : memref<2x49xf32, #tpu.memory_space<smem>>
    %266 = vector.extract_strided_slice %233 {offsets = [3, 0], sizes = [16, 16], strides = [1, 1]} : vector<22x16xf32> to vector<16x16xf32>
    %267 = vector.broadcast %265 : f32 to vector<16x16xf32>
    %268 = arith.mulf %267, %266 : vector<16x16xf32>
    %269 = arith.addf %264, %268 : vector<16x16xf32>
    %c1_97 = arith.constant 1 : index
    %c24_98 = arith.constant 24 : index
    %270 = memref.load %arg1[%c1_97, %c24_98] : memref<2x49xf32, #tpu.memory_space<smem>>
    %271 = vector.extract_strided_slice %234 {offsets = [3, 0], sizes = [16, 16], strides = [1, 1]} : vector<22x16xf32> to vector<16x16xf32>
    %272 = vector.broadcast %270 : f32 to vector<16x16xf32>
    %273 = arith.mulf %272, %271 : vector<16x16xf32>
    %274 = arith.addf %269, %273 : vector<16x16xf32>
    %c0_99 = arith.constant 0 : index
    %c31 = arith.constant 31 : index
    %275 = memref.load %arg1[%c0_99, %c31] : memref<2x49xf32, #tpu.memory_space<smem>>
    %276 = vector.extract_strided_slice %233 {offsets = [4, 0], sizes = [16, 16], strides = [1, 1]} : vector<22x16xf32> to vector<16x16xf32>
    %277 = vector.broadcast %275 : f32 to vector<16x16xf32>
    %278 = arith.mulf %277, %276 : vector<16x16xf32>
    %279 = arith.addf %274, %278 : vector<16x16xf32>
    %c1_100 = arith.constant 1 : index
    %c31_101 = arith.constant 31 : index
    %280 = memref.load %arg1[%c1_100, %c31_101] : memref<2x49xf32, #tpu.memory_space<smem>>
    %281 = vector.extract_strided_slice %234 {offsets = [4, 0], sizes = [16, 16], strides = [1, 1]} : vector<22x16xf32> to vector<16x16xf32>
    %282 = vector.broadcast %280 : f32 to vector<16x16xf32>
    %283 = arith.mulf %282, %281 : vector<16x16xf32>
    %284 = arith.addf %279, %283 : vector<16x16xf32>
    %c0_102 = arith.constant 0 : index
    %c38 = arith.constant 38 : index
    %285 = memref.load %arg1[%c0_102, %c38] : memref<2x49xf32, #tpu.memory_space<smem>>
    %286 = vector.extract_strided_slice %233 {offsets = [5, 0], sizes = [16, 16], strides = [1, 1]} : vector<22x16xf32> to vector<16x16xf32>
    %287 = vector.broadcast %285 : f32 to vector<16x16xf32>
    %288 = arith.mulf %287, %286 : vector<16x16xf32>
    %289 = arith.addf %284, %288 : vector<16x16xf32>
    %c1_103 = arith.constant 1 : index
    %c38_104 = arith.constant 38 : index
    %290 = memref.load %arg1[%c1_103, %c38_104] : memref<2x49xf32, #tpu.memory_space<smem>>
    %291 = vector.extract_strided_slice %234 {offsets = [5, 0], sizes = [16, 16], strides = [1, 1]} : vector<22x16xf32> to vector<16x16xf32>
    %292 = vector.broadcast %290 : f32 to vector<16x16xf32>
    %293 = arith.mulf %292, %291 : vector<16x16xf32>
    %294 = arith.addf %289, %293 : vector<16x16xf32>
    %c0_105 = arith.constant 0 : index
    %c45 = arith.constant 45 : index
    %295 = memref.load %arg1[%c0_105, %c45] : memref<2x49xf32, #tpu.memory_space<smem>>
    %296 = vector.extract_strided_slice %233 {offsets = [6, 0], sizes = [16, 16], strides = [1, 1]} : vector<22x16xf32> to vector<16x16xf32>
    %297 = vector.broadcast %295 : f32 to vector<16x16xf32>
    %298 = arith.mulf %297, %296 : vector<16x16xf32>
    %299 = arith.addf %294, %298 : vector<16x16xf32>
    %c1_106 = arith.constant 1 : index
    %c45_107 = arith.constant 45 : index
    %300 = memref.load %arg1[%c1_106, %c45_107] : memref<2x49xf32, #tpu.memory_space<smem>>
    %301 = vector.extract_strided_slice %234 {offsets = [6, 0], sizes = [16, 16], strides = [1, 1]} : vector<22x16xf32> to vector<16x16xf32>
    %302 = vector.broadcast %300 : f32 to vector<16x16xf32>
    %303 = arith.mulf %302, %301 : vector<16x16xf32>
    %304 = arith.addf %299, %303 : vector<16x16xf32>
    %305 = vector.extract_strided_slice %13 {offsets = [0, 4], sizes = [22, 16], strides = [1, 1]} : vector<22x22xf32> to vector<22x16xf32>
    %306 = vector.extract_strided_slice %15 {offsets = [0, 4], sizes = [22, 16], strides = [1, 1]} : vector<22x22xf32> to vector<22x16xf32>
    %c0_108 = arith.constant 0 : index
    %c4 = arith.constant 4 : index
    %307 = memref.load %arg1[%c0_108, %c4] : memref<2x49xf32, #tpu.memory_space<smem>>
    %308 = vector.extract_strided_slice %305 {offsets = [0, 0], sizes = [16, 16], strides = [1, 1]} : vector<22x16xf32> to vector<16x16xf32>
    %309 = vector.broadcast %307 : f32 to vector<16x16xf32>
    %310 = arith.mulf %309, %308 : vector<16x16xf32>
    %311 = arith.addf %304, %310 : vector<16x16xf32>
    %c1_109 = arith.constant 1 : index
    %c4_110 = arith.constant 4 : index
    %312 = memref.load %arg1[%c1_109, %c4_110] : memref<2x49xf32, #tpu.memory_space<smem>>
    %313 = vector.extract_strided_slice %306 {offsets = [0, 0], sizes = [16, 16], strides = [1, 1]} : vector<22x16xf32> to vector<16x16xf32>
    %314 = vector.broadcast %312 : f32 to vector<16x16xf32>
    %315 = arith.mulf %314, %313 : vector<16x16xf32>
    %316 = arith.addf %311, %315 : vector<16x16xf32>
    %c0_111 = arith.constant 0 : index
    %c11 = arith.constant 11 : index
    %317 = memref.load %arg1[%c0_111, %c11] : memref<2x49xf32, #tpu.memory_space<smem>>
    %318 = vector.extract_strided_slice %305 {offsets = [1, 0], sizes = [16, 16], strides = [1, 1]} : vector<22x16xf32> to vector<16x16xf32>
    %319 = vector.broadcast %317 : f32 to vector<16x16xf32>
    %320 = arith.mulf %319, %318 : vector<16x16xf32>
    %321 = arith.addf %316, %320 : vector<16x16xf32>
    %c1_112 = arith.constant 1 : index
    %c11_113 = arith.constant 11 : index
    %322 = memref.load %arg1[%c1_112, %c11_113] : memref<2x49xf32, #tpu.memory_space<smem>>
    %323 = vector.extract_strided_slice %306 {offsets = [1, 0], sizes = [16, 16], strides = [1, 1]} : vector<22x16xf32> to vector<16x16xf32>
    %324 = vector.broadcast %322 : f32 to vector<16x16xf32>
    %325 = arith.mulf %324, %323 : vector<16x16xf32>
    %326 = arith.addf %321, %325 : vector<16x16xf32>
    %c0_114 = arith.constant 0 : index
    %c18 = arith.constant 18 : index
    %327 = memref.load %arg1[%c0_114, %c18] : memref<2x49xf32, #tpu.memory_space<smem>>
    %328 = vector.extract_strided_slice %305 {offsets = [2, 0], sizes = [16, 16], strides = [1, 1]} : vector<22x16xf32> to vector<16x16xf32>
    %329 = vector.broadcast %327 : f32 to vector<16x16xf32>
    %330 = arith.mulf %329, %328 : vector<16x16xf32>
    %331 = arith.addf %326, %330 : vector<16x16xf32>
    %c1_115 = arith.constant 1 : index
    %c18_116 = arith.constant 18 : index
    %332 = memref.load %arg1[%c1_115, %c18_116] : memref<2x49xf32, #tpu.memory_space<smem>>
    %333 = vector.extract_strided_slice %306 {offsets = [2, 0], sizes = [16, 16], strides = [1, 1]} : vector<22x16xf32> to vector<16x16xf32>
    %334 = vector.broadcast %332 : f32 to vector<16x16xf32>
    %335 = arith.mulf %334, %333 : vector<16x16xf32>
    %336 = arith.addf %331, %335 : vector<16x16xf32>
    %c0_117 = arith.constant 0 : index
    %c25 = arith.constant 25 : index
    %337 = memref.load %arg1[%c0_117, %c25] : memref<2x49xf32, #tpu.memory_space<smem>>
    %338 = vector.extract_strided_slice %305 {offsets = [3, 0], sizes = [16, 16], strides = [1, 1]} : vector<22x16xf32> to vector<16x16xf32>
    %339 = vector.broadcast %337 : f32 to vector<16x16xf32>
    %340 = arith.mulf %339, %338 : vector<16x16xf32>
    %341 = arith.addf %336, %340 : vector<16x16xf32>
    %c1_118 = arith.constant 1 : index
    %c25_119 = arith.constant 25 : index
    %342 = memref.load %arg1[%c1_118, %c25_119] : memref<2x49xf32, #tpu.memory_space<smem>>
    %343 = vector.extract_strided_slice %306 {offsets = [3, 0], sizes = [16, 16], strides = [1, 1]} : vector<22x16xf32> to vector<16x16xf32>
    %344 = vector.broadcast %342 : f32 to vector<16x16xf32>
    %345 = arith.mulf %344, %343 : vector<16x16xf32>
    %346 = arith.addf %341, %345 : vector<16x16xf32>
    %c0_120 = arith.constant 0 : index
    %c32 = arith.constant 32 : index
    %347 = memref.load %arg1[%c0_120, %c32] : memref<2x49xf32, #tpu.memory_space<smem>>
    %348 = vector.extract_strided_slice %305 {offsets = [4, 0], sizes = [16, 16], strides = [1, 1]} : vector<22x16xf32> to vector<16x16xf32>
    %349 = vector.broadcast %347 : f32 to vector<16x16xf32>
    %350 = arith.mulf %349, %348 : vector<16x16xf32>
    %351 = arith.addf %346, %350 : vector<16x16xf32>
    %c1_121 = arith.constant 1 : index
    %c32_122 = arith.constant 32 : index
    %352 = memref.load %arg1[%c1_121, %c32_122] : memref<2x49xf32, #tpu.memory_space<smem>>
    %353 = vector.extract_strided_slice %306 {offsets = [4, 0], sizes = [16, 16], strides = [1, 1]} : vector<22x16xf32> to vector<16x16xf32>
    %354 = vector.broadcast %352 : f32 to vector<16x16xf32>
    %355 = arith.mulf %354, %353 : vector<16x16xf32>
    %356 = arith.addf %351, %355 : vector<16x16xf32>
    %c0_123 = arith.constant 0 : index
    %c39 = arith.constant 39 : index
    %357 = memref.load %arg1[%c0_123, %c39] : memref<2x49xf32, #tpu.memory_space<smem>>
    %358 = vector.extract_strided_slice %305 {offsets = [5, 0], sizes = [16, 16], strides = [1, 1]} : vector<22x16xf32> to vector<16x16xf32>
    %359 = vector.broadcast %357 : f32 to vector<16x16xf32>
    %360 = arith.mulf %359, %358 : vector<16x16xf32>
    %361 = arith.addf %356, %360 : vector<16x16xf32>
    %c1_124 = arith.constant 1 : index
    %c39_125 = arith.constant 39 : index
    %362 = memref.load %arg1[%c1_124, %c39_125] : memref<2x49xf32, #tpu.memory_space<smem>>
    %363 = vector.extract_strided_slice %306 {offsets = [5, 0], sizes = [16, 16], strides = [1, 1]} : vector<22x16xf32> to vector<16x16xf32>
    %364 = vector.broadcast %362 : f32 to vector<16x16xf32>
    %365 = arith.mulf %364, %363 : vector<16x16xf32>
    %366 = arith.addf %361, %365 : vector<16x16xf32>
    %c0_126 = arith.constant 0 : index
    %c46 = arith.constant 46 : index
    %367 = memref.load %arg1[%c0_126, %c46] : memref<2x49xf32, #tpu.memory_space<smem>>
    %368 = vector.extract_strided_slice %305 {offsets = [6, 0], sizes = [16, 16], strides = [1, 1]} : vector<22x16xf32> to vector<16x16xf32>
    %369 = vector.broadcast %367 : f32 to vector<16x16xf32>
    %370 = arith.mulf %369, %368 : vector<16x16xf32>
    %371 = arith.addf %366, %370 : vector<16x16xf32>
    %c1_127 = arith.constant 1 : index
    %c46_128 = arith.constant 46 : index
    %372 = memref.load %arg1[%c1_127, %c46_128] : memref<2x49xf32, #tpu.memory_space<smem>>
    %373 = vector.extract_strided_slice %306 {offsets = [6, 0], sizes = [16, 16], strides = [1, 1]} : vector<22x16xf32> to vector<16x16xf32>
    %374 = vector.broadcast %372 : f32 to vector<16x16xf32>
    %375 = arith.mulf %374, %373 : vector<16x16xf32>
    %376 = arith.addf %371, %375 : vector<16x16xf32>
    %377 = vector.extract_strided_slice %13 {offsets = [0, 5], sizes = [22, 16], strides = [1, 1]} : vector<22x22xf32> to vector<22x16xf32>
    %378 = vector.extract_strided_slice %15 {offsets = [0, 5], sizes = [22, 16], strides = [1, 1]} : vector<22x22xf32> to vector<22x16xf32>
    %c0_129 = arith.constant 0 : index
    %c5 = arith.constant 5 : index
    %379 = memref.load %arg1[%c0_129, %c5] : memref<2x49xf32, #tpu.memory_space<smem>>
    %380 = vector.extract_strided_slice %377 {offsets = [0, 0], sizes = [16, 16], strides = [1, 1]} : vector<22x16xf32> to vector<16x16xf32>
    %381 = vector.broadcast %379 : f32 to vector<16x16xf32>
    %382 = arith.mulf %381, %380 : vector<16x16xf32>
    %383 = arith.addf %376, %382 : vector<16x16xf32>
    %c1_130 = arith.constant 1 : index
    %c5_131 = arith.constant 5 : index
    %384 = memref.load %arg1[%c1_130, %c5_131] : memref<2x49xf32, #tpu.memory_space<smem>>
    %385 = vector.extract_strided_slice %378 {offsets = [0, 0], sizes = [16, 16], strides = [1, 1]} : vector<22x16xf32> to vector<16x16xf32>
    %386 = vector.broadcast %384 : f32 to vector<16x16xf32>
    %387 = arith.mulf %386, %385 : vector<16x16xf32>
    %388 = arith.addf %383, %387 : vector<16x16xf32>
    %c0_132 = arith.constant 0 : index
    %c12 = arith.constant 12 : index
    %389 = memref.load %arg1[%c0_132, %c12] : memref<2x49xf32, #tpu.memory_space<smem>>
    %390 = vector.extract_strided_slice %377 {offsets = [1, 0], sizes = [16, 16], strides = [1, 1]} : vector<22x16xf32> to vector<16x16xf32>
    %391 = vector.broadcast %389 : f32 to vector<16x16xf32>
    %392 = arith.mulf %391, %390 : vector<16x16xf32>
    %393 = arith.addf %388, %392 : vector<16x16xf32>
    %c1_133 = arith.constant 1 : index
    %c12_134 = arith.constant 12 : index
    %394 = memref.load %arg1[%c1_133, %c12_134] : memref<2x49xf32, #tpu.memory_space<smem>>
    %395 = vector.extract_strided_slice %378 {offsets = [1, 0], sizes = [16, 16], strides = [1, 1]} : vector<22x16xf32> to vector<16x16xf32>
    %396 = vector.broadcast %394 : f32 to vector<16x16xf32>
    %397 = arith.mulf %396, %395 : vector<16x16xf32>
    %398 = arith.addf %393, %397 : vector<16x16xf32>
    %c0_135 = arith.constant 0 : index
    %c19 = arith.constant 19 : index
    %399 = memref.load %arg1[%c0_135, %c19] : memref<2x49xf32, #tpu.memory_space<smem>>
    %400 = vector.extract_strided_slice %377 {offsets = [2, 0], sizes = [16, 16], strides = [1, 1]} : vector<22x16xf32> to vector<16x16xf32>
    %401 = vector.broadcast %399 : f32 to vector<16x16xf32>
    %402 = arith.mulf %401, %400 : vector<16x16xf32>
    %403 = arith.addf %398, %402 : vector<16x16xf32>
    %c1_136 = arith.constant 1 : index
    %c19_137 = arith.constant 19 : index
    %404 = memref.load %arg1[%c1_136, %c19_137] : memref<2x49xf32, #tpu.memory_space<smem>>
    %405 = vector.extract_strided_slice %378 {offsets = [2, 0], sizes = [16, 16], strides = [1, 1]} : vector<22x16xf32> to vector<16x16xf32>
    %406 = vector.broadcast %404 : f32 to vector<16x16xf32>
    %407 = arith.mulf %406, %405 : vector<16x16xf32>
    %408 = arith.addf %403, %407 : vector<16x16xf32>
    %c0_138 = arith.constant 0 : index
    %c26 = arith.constant 26 : index
    %409 = memref.load %arg1[%c0_138, %c26] : memref<2x49xf32, #tpu.memory_space<smem>>
    %410 = vector.extract_strided_slice %377 {offsets = [3, 0], sizes = [16, 16], strides = [1, 1]} : vector<22x16xf32> to vector<16x16xf32>
    %411 = vector.broadcast %409 : f32 to vector<16x16xf32>
    %412 = arith.mulf %411, %410 : vector<16x16xf32>
    %413 = arith.addf %408, %412 : vector<16x16xf32>
    %c1_139 = arith.constant 1 : index
    %c26_140 = arith.constant 26 : index
    %414 = memref.load %arg1[%c1_139, %c26_140] : memref<2x49xf32, #tpu.memory_space<smem>>
    %415 = vector.extract_strided_slice %378 {offsets = [3, 0], sizes = [16, 16], strides = [1, 1]} : vector<22x16xf32> to vector<16x16xf32>
    %416 = vector.broadcast %414 : f32 to vector<16x16xf32>
    %417 = arith.mulf %416, %415 : vector<16x16xf32>
    %418 = arith.addf %413, %417 : vector<16x16xf32>
    %c0_141 = arith.constant 0 : index
    %c33 = arith.constant 33 : index
    %419 = memref.load %arg1[%c0_141, %c33] : memref<2x49xf32, #tpu.memory_space<smem>>
    %420 = vector.extract_strided_slice %377 {offsets = [4, 0], sizes = [16, 16], strides = [1, 1]} : vector<22x16xf32> to vector<16x16xf32>
    %421 = vector.broadcast %419 : f32 to vector<16x16xf32>
    %422 = arith.mulf %421, %420 : vector<16x16xf32>
    %423 = arith.addf %418, %422 : vector<16x16xf32>
    %c1_142 = arith.constant 1 : index
    %c33_143 = arith.constant 33 : index
    %424 = memref.load %arg1[%c1_142, %c33_143] : memref<2x49xf32, #tpu.memory_space<smem>>
    %425 = vector.extract_strided_slice %378 {offsets = [4, 0], sizes = [16, 16], strides = [1, 1]} : vector<22x16xf32> to vector<16x16xf32>
    %426 = vector.broadcast %424 : f32 to vector<16x16xf32>
    %427 = arith.mulf %426, %425 : vector<16x16xf32>
    %428 = arith.addf %423, %427 : vector<16x16xf32>
    %c0_144 = arith.constant 0 : index
    %c40 = arith.constant 40 : index
    %429 = memref.load %arg1[%c0_144, %c40] : memref<2x49xf32, #tpu.memory_space<smem>>
    %430 = vector.extract_strided_slice %377 {offsets = [5, 0], sizes = [16, 16], strides = [1, 1]} : vector<22x16xf32> to vector<16x16xf32>
    %431 = vector.broadcast %429 : f32 to vector<16x16xf32>
    %432 = arith.mulf %431, %430 : vector<16x16xf32>
    %433 = arith.addf %428, %432 : vector<16x16xf32>
    %c1_145 = arith.constant 1 : index
    %c40_146 = arith.constant 40 : index
    %434 = memref.load %arg1[%c1_145, %c40_146] : memref<2x49xf32, #tpu.memory_space<smem>>
    %435 = vector.extract_strided_slice %378 {offsets = [5, 0], sizes = [16, 16], strides = [1, 1]} : vector<22x16xf32> to vector<16x16xf32>
    %436 = vector.broadcast %434 : f32 to vector<16x16xf32>
    %437 = arith.mulf %436, %435 : vector<16x16xf32>
    %438 = arith.addf %433, %437 : vector<16x16xf32>
    %c0_147 = arith.constant 0 : index
    %c47 = arith.constant 47 : index
    %439 = memref.load %arg1[%c0_147, %c47] : memref<2x49xf32, #tpu.memory_space<smem>>
    %440 = vector.extract_strided_slice %377 {offsets = [6, 0], sizes = [16, 16], strides = [1, 1]} : vector<22x16xf32> to vector<16x16xf32>
    %441 = vector.broadcast %439 : f32 to vector<16x16xf32>
    %442 = arith.mulf %441, %440 : vector<16x16xf32>
    %443 = arith.addf %438, %442 : vector<16x16xf32>
    %c1_148 = arith.constant 1 : index
    %c47_149 = arith.constant 47 : index
    %444 = memref.load %arg1[%c1_148, %c47_149] : memref<2x49xf32, #tpu.memory_space<smem>>
    %445 = vector.extract_strided_slice %378 {offsets = [6, 0], sizes = [16, 16], strides = [1, 1]} : vector<22x16xf32> to vector<16x16xf32>
    %446 = vector.broadcast %444 : f32 to vector<16x16xf32>
    %447 = arith.mulf %446, %445 : vector<16x16xf32>
    %448 = arith.addf %443, %447 : vector<16x16xf32>
    %449 = vector.extract_strided_slice %13 {offsets = [0, 6], sizes = [22, 16], strides = [1, 1]} : vector<22x22xf32> to vector<22x16xf32>
    %450 = vector.extract_strided_slice %15 {offsets = [0, 6], sizes = [22, 16], strides = [1, 1]} : vector<22x22xf32> to vector<22x16xf32>
    %c0_150 = arith.constant 0 : index
    %c6 = arith.constant 6 : index
    %451 = memref.load %arg1[%c0_150, %c6] : memref<2x49xf32, #tpu.memory_space<smem>>
    %452 = vector.extract_strided_slice %449 {offsets = [0, 0], sizes = [16, 16], strides = [1, 1]} : vector<22x16xf32> to vector<16x16xf32>
    %453 = vector.broadcast %451 : f32 to vector<16x16xf32>
    %454 = arith.mulf %453, %452 : vector<16x16xf32>
    %455 = arith.addf %448, %454 : vector<16x16xf32>
    %c1_151 = arith.constant 1 : index
    %c6_152 = arith.constant 6 : index
    %456 = memref.load %arg1[%c1_151, %c6_152] : memref<2x49xf32, #tpu.memory_space<smem>>
    %457 = vector.extract_strided_slice %450 {offsets = [0, 0], sizes = [16, 16], strides = [1, 1]} : vector<22x16xf32> to vector<16x16xf32>
    %458 = vector.broadcast %456 : f32 to vector<16x16xf32>
    %459 = arith.mulf %458, %457 : vector<16x16xf32>
    %460 = arith.addf %455, %459 : vector<16x16xf32>
    %c0_153 = arith.constant 0 : index
    %c13 = arith.constant 13 : index
    %461 = memref.load %arg1[%c0_153, %c13] : memref<2x49xf32, #tpu.memory_space<smem>>
    %462 = vector.extract_strided_slice %449 {offsets = [1, 0], sizes = [16, 16], strides = [1, 1]} : vector<22x16xf32> to vector<16x16xf32>
    %463 = vector.broadcast %461 : f32 to vector<16x16xf32>
    %464 = arith.mulf %463, %462 : vector<16x16xf32>
    %465 = arith.addf %460, %464 : vector<16x16xf32>
    %c1_154 = arith.constant 1 : index
    %c13_155 = arith.constant 13 : index
    %466 = memref.load %arg1[%c1_154, %c13_155] : memref<2x49xf32, #tpu.memory_space<smem>>
    %467 = vector.extract_strided_slice %450 {offsets = [1, 0], sizes = [16, 16], strides = [1, 1]} : vector<22x16xf32> to vector<16x16xf32>
    %468 = vector.broadcast %466 : f32 to vector<16x16xf32>
    %469 = arith.mulf %468, %467 : vector<16x16xf32>
    %470 = arith.addf %465, %469 : vector<16x16xf32>
    %c0_156 = arith.constant 0 : index
    %c20 = arith.constant 20 : index
    %471 = memref.load %arg1[%c0_156, %c20] : memref<2x49xf32, #tpu.memory_space<smem>>
    %472 = vector.extract_strided_slice %449 {offsets = [2, 0], sizes = [16, 16], strides = [1, 1]} : vector<22x16xf32> to vector<16x16xf32>
    %473 = vector.broadcast %471 : f32 to vector<16x16xf32>
    %474 = arith.mulf %473, %472 : vector<16x16xf32>
    %475 = arith.addf %470, %474 : vector<16x16xf32>
    %c1_157 = arith.constant 1 : index
    %c20_158 = arith.constant 20 : index
    %476 = memref.load %arg1[%c1_157, %c20_158] : memref<2x49xf32, #tpu.memory_space<smem>>
    %477 = vector.extract_strided_slice %450 {offsets = [2, 0], sizes = [16, 16], strides = [1, 1]} : vector<22x16xf32> to vector<16x16xf32>
    %478 = vector.broadcast %476 : f32 to vector<16x16xf32>
    %479 = arith.mulf %478, %477 : vector<16x16xf32>
    %480 = arith.addf %475, %479 : vector<16x16xf32>
    %c0_159 = arith.constant 0 : index
    %c27 = arith.constant 27 : index
    %481 = memref.load %arg1[%c0_159, %c27] : memref<2x49xf32, #tpu.memory_space<smem>>
    %482 = vector.extract_strided_slice %449 {offsets = [3, 0], sizes = [16, 16], strides = [1, 1]} : vector<22x16xf32> to vector<16x16xf32>
    %483 = vector.broadcast %481 : f32 to vector<16x16xf32>
    %484 = arith.mulf %483, %482 : vector<16x16xf32>
    %485 = arith.addf %480, %484 : vector<16x16xf32>
    %c1_160 = arith.constant 1 : index
    %c27_161 = arith.constant 27 : index
    %486 = memref.load %arg1[%c1_160, %c27_161] : memref<2x49xf32, #tpu.memory_space<smem>>
    %487 = vector.extract_strided_slice %450 {offsets = [3, 0], sizes = [16, 16], strides = [1, 1]} : vector<22x16xf32> to vector<16x16xf32>
    %488 = vector.broadcast %486 : f32 to vector<16x16xf32>
    %489 = arith.mulf %488, %487 : vector<16x16xf32>
    %490 = arith.addf %485, %489 : vector<16x16xf32>
    %c0_162 = arith.constant 0 : index
    %c34 = arith.constant 34 : index
    %491 = memref.load %arg1[%c0_162, %c34] : memref<2x49xf32, #tpu.memory_space<smem>>
    %492 = vector.extract_strided_slice %449 {offsets = [4, 0], sizes = [16, 16], strides = [1, 1]} : vector<22x16xf32> to vector<16x16xf32>
    %493 = vector.broadcast %491 : f32 to vector<16x16xf32>
    %494 = arith.mulf %493, %492 : vector<16x16xf32>
    %495 = arith.addf %490, %494 : vector<16x16xf32>
    %c1_163 = arith.constant 1 : index
    %c34_164 = arith.constant 34 : index
    %496 = memref.load %arg1[%c1_163, %c34_164] : memref<2x49xf32, #tpu.memory_space<smem>>
    %497 = vector.extract_strided_slice %450 {offsets = [4, 0], sizes = [16, 16], strides = [1, 1]} : vector<22x16xf32> to vector<16x16xf32>
    %498 = vector.broadcast %496 : f32 to vector<16x16xf32>
    %499 = arith.mulf %498, %497 : vector<16x16xf32>
    %500 = arith.addf %495, %499 : vector<16x16xf32>
    %c0_165 = arith.constant 0 : index
    %c41 = arith.constant 41 : index
    %501 = memref.load %arg1[%c0_165, %c41] : memref<2x49xf32, #tpu.memory_space<smem>>
    %502 = vector.extract_strided_slice %449 {offsets = [5, 0], sizes = [16, 16], strides = [1, 1]} : vector<22x16xf32> to vector<16x16xf32>
    %503 = vector.broadcast %501 : f32 to vector<16x16xf32>
    %504 = arith.mulf %503, %502 : vector<16x16xf32>
    %505 = arith.addf %500, %504 : vector<16x16xf32>
    %c1_166 = arith.constant 1 : index
    %c41_167 = arith.constant 41 : index
    %506 = memref.load %arg1[%c1_166, %c41_167] : memref<2x49xf32, #tpu.memory_space<smem>>
    %507 = vector.extract_strided_slice %450 {offsets = [5, 0], sizes = [16, 16], strides = [1, 1]} : vector<22x16xf32> to vector<16x16xf32>
    %508 = vector.broadcast %506 : f32 to vector<16x16xf32>
    %509 = arith.mulf %508, %507 : vector<16x16xf32>
    %510 = arith.addf %505, %509 : vector<16x16xf32>
    %c0_168 = arith.constant 0 : index
    %c48 = arith.constant 48 : index
    %511 = memref.load %arg1[%c0_168, %c48] : memref<2x49xf32, #tpu.memory_space<smem>>
    %512 = vector.extract_strided_slice %449 {offsets = [6, 0], sizes = [16, 16], strides = [1, 1]} : vector<22x16xf32> to vector<16x16xf32>
    %513 = vector.broadcast %511 : f32 to vector<16x16xf32>
    %514 = arith.mulf %513, %512 : vector<16x16xf32>
    %515 = arith.addf %510, %514 : vector<16x16xf32>
    %c1_169 = arith.constant 1 : index
    %c48_170 = arith.constant 48 : index
    %516 = memref.load %arg1[%c1_169, %c48_170] : memref<2x49xf32, #tpu.memory_space<smem>>
    %517 = vector.extract_strided_slice %450 {offsets = [6, 0], sizes = [16, 16], strides = [1, 1]} : vector<22x16xf32> to vector<16x16xf32>
    %518 = vector.broadcast %516 : f32 to vector<16x16xf32>
    %519 = arith.mulf %518, %517 : vector<16x16xf32>
    %520 = arith.addf %515, %519 : vector<16x16xf32>
    %cst_171 = arith.constant 0.000000e+00 : f32
    %521 = vector.broadcast %cst_171 : f32 to vector<16x16xf32>
    %522 = arith.subf %521, %520 : vector<16x16xf32>
    %523 = math.exp %522 : vector<16x16xf32>
    %cst_172 = arith.constant 1.000000e+00 : f32
    %524 = vector.broadcast %cst_172 : f32 to vector<16x16xf32>
    %525 = arith.addf %524, %523 : vector<16x16xf32>
    %526 = tpu.reciprocal %525 : vector<16x16xf32> -> vector<16x16xf32>
    %c0_173 = arith.constant 0 : index
    %c0_174 = arith.constant 0 : index
    %c0_175 = arith.constant 0 : index
    %527 = vector.load %arg3[%c0_173, %c0_174, %c0_175] : memref<1x16x16xf32, #tpu.memory_space<vmem>>, vector<1x16x16xf32>
    %528 = vector.shape_cast %527 : vector<1x16x16xf32> to vector<16x16xf32>
    %529 = vector.shape_cast %526 : vector<16x16xf32> to vector<1x16x16xf32>
    tpu.vector_store %arg3[%c0_173, %c0_174, %c0_175], %529 {strides = array<i32>} : memref<1x16x16xf32, #tpu.memory_space<vmem>>, vector<1x16x16xf32>,
    return
  }
  func.func @transform_0(%arg0: i32) -> (i32, i32) {
    %c0_i32 = arith.constant 0 : i32
    %c0_i32_0 = arith.constant 0 : i32
    %c0_i32_1 = arith.constant 0 : i32
    return %c0_i32, %c0_i32_0 : i32, i32
  }
  func.func @transform_1(%arg0: i32) -> (i32, i32, i32, i32) {
    %c0_i32 = arith.constant 0 : i32
    %c0_i32_0 = arith.constant 0 : i32
    %c0_i32_1 = arith.constant 0 : i32
    %c0_i32_2 = arith.constant 0 : i32
    return %arg0, %c0_i32, %c0_i32_0, %c0_i32_1 : i32, i32, i32, i32
  }
  func.func @transform_2(%arg0: i32) -> (i32, i32, i32) {
    %c0_i32 = arith.constant 0 : i32
    %c0_i32_0 = arith.constant 0 : i32
    %c0_i32_1 = arith.constant 0 : i32
    return %arg0, %c0_i32, %c0_i32_0 : i32, i32, i32
  }
}

</mosaic_0001>

<bundles_post_ra>
// kernel: spatial_attention.5
= control target key start
LH: loop header
LB: loop body
LE: loop exit
PB: predicated region body
PF: predicated region fallthrough
CT: control target
= control target key end

     0   :  { %s389_s9 = smov 0   ;;  %s391_s10 = smov 0   ;;  %s418_s0 = inlined_call_operand.vmem [shape: f32[2,4,256], index: 0, kind: input, shape index: {}]   ;;  %s419_s1 = inlined_call_operand.vmem [shape: f32[2,1,256], index: 1, kind: input, shape index: {}]   ;;  %s420_s2 = inlined_call_operand.vmem [shape: f32[2,4,256], index: 2, kind: output, shape index: {}]  }
   0x1   :  { %s393_s11 = smov 0  }
   0x2 LB: > { %s24_s12 = sadd.s32 1, %s368_s10  ;;  %p316_p0 = scmp.ge.s32.totalorder %s372_s11, 1  ;;  %s372_s11 = sphi %s393_s11, %s12_s11   ;;  %s368_s10 = sphi %s391_s10, %s422_s10   ;;  %s364_s9 = sphi %s389_s9, %s421_s9  }
   0x3   : > { %p26_p1 = scmp.ge.s32.totalorder %s24_s12, 2  ;;  %p141_p2 = scmp.lt.s32.totalorder %s372_s11, 3 }
   0x5   : > { %s424_s12 = smov (%p26_p1, %s24_s12), 0  ;;  %p142_p3 = pnand %p316_p0, %p141_p2 }
   0x6   : > { %p175_p4 = scmp.lt.s32.totalorder (!%p142_p3), %s364_s9, 1 }
   0x7   : > { %145 = sbr.rel (%p142_p3) target bundleno = 24 (0x18), region = 28 }
   0xc   : > { %s426_s9 = smov (!%p175_p4, %s364_s9), 1  ;;  %vm203_vm0 = vcmask 1043456  }
   0xd   : > { %s324_s13 = sshll.u32 %s426_s9, 3  ;;  %s319_s14 = sshll.u32 %s426_s9, 1 }
   0xe   : > { %s187_s17 = scalar_lea.vmem %s419_s1, %s319_s14  ;;  %s183_s20 = scalar_lea.vmem %s418_s0, %s324_s13 }
   0xf   : > { %v197_v0 = vld [vmem:[%s187_s17] sm:$0x3]  ;;  %s196_s23 = scalar_lea.vmem %s420_s2, %s324_s13 }
  0x10   : > { %v199_v1 = vperm.slane %v197_v0, 0  ;;  %v200_v2 = vperm.slane %v197_v0, 1  ;;  %v201_v3 = vld [vmem:[%s183_s20] sm:$0xff] }
  0x12   : > { %v202_v4 = vrot.slane %v200_v2, 4 }
  0x14   : > { %v204_v5 = vsel %vm203_vm0, %v199_v1, %v202_v4 }
  0x15   : > { %v206_v6 = vmul.f32 %v204_v5, %v201_v3 }
  0x17   : > { %207 = vst [vmem:[%s196_s23] sm:$0xff] %v206_v6 }
  0x18 PF: > { %s12_s11 = sadd.s32 1, %s372_s11   ;;  %s421_s9 = smov %s368_s10 }
  0x19   : > { %p9_p5 = scmp.ge.s32.totalorder %s12_s11, 4   ;;  %s422_s10 = smov %s424_s12 }
  0x1b   :  { %11 = sbr.rel (!%p9_p5) target bundleno = 2 (0x2), region = 61 }

// kernel: spatial_attention.3
= control target key start
LH: loop header
LB: loop body
LE: loop exit
PB: predicated region body
PF: predicated region fallthrough
CT: control target
= control target key end

     0   :  { %s366_s6 = smov 0   ;;  %s368_s7 = smov 0   ;;  %s407_s0 = inlined_call_operand.vmem [shape: f32[2,4,256], index: 0, kind: input, shape index: {}]   ;;  %s408_s1 = inlined_call_operand.vmem [shape: f32[2,2,256], index: 1, kind: output, shape index: {}]  }
   0x1   :  { %s370_s8 = smov 0  }
   0x2 LB: > { %s23_s9 = sadd.s32 1, %s350_s7  ;;  %p298_p0 = scmp.ge.s32.totalorder %s354_s8, 1  ;;  %s354_s8 = sphi %s370_s8, %s11_s8   ;;  %s350_s7 = sphi %s368_s7, %s410_s7   ;;  %s346_s6 = sphi %s366_s6, %s409_s6  }
   0x3   : > { %p25_p1 = scmp.ge.s32.totalorder %s23_s9, 2  ;;  %p105_p2 = scmp.lt.s32.totalorder %s354_s8, 3 }
   0x5   : > { %s412_s9 = smov (%p25_p1, %s23_s9), 0  ;;  %p106_p3 = pnand %p298_p0, %p105_p2 }
   0x6   : > { %p129_p4 = scmp.lt.s32.totalorder (!%p106_p3), %s346_s6, 1 }
   0x7   : > { %109 = sbr.rel (%p106_p3) target bundleno = 49 (0x31), region = 24 }
   0xc   : > { %s414_s6 = smov (!%p129_p4, %s346_s6), 1  ;;  %vm166_vm0 = vcmask 1043456   ;;  %v189_v21 = vlaneseq  ;;  %vm186_vm1 = vcmask 1040384  }
   0xd   : > { %s306_s10 = sshll.u32 %s414_s6, 3  ;;  %s307_s14 = sshll.u32 %s414_s6, 2 }
   0xe   : > { %s137_s13 = scalar_lea.vmem %s407_s0, %s306_s10  ;;  %vm191_vm2 = vcmp.lt.s32.totalorder %v189_v21, 256  ;;  %s142_s17 = scalar_lea.vmem %s408_s1, %s307_s14 }
   0xf   : > { %v149_v0 = vld [vmem:[%s137_s13] sm:$0xff] }
  0x10   : > { %161 = vst [vmem:[#allocation1] ss:$2 sm:$0xff] %v149_v0 }
  0x17   : > { %v162_v1 = vld.sshfl [vmem:[#allocation1] sm:$0xff pattern:$0x75316420]  ;;  %v163_v2 = vld.sshfl [vmem:[#allocation1 + $0x8] sm:$0xff pattern:$0x75316420] }
  0x18   : > { %v167_v3 = vsel %vm166_vm0, %v162_v1, 0.0  ;;  %v174_v4 = vsel %vm166_vm0, %v163_v2, 0.0  ;;  %196 = vst [vmem:[#allocation1] ss:$2 sm:$0xff] %v149_v0 }
  0x19   : > { %v168_v5 = vrot.slane %v167_v3, 4  ;;  %v175_v6 = vrot.slane %v174_v4, 4 }
  0x1b   : > { %v169_v7 = vadd.f32 %v168_v5, %v167_v3  ;;  %v176_v8 = vadd.f32 %v175_v6, %v174_v4 }
  0x1d   : > { %v170_v9 = vrot.slane %v169_v7, 2  ;;  %v177_v10 = vrot.slane %v176_v8, 2 }
  0x1f   : > { %v171_v11 = vadd.f32 %v170_v9, %v169_v7  ;;  %v178_v12 = vadd.f32 %v177_v10, %v176_v8  ;;  %v197_v13 = vld.sshfl [vmem:[#allocation1] sm:$0xff pattern:$0x75316420]  ;;  %v198_v14 = vld.sshfl [vmem:[#allocation1 + $0x8] sm:$0xff pattern:$0x75316420] }
  0x20   : > { %v201_v15 = vsel %vm166_vm0, %v197_v13, -inf  ;;  %v208_v16 = vsel %vm166_vm0, %v198_v14, -inf }
  0x21   : > { %v172_v17 = vrot.slane %v171_v11, 1  ;;  %v179_v18 = vrot.slane %v178_v12, 1  ;;  %v202_v19 = vrot.slane %v201_v15, 4  ;;  %v209_v20 = vrot.slane %v208_v16, 4 }
  0x23   : > { %v173_v22 = vadd.f32 %v172_v17, %v171_v11  ;;  %v180_v23 = vadd.f32 %v179_v18, %v178_v12  ;;  %v203_v24 = vmax.f32 %v201_v15, %v202_v19  ;;  %v210_v25 = vmax.f32 %v208_v16, %v209_v20 }
  0x25   : > { %v182_v26 = vmul.f32 0.25, %v180_v23  ;;  %v204_v27 = vrot.slane %v203_v24, 2  ;;  %v211_v28 = vrot.slane %v210_v25, 2  ;;  %v181_v29 = vmul.f32 0.25, %v173_v22 }
  0x27   : > { %v185_v30 = vrot.slane %v182_v26, 7  ;;  %v205_v31 = vmax.f32 %v203_v24, %v204_v27  ;;  %v212_v32 = vmax.f32 %v210_v25, %v211_v28 }
  0x29   : > { %v187_v33 = vsel %vm186_vm1, %v181_v29, %v185_v30  ;;  %v206_v34 = vrot.slane %v205_v31, 1  ;;  %v213_v35 = vrot.slane %v212_v32, 1 }
  0x2a   : > { %193 = vst.msk [vmem:[%s142_s17] ss:$2 sm:$0x3] %vm191_vm2, %v187_v33 }
  0x2b   : > { %v214_v36 = vmax.f32 %v212_v32, %v213_v35  ;;  %v207_v37 = vmax.f32 %v205_v31, %v206_v34 }
  0x2d   : > { %v217_v38 = vrot.slane %v214_v36, 7 }
  0x2f   : > { %v218_v39 = vsel %vm186_vm1, %v207_v37, %v217_v38 }
  0x30   : > { %303 = vst.msk [vmem:[%s142_s17 + $0x1] ss:$2 sm:$0x3] %vm191_vm2, %v218_v39 }
  0x31 PF: > { %s11_s8 = sadd.s32 1, %s354_s8   ;;  %s409_s6 = smov %s350_s7 }
  0x32   : > { %p8_p5 = scmp.ge.s32.totalorder %s11_s8, 4   ;;  %s410_s7 = smov %s412_s9 }
  0x34   :  { %10 = sbr.rel (!%p8_p5) target bundleno = 2 (0x2), region = 63 }

// kernel: spatial_attention.4
= control target key start
LH: loop header
LB: loop body
LE: loop exit
PB: predicated region body
PF: predicated region fallthrough
CT: control target
= control target key end

     0   :  { %7 = vsyncpa [#allocation4], 0  ;;  %s2419_s9 = smov 0   ;;  %s3373_s0 = inlined_call_operand.vmem [shape: f32[2,49], index: 0, kind: input, shape index: {}]   ;;  %s3374_s1 = inlined_call_operand.vmem [shape: f32[2,2,16,16], index: 1, kind: input, shape index: {}]   ;;  %s3375_s2 = inlined_call_operand.vmem [shape: f32[2,16,16], index: 2, kind: output, shape index: {}]  }
   0x1 LB: > { %s2207_s10 = sadd.s32 4294967295, %s2393_s9   ;;  %p2209_p0 = scmp.ge.s32.totalorder %s2393_s9, 1  ;;  %s2393_s9 = sphi %s2419_s9, %s13_s9  }
   0x2   : > { %p91_p1 = scmp.lt.s32.totalorder %s2393_s9, 3  ;;  %s103_s13 = sshll.u32 %s3373_s0, 4  ;;  %s104_s13 = int_to_ptr.vmem [resolvable:$true] %s103_s13 }
   0x3   : > { %p2329_p3 = scmp.eq.s32.totalorder %s2207_s10, 0  ;;  %s2395_s14 = smov [#allocation3]  }
   0x4   : > { %p92_p2 = pnand %p2209_p0, %p91_p1 }
   0x6   : > { %p2325_p4 = pneg %p92_p2  ;;  %124 = sbr.rel (%p92_p2) target bundleno = 735 (0x2df), region = 28 }
   0x8   : > { %p2326_p5 = pnand %p2329_p3, %p2325_p4 }
   0xa   : > { %2328 = dma.vmem_to_smem (!%p2326_p5), %s104_s13, 32, %s2395_s14, [#allocation4]  }
   0xb   : > { %2388 = dma.done.wait (%p2329_p3), [#allocation4], 32  }
   0xc   : > { %2390 = vsyncadd (%p2329_p3), [#allocation4], 4294967264 }
   0xd   : > { %131 = sfence }
   0xe   : > { %p148_p6 = scmp.lt.s32.totalorder %s2207_s10, 1  ;;  %vm158_vm0 = vcmask 179200   ;;  %v2396_v0 = vmov 0.0   ;;  %s2397_s19 = smov 3   ;;  %vm161_vm1 = vcmask 177152   ;;  %vm176_vm2 = vcmask 154648  }
   0xf   : > { %163 = vst.msk [vmem:[#allocation2 + $0x18] sm:$0xff] %vm158_vm0, %v2396_v0  ;;  %s2234_s20 = sld [smem:[#allocation3 + $0x81]]  ;;  %s2398_s24 = smov 127   ;;  %vm219_vm3 = vcmask 1046528   ;;  %vm254_vm4 = vcmask 1045504   ;;  %vm289_vm5 = vcmask 1044480  }
  0x10   : > { %s3377_s10 = smov (!%p148_p6, %s2207_s10), 1  ;;  %164 = vst.msk [vmem:[#allocation2 + $0x20] sm:$0xff] %vm158_vm0, %v2396_v0  ;;  %s2233_s21 = sld [smem:[#allocation3 + $0x1]]  ;;  %vm324_vm6 = vcmask 1043456   ;;  %vm359_vm7 = vcmask 1042432   ;;  %vm394_vm8 = vcmask 1041408  }
  0x11   : > { %159 = vst.msk [vmem:[#allocation2] sm:$0xff] %vm158_vm0, %v2396_v0  ;;  %s2319_s15 = sshll.u32 %s3377_s10, 5  ;;  %s2444_s22 = sld [smem:[#allocation3 + $0x2]]  ;;  %vm2137_vm11 = vcmask 130048  }
  0x12   : > { %160 = vst.msk [vmem:[#allocation2 + $0x8] sm:$0xff] %vm158_vm0, %v2396_v0  ;;  %s152_s18 = scalar_lea.vmem %s3374_s1, %s2319_s15  ;;  %s2235_s23 = sld [smem:[#allocation3 + $0x8]] }
  0x13   : > { %v2218_v1 = vld [vmem:[%s152_s18 + $0x10] sm:$0xff]  ;;  %v166_v2 = vld [vmem:[%s152_s18] sm:$0xff]  ;;  %v2219_v3 = vld [vmem:[%s152_s18 + $0x18] sm:$0xff]  ;;  %165 = vst.msk [vmem:[#allocation2 + $0x28] sm:$0x3f] %vm161_vm1, %v2396_v0  ;;  %s2450_s25 = sld [smem:[#allocation3 + $0x82]] }
  0x14   : > { %184 = vrot.lane.b32.xlu1 %v2218_v1, %s2397_s19  ;;  %170 = vrot.lane.b32.xlu0 %v166_v2, %s2397_s19  ;;  %v167_v4 = vld [vmem:[%s152_s18 + $0x8] sm:$0xff]  ;;  %162 = vst.msk [vmem:[#allocation2 + $0x10] sm:$0x3f] %vm161_vm1, %v2396_v0  ;;  %s2236_s26 = sld [smem:[#allocation3 + $0x88]]  ;;  %s2399_s28 = smov 126  }
  0x15   : > { %v436_v7 = vstv %s2234_s20  ;;  %s2237_s27 = sld [smem:[#allocation3 + $0xf]] }
  0x16   : > { %v422_v8 = vstv %s2233_s21  ;;  %s2238_s29 = sld [smem:[#allocation3 + $0x8f]] }
  0x17   : > { %v702_v19 = vstv %s2444_s22  ;;  %s2239_s30 = sld [smem:[#allocation3 + $0x16]] }
  0x18   : > { %v450_v22 = vstv %s2235_s23  ;;  %s2240_s3 = sld [smem:[#allocation3 + $0x96]] }
  0x19   : > { %v716_v25 = vstv %s2450_s25  ;;  %s2241_s4 = sld [smem:[#allocation3 + $0x1d]] }
  0x1a   : > { %v471_v29 = vstv %s2236_s26  ;;  %s2242_s5 = sld [smem:[#allocation3 + $0x9d]] }
  0x1b   : > { %v492_v32 = vstv %s2237_s27  ;;  %s2243_s6 = sld [smem:[#allocation3 + $0x24]] }
  0x1c   : > { %186 = vrot.lane.b32.xlu1 %v2219_v3, %s2397_s19  ;;  %172 = vrot.lane.b32.xlu0 %v167_v4, %s2397_s19  ;;  %v513_v45 = vstv %s2238_s29  ;;  %s2244_s7 = sld [smem:[#allocation3 + $0xa4]] }
  0x1d   : > { %v534_v54 = vstv %s2239_s30  ;;  %s2245_s8 = sld [smem:[#allocation3 + $0x2b]] }
  0x1e   : > { %v555_v57 = vstv %s2240_s3  ;;  %s2246_s11 = sld [smem:[#allocation3 + $0xab]] }
  0x1f   : > { %s2249_s12 = sld [smem:[#allocation3 + $0x9]] }
  0x20   : > { %s2250_s13 = sld [smem:[#allocation3 + $0x89]] }
  0x21   : > { %s2556_s14 = sld [smem:[#allocation3]] }
  0x22   : > { %s2562_s15 = sld [smem:[#allocation3 + $0x80]] }
  0x23   : > { %s2221_s16 = sld [smem:[#allocation3 + $0x7]] }
  0x24   : > { %s2222_s17 = sld [smem:[#allocation3 + $0x87]] }
  0x25   : > { %s2568_s18 = sld [smem:[#allocation3 + $0x8e]] }
  0x26   : > { %s2570_s19 = sld [smem:[#allocation3 + $0x95]] }
  0x27   : > { %s2572_s20 = sld [smem:[#allocation3 + $0x10]] }
  0x28   : > { %s2580_s21 = sld [smem:[#allocation3 + $0x90]] }
  0x29   : > { %s2586_s22 = sld [smem:[#allocation3 + $0xe]] }
  0x2a   : > { %s2590_s23 = sld [smem:[#allocation3 + $0x15]] }
  0x2b   : > { %s2593_s25 = sld [smem:[#allocation3 + $0x9c]] }
  0x2c   : > { %s2601_s26 = sld [smem:[#allocation3 + $0x1c]] }
  0x2d   : > { %s2625_s27 = sld [smem:[#allocation3 + $0x17]] }
  0x2e   : > { %s2684_s29 = sld [smem:[#allocation3 + $0x1e]] }
  0x2f   : > { %s2738_s30 = sld [smem:[#allocation3 + $0x9e]] }
  0x30   : > { %s2754_s3 = sld [smem:[#allocation3 + $0x23]] }
  0x86   : > { %v185_v5 = vpop.permute.xlu1 %184  ;;  %v171_v6 = vpop.permute.xlu0 %170 }
  0x87   : > { %191 = vst.msk [vmem:[#allocation2 + $0x1b] sm:$0xff] %vm176_vm2, %v185_v5 }
  0x88   : > { %177 = vst.msk [vmem:[#allocation2 + $0x3] sm:$0xff] %vm176_vm2, %v171_v6 }
  0x8e   : > { %v2438_v9 = vld [vmem:[#allocation2 + $0x18] sm:$0xff]  ;;  %v187_v10 = vpop.permute.xlu1 %186  ;;  %v173_v11 = vpop.permute.xlu0 %172 }
  0x8f   : > { %v2440_v12 = vld [vmem:[#allocation2] sm:$0xff]  ;;  %192 = vst.msk [vmem:[#allocation2 + $0x23] sm:$0xff] %vm176_vm2, %v187_v10  ;;  %v437_v13 = vmul.f32 %v436_v7, %v2438_v9  ;;  %v717_v28 = vmul.f32 %v716_v25, %v2438_v9  ;;  %v472_v35 = vmul.f32 %v471_v29, %v2438_v9  ;;  %v556_v63 = vmul.f32 %v555_v57, %v2438_v9 }
  0x90   : > { %178 = vst.msk [vmem:[#allocation2 + $0xb] sm:$0xff] %vm176_vm2, %v173_v11  ;;  %v423_v14 = vmul.f32 %v422_v8, %v2440_v12  ;;  %v703_v30 = vmul.f32 %v702_v19, %v2440_v12  ;;  %v493_v36 = vmul.f32 %v492_v32, %v2440_v12  ;;  %v451_v49 = vmul.f32 %v450_v22, %v2440_v12 }
  0x91   : > { %441 = vrot.lane.b32.xlu0 %v437_v13, %s2398_s24  ;;  %v478_v40 = vrot.slane %v472_v35, 1  ;;  %v535_v62 = vmul.f32 %v534_v54, %v2440_v12  ;;  %v562_v4 = vrot.slane %v556_v63, 3 }
  0x92   : > { %427 = vrot.lane.b32.xlu2 %v423_v14, %s2398_s24  ;;  %v499_v41 = vrot.slane %v493_v36, 2  ;;  %v457_v53 = vrot.slane %v451_v49, 1  ;;  %v514_v14 = vmul.f32 %v513_v45, %v2438_v9 }
  0x93   : > { %v541_v3 = vrot.slane %v535_v62, 3 }
  0x96   : > { %v2452_v15 = vld [vmem:[#allocation2 + $0x20] sm:$0xff]  ;;  %v2478_v39 = vld [vmem:[#allocation2 + $0x28] sm:$0x3f] }
  0x97   : > { %v2454_v16 = vld [vmem:[#allocation2 + $0x8] sm:$0xff]  ;;  %v2456_v17 = vld [vmem:[#allocation2 + $0x10] sm:$0x3f]  ;;  %v438_v18 = vmul.f32 %v436_v7, %v2452_v15  ;;  %v473_v31 = vmul.f32 %v471_v29, %v2452_v15  ;;  %v718_v43 = vmul.f32 %v716_v25, %v2452_v15  ;;  %v515_v47 = vmul.f32 %v513_v45, %v2452_v15 }
  0x98   : > { %v424_v20 = vmul.f32 %v422_v8, %v2454_v16  ;;  %v704_v21 = vmul.f32 %v702_v19, %v2454_v16  ;;  %v452_v23 = vmul.f32 %v450_v22, %v2454_v16  ;;  %v453_v24 = vmul.f32 %v450_v22, %v2456_v17 }
  0x99   : > { %443 = vrot.lane.b32.xlu1 %v438_v18, %s2398_s24  ;;  %v494_v34 = vmul.f32 %v492_v32, %v2454_v16  ;;  %v479_v37 = vrot.slane %v473_v31, 1  ;;  %v495_v44 = vmul.f32 %v492_v32, %v2456_v17  ;;  %v516_v48 = vmul.f32 %v513_v45, %v2478_v39 }
  0x9a   : > { %709 = vrot.lane.b32.xlu0 %v704_v21, %s2399_s28  ;;  %429 = vrot.lane.b32.xlu2 %v424_v20, %s2398_s24  ;;  %v458_v26 = vrot.slane %v452_v23, 1  ;;  %v460_v27 = vrot.slane %v453_v24, 1  ;;  %v521_v51 = vrot.slane %v515_v47, 2  ;;  %v2492_v56 = vmul.f32 %v534_v54, %v2454_v16 }
  0x9b   : > { %v500_v38 = vrot.slane %v494_v34, 2  ;;  %v480_v42 = vsel %vm219_vm3, %v478_v40, %v479_v37  ;;  %v502_v50 = vrot.slane %v495_v44, 2  ;;  %v523_v52 = vrot.slane %v516_v48, 2 }
  0x9c   : > { %v461_v33 = vsel %vm219_vm3, %v458_v26, %v460_v27  ;;  %v459_v59 = vsel %vm219_vm3, %v457_v53, %v458_v26  ;;  %v557_v60 = vmul.f32 %v555_v57, %v2452_v15  ;;  %v474_v61 = vmul.f32 %v471_v29, %v2478_v39 }
  0x9d   : > { %v501_v46 = vsel %vm254_vm4, %v499_v41, %v500_v38  ;;  %v503_v55 = vsel %vm254_vm4, %v500_v38, %v502_v50  ;;  %v524_v58 = vsel %vm254_vm4, %v521_v51, %v523_v52  ;;  %v542_v0 = vrot.slane %v2492_v56, 3 }
  0x9e   : > { %v563_v1 = vrot.slane %v557_v60, 3  ;;  %v481_v2 = vrot.slane %v474_v61, 1  ;;  %v558_v6 = vmul.f32 %v555_v57, %v2478_v39  ;;  %v576_v7 = vstv %s2241_s4  ;;  %s2764_s4 = sld [smem:[#allocation3 + $0xa3]] }
  0x9f   : > { %v543_v5 = vsel %vm289_vm5, %v541_v3, %v542_v0  ;;  %v578_v11 = vmul.f32 %v576_v7, %v2454_v16  ;;  %v579_v13 = vmul.f32 %v576_v7, %v2456_v17  ;;  %v520_v21 = vrot.slane %v514_v14, 2 }
  0xa0   : > { %v564_v8 = vsel %vm289_vm5, %v562_v4, %v563_v1  ;;  %v482_v10 = vsel %vm219_vm3, %v479_v37, %v481_v2  ;;  %v565_v18 = vrot.slane %v558_v6, 3  ;;  %v597_v22 = vstv %s2242_s5  ;;  %s2778_s5 = sld [smem:[#allocation3 + $0x25]] }
  0xa1   : > { %721 = vrot.lane.b32.xlu1 %v717_v28, %s2399_s28  ;;  %v584_v19 = vrot.slane %v578_v11, 4  ;;  %v586_v20 = vrot.slane %v579_v13, 4  ;;  %v2516_v24 = vmul.f32 %v597_v22, %v2452_v15  ;;  %v618_v25 = vstv %s2243_s6  ;;  %s2784_s6 = sld [smem:[#allocation3 + $0xa5]] }
  0xa2   : > { %464 = vrot.lane.b32.xlu0 %v461_v33, %s2398_s24  ;;  %707 = vrot.lane.b32.xlu2 %v703_v30, %s2399_s28  ;;  %v566_v23 = vsel %vm289_vm5, %v563_v1, %v565_v18  ;;  %v522_v27 = vsel %vm254_vm4, %v520_v21, %v521_v51  ;;  %v620_v28 = vmul.f32 %v618_v25, %v2454_v16  ;;  %v639_v40 = vstv %s2244_s7  ;;  %s2813_s7 = sld [smem:[#allocation3 + $0x2a]] }
  0xa3   : > { %v587_v26 = vsel %vm324_vm6, %v584_v19, %v586_v20  ;;  %v537_v29 = vmul.f32 %v534_v54, %v2456_v17  ;;  %v598_v30 = vmul.f32 %v597_v22, %v2438_v9  ;;  %v619_v31 = vmul.f32 %v618_v25, %v2440_v12 }
  0xa4   : > { %v605_v32 = vrot.slane %v2516_v24, 4  ;;  %v626_v33 = vrot.slane %v620_v28, 5  ;;  %v621_v38 = vmul.f32 %v618_v25, %v2456_v17  ;;  %v642_v44 = vmul.f32 %v639_v40, %v2478_v39 }
  0xa5   : > { %v544_v34 = vrot.slane %v537_v29, 3  ;;  %v604_v35 = vrot.slane %v598_v30, 4  ;;  %v625_v36 = vrot.slane %v619_v31, 5  ;;  %v577_v45 = vmul.f32 %v576_v7, %v2440_v12 }
  0xa6   : > { %v649_v48 = vrot.slane %v642_v44, 5  ;;  %v660_v50 = vstv %s2245_s8  ;;  %v681_v53 = vstv %s2246_s11  ;;  %v600_v57 = vmul.f32 %v597_v22, %v2478_v39  ;;  %s2832_s8 = sld [smem:[#allocation3 + $0x2c]] }
  0xa7   : > { %v606_v37 = vsel %vm324_vm6, %v604_v35, %v605_v32  ;;  %v627_v41 = vsel %vm359_vm7, %v625_v36, %v626_v33  ;;  %v583_v49 = vrot.slane %v577_v45, 4  ;;  %v2540_v52 = vmul.f32 %v660_v50, %v2454_v16  ;;  %s2868_s11 = sld [smem:[#allocation3 + $0xaa]] }
  0xa8   : > { %v683_v56 = vmul.f32 %v681_v53, %v2452_v15  ;;  %v607_v62 = vrot.slane %v600_v57, 4  ;;  %v684_v2 = vmul.f32 %v681_v53, %v2478_v39  ;;  %v730_v3 = vstv %s2249_s12  ;;  %s2874_s12 = sld [smem:[#allocation3 + $0xac]] }
  0xa9   : > { %483 = vrot.lane.b32.xlu1 %v480_v42, %s2398_s24  ;;  %v545_v42 = vsel %vm289_vm5, %v542_v0, %v544_v34  ;;  %v668_v60 = vrot.slane %v2540_v52, 6  ;;  %v732_v6 = vmul.f32 %v730_v3, %v2454_v16  ;;  %v731_v7 = vmul.f32 %v730_v3, %v2440_v12 }
  0xaa   : > { %504 = vrot.lane.b32.xlu0 %v501_v46, %s2398_s24  ;;  %723 = vrot.lane.b32.xlu2 %v718_v43, %s2399_s28  ;;  %v641_v43 = vmul.f32 %v639_v40, %v2452_v15  ;;  %v628_v46 = vrot.slane %v621_v38, 5  ;;  %v689_v61 = vrot.slane %v683_v56, 6  ;;  %v751_v18 = vstv %s2250_s13  ;;  %s2906_s13 = sld [smem:[#allocation3 + $0x3]] }
  0xab   : > { %v738_v11 = vrot.slane %v732_v6, 1  ;;  %v737_v13 = vrot.slane %v731_v7, 1  ;;  %v733_v20 = vmul.f32 %v730_v3, %v2456_v17  ;;  %v2577_v21 = vmul.f32 %v751_v18, %v2452_v15 }
  0xac   : > { %v647_v47 = vrot.slane %v641_v43, 5  ;;  %v629_v51 = vsel %vm359_vm7, %v626_v33, %v628_v46  ;;  %v754_v22 = vmul.f32 %v751_v18, %v2478_v39  ;;  %v663_v25 = vmul.f32 %v660_v50, %v2456_v17 }
  0xad   : > { %v740_v29 = vrot.slane %v733_v20, 1  ;;  %v759_v30 = vrot.slane %v2577_v21, 1  ;;  %v200_v34 = vstv %s2556_s14  ;;  %v2606_v36 = vstv %s2568_s18  ;;  %s2929_s14 = sld [smem:[#allocation3 + $0x83]] }
  0xae   : > { %v650_v54 = vsel %vm359_vm7, %v647_v47, %v649_v48  ;;  %v761_v31 = vrot.slane %v754_v22, 1  ;;  %v670_v33 = vrot.slane %v663_v25, 6  ;;  %v772_v38 = vstv %s2572_s20  ;;  %s2265_s18 = sld [smem:[#allocation3 + $0x11]] }
  0xaf   : > { %v2619_v43 = vmul.f32 %v772_v38, %v2454_v16  ;;  %v741_v44 = vsel %vm219_vm3, %v738_v11, %v740_v29  ;;  %v201_v46 = vmul.f32 %v200_v34, %v2440_v12  ;;  %v752_v52 = vmul.f32 %v751_v18, %v2438_v9  ;;  %s2268_s20 = sld [smem:[#allocation3 + $0x98]] }
  0xb0   : > { %v762_v45 = vsel %vm219_vm3, %v759_v30, %v761_v31  ;;  %v671_v48 = vsel %vm394_vm8, %v668_v60, %v670_v33  ;;  %v2647_v56 = vstv %s2593_s25  ;;  %v814_v21 = vstv %s2625_s27  ;;  %s2272_s25 = sld [smem:[#allocation3 + $0xa6]] }
  0xb1   : > { %506 = vrot.lane.b32.xlu1 %v503_v55, %s2398_s24  ;;  %v585_v55 = vsel %vm324_vm6, %v583_v49, %v584_v19  ;;  %v775_v25 = vmul.f32 %v772_v38, %v2456_v17  ;;  %s2274_s27 = sld [smem:[#allocation3 + $0xad]] }
  0xb2   : > { %527 = vrot.lane.b32.xlu0 %v524_v58, %s2398_s24  ;;  %462 = vrot.lane.b32.xlu2 %v459_v59, %s2398_s24  ;;  %v661_v58 = vmul.f32 %v660_v50, %v2440_v12  ;;  %v682_v59 = vmul.f32 %v681_v53, %v2438_v9  ;;  %v773_v50 = vmul.f32 %v772_v38, %v2440_v12 }
  0xb4   : > { %v667_v63 = vrot.slane %v661_v58, 6  ;;  %v688_v0 = vrot.slane %v682_v59, 6  ;;  %v780_v58 = vrot.slane %v2619_v43, 2  ;;  %v779_v3 = vrot.slane %v773_v50, 2 }
  0xb6   : > { %v669_v1 = vsel %vm394_vm8, %v667_v63, %v668_v60  ;;  %v690_v4 = vsel %vm394_vm8, %v688_v0, %v689_v61  ;;  %v2656_v60 = vmul.f32 %v2606_v36, %v2438_v9 }
  0xb9   : > { %546 = vrot.lane.b32.xlu1 %v543_v5, %s2398_s24  ;;  %v608_v5 = vsel %vm324_vm6, %v605_v32, %v607_v62  ;;  %v2599_v32 = vstv %s2222_s17  ;;  %s2400_s17 = smov 125  }
  0xba   : > { %567 = vrot.lane.b32.xlu0 %v564_v8, %s2398_s24  ;;  %485 = vrot.lane.b32.xlu2 %v482_v10, %s2398_s24  ;;  %v640_v8 = vmul.f32 %v639_v40, %v2438_v9  ;;  %v691_v10 = vrot.slane %v684_v2, 6  ;;  %v2639_v53 = vmul.f32 %v2599_v32, %v2452_v15  ;;  %v2667_v2 = vmul.f32 %v2606_v36, %v2452_v15 }
  0xbc   : > { %v646_v14 = vrot.slane %v640_v8, 5  ;;  %v692_v19 = vsel %vm394_vm8, %v689_v61, %v691_v10  ;;  %v2659_v61 = vstv %s2601_s26  ;;  %v758_v8 = vrot.slane %v752_v52, 1  ;;  %s2273_s26 = sld [smem:[#allocation3 + $0x2d]] }
  0xbd   : > { %v781_v10 = vsel %vm254_vm4, %v779_v3, %v780_v58  ;;  %v273_v31 = vrot.slane %v2667_v2, 2 }
  0xbe   : > { %v648_v24 = vsel %vm359_vm7, %v646_v14, %v647_v47  ;;  %v793_v47 = vstv %s2580_s21  ;;  %v202_v14 = vmul.f32 %v200_v34, %v2454_v16  ;;  %v760_v18 = vsel %vm219_vm3, %v758_v8, %v759_v30  ;;  %s2269_s21 = sld [smem:[#allocation3 + $0x1f]] }
  0xbf   : > { %v794_v59 = vmul.f32 %v793_v47, %v2438_v9  ;;  %v796_v20 = vmul.f32 %v793_v47, %v2478_v39  ;;  %v233_v30 = vmul.f32 %v2599_v32, %v2478_v39  ;;  %v2710_v34 = vmul.f32 %v2647_v56, %v2438_v9 }
  0xc0   : > { %v268_v8 = vmul.f32 %v2606_v36, %v2478_v39 }
  0xc1   : > { %569 = vrot.lane.b32.xlu1 %v566_v23, %s2398_s24  ;;  %v739_v23 = vsel %vm219_vm3, %v737_v13, %v738_v11  ;;  %v800_v11 = vrot.slane %v794_v59, 2 }
  0xc2   : > { %590 = vrot.lane.b32.xlu0 %v587_v26, %s2398_s24  ;;  %525 = vrot.lane.b32.xlu2 %v522_v27, %s2398_s24  ;;  %v212_v26 = vstv %s2221_s16  ;;  %v206_v27 = vstv %s2562_s15  ;;  %s2263_s15 = sld [smem:[#allocation3 + $0xa]] }
  0xc3   : > { %v2596_v28 = vmul.f32 %v212_v26, %v2454_v16  ;;  %v213_v35 = vmul.f32 %v212_v26, %v2440_v12  ;;  %v207_v40 = vmul.f32 %v206_v27, %v2438_v9  ;;  %v215_v0 = vmul.f32 %v212_v26, %v2456_v17  ;;  %s2264_s16 = sld [smem:[#allocation3 + $0x8a]] }
  0xc4   : > { %v208_v13 = vmul.f32 %v206_v27, %v2452_v15  ;;  %v272_v26 = vrot.slane %v2656_v60, 2 }
  0xc5   : > { %v220_v49 = vrot.slane %v213_v35, 1  ;;  %v209_v63 = vadd.f32 %v207_v40, %v201_v46 }
  0xc6   : > { %v210_v35 = vadd.f32 %v208_v13, %v202_v14  ;;  %v815_v13 = vmul.f32 %v814_v21, %v2440_v12 }
  0xc9   : > { %609 = vrot.lane.b32.xlu1 %v606_v37, %s2398_s24  ;;  %v2609_v37 = vstv %s2570_s19  ;;  %s2267_s19 = sld [smem:[#allocation3 + $0x18]] }
  0xca   : > { %630 = vrot.lane.b32.xlu0 %v627_v41, %s2398_s24  ;;  %548 = vrot.lane.b32.xlu2 %v545_v42, %s2398_s24  ;;  %v2615_v41 = vmul.f32 %v2599_v32, %v2438_v9  ;;  %v221_v42 = vrot.slane %v2596_v28, 1  ;;  %v2696_v27 = vmul.f32 %v2609_v37, %v2438_v9  ;;  %v2706_v33 = vmul.f32 %v2609_v37, %v2452_v15 }
  0xcc   : > { %v222_v57 = vsel %vm219_vm3, %v220_v49, %v221_v42  ;;  %v2722_v49 = vmul.f32 %v2647_v56, %v2452_v15  ;;  %v307_v36 = vrot.slane %v2696_v27, 3  ;;  %v308_v14 = vrot.slane %v2706_v33, 3 }
  0xcd   : > { %v227_v6 = vadd.f32 %v222_v57, %v209_v63 }
  0xce   : > { %v309_v2 = vsel %vm289_vm5, %v307_v36, %v308_v14 }
  0xd1   : > { %632 = vrot.lane.b32.xlu1 %v629_v51, %s2398_s24  ;;  %v2633_v51 = vmul.f32 %v793_v47, %v2452_v15 }
  0xd2   : > { %653 = vrot.lane.b32.xlu0 %v650_v54, %s2398_s24  ;;  %588 = vrot.lane.b32.xlu2 %v585_v55, %s2398_s24  ;;  %v247_v54 = vstv %s2586_s22  ;;  %v2643_v55 = vstv %s2590_s23  ;;  %s2270_s22 = sld [smem:[#allocation3 + $0x9f]] }
  0xd3   : > { %v2672_v7 = vmul.f32 %v247_v54, %v2454_v16  ;;  %v248_v29 = vmul.f32 %v247_v54, %v2440_v12  ;;  %v283_v28 = vmul.f32 %v2643_v55, %v2440_v12  ;;  %s2271_s23 = sld [smem:[#allocation3 + $0x26]] }
  0xd5   : > { %v256_v40 = vrot.slane %v2672_v7, 2  ;;  %v255_v50 = vrot.slane %v248_v29, 2 }
  0xd7   : > { %v257_v59 = vsel %vm254_vm4, %v255_v50, %v256_v40 }
  0xd9   : > { %672 = vrot.lane.b32.xlu1 %v669_v1, %s2398_s24  ;;  %v237_v1 = vrot.slane %v2615_v41, 1 }
  0xda   : > { %693 = vrot.lane.b32.xlu0 %v690_v4, %s2398_s24  ;;  %611 = vrot.lane.b32.xlu2 %v608_v5, %s2398_s24  ;;  %v801_v4 = vrot.slane %v2633_v51, 2  ;;  %v238_v5 = vrot.slane %v2639_v53, 1  ;;  %v240_v51 = vrot.slane %v233_v30, 1  ;;  %v250_v53 = vmul.f32 %v247_v54, %v2456_v17 }
  0xdc   : > { %v802_v22 = vsel %vm254_vm4, %v800_v11, %v801_v4  ;;  %v239_v38 = vsel %vm219_vm3, %v237_v1, %v238_v5  ;;  %v258_v7 = vrot.slane %v250_v53, 2 }
  0xe1   : > { %695 = vrot.lane.b32.xlu1 %v692_v19, %s2398_s24  ;;  %v223_v19 = vrot.slane %v215_v0, 1  ;;  %v856_v0 = vstv %s2684_s29  ;;  %s3051_s29 = sld [smem:[#allocation3 + $0x84]] }
  0xe2   : > { %742 = vrot.lane.b32.xlu0 %v739_v23, %s2399_s28  ;;  %651 = vrot.lane.b32.xlu2 %v648_v24, %s2398_s24  ;;  %v2689_v23 = vmul.f32 %v814_v21, %v2454_v16  ;;  %v817_v24 = vmul.f32 %v814_v21, %v2456_v17  ;;  %v857_v11 = vmul.f32 %v856_v0, %v2440_v12 }
  0xe3   : > { %v224_v32 = vsel %vm219_vm3, %v221_v42, %v223_v19  ;;  %v2729_v42 = vmul.f32 %v2643_v55, %v2454_v16  ;;  %v2771_v21 = vmul.f32 %v2659_v61, %v2454_v16 }
  0xe4   : > { %v822_v46 = vrot.slane %v2689_v23, 3  ;;  %v824_v47 = vrot.slane %v817_v24, 3  ;;  %v228_v52 = vadd.f32 %v224_v32, %v210_v35  ;;  %v275_v24 = vrot.slane %v268_v8, 2 }
  0xe5   : > { %v291_v43 = vrot.slane %v2729_v42, 3  ;;  %v863_v35 = vrot.slane %v857_v11, 4  ;;  %v303_v42 = vmul.f32 %v2609_v37, %v2478_v39  ;;  %v2811_v37 = vstv %s2764_s4  ;;  %s2279_s4 = sld [smem:[#allocation3 + $0x12]] }
  0xe6   : > { %v825_v1 = vsel %vm289_vm5, %v822_v46, %v824_v47  ;;  %v276_v53 = vsel %vm254_vm4, %v273_v31, %v275_v24 }
  0xe9   : > { %744 = vrot.lane.b32.xlu1 %v741_v44, %s2399_s28  ;;  %v803_v44 = vrot.slane %v796_v20, 2 }
  0xea   : > { %765 = vrot.lane.b32.xlu0 %v762_v45, %s2399_s28  ;;  %674 = vrot.lane.b32.xlu2 %v671_v48, %s2398_s24  ;;  %s2679_s24 = sld [smem:[#allocation3 + $0x97]]  ;;  %v244_v45 = vadd.f32 %v239_v38, %v227_v6  ;;  %v782_v48 = vrot.slane %v775_v25, 2  ;;  %v2746_v6 = vmul.f32 %v856_v0, %v2454_v16  ;;  %v285_v25 = vmul.f32 %v2643_v55, %v2456_v17 }
  0xeb   : > { %v804_v60 = vsel %vm254_vm4, %v801_v4, %v803_v44  ;;  %v241_v4 = vsel %vm219_vm3, %v238_v5, %v240_v51  ;;  %v274_v5 = vsel %vm254_vm4, %v272_v26, %v273_v31  ;;  %v259_v26 = vsel %vm254_vm4, %v256_v40, %v258_v7 }
  0xec   : > { %v2661_v62 = vpop.permute.xlu2 %427  ;;  %v262_v54 = vadd.f32 %v257_v59, %v244_v45  ;;  %v783_v3 = vsel %vm254_vm4, %v780_v58, %v782_v48  ;;  %v245_v58 = vadd.f32 %v241_v4, %v228_v52  ;;  %v864_v23 = vrot.slane %v2746_v6, 4 }
  0xed   : > { %v821_v38 = vrot.slane %v815_v13, 3  ;;  %v859_v44 = vmul.f32 %v856_v0, %v2456_v17  ;;  %v877_v45 = vstv %s2738_s30  ;;  %v343_v52 = vrot.slane %v2722_v49, 4  ;;  %s2277_s30 = sld [smem:[#allocation3 + $0xb]] }
  0xee   : > { %v279_v20 = vadd.f32 %v274_v5, %v262_v54  ;;  %v263_v30 = vadd.f32 %v259_v26, %v245_v58  ;;  %v865_v55 = vsel %vm324_vm6, %v863_v35, %v864_v23  ;;  %v2790_v48 = vmul.f32 %v877_v45, %v2452_v15 }
  0xef   : > { %v823_v40 = vsel %vm289_vm5, %v821_v38, %v822_v46  ;;  %v880_v50 = vmul.f32 %v877_v45, %v2478_v39  ;;  %v342_v46 = vrot.slane %v2710_v34, 4  ;;  %v352_v31 = vstv %s2754_s3  ;;  %s2278_s3 = sld [smem:[#allocation3 + $0x8b]] }
  0xf0   : > { %v835_v57 = vstv %s2679_s24  ;;  %v280_v59 = vadd.f32 %v276_v53, %v263_v30  ;;  %v866_v34 = vrot.slane %v859_v44, 4  ;;  %v326_v0 = vrot.slane %v2771_v21, 4  ;;  %s3049_s24 = sld [smem:[#allocation3 + $0x4]] }
  0xf1   : > { %784 = vrot.lane.b32.xlu1 %v781_v10, %s2399_s28  ;;  %v2735_v63 = vmul.f32 %v835_v57, %v2452_v15  ;;  %v836_v10 = vmul.f32 %v835_v57, %v2438_v9  ;;  %v838_v47 = vmul.f32 %v835_v57, %v2478_v39  ;;  %v318_v57 = vmul.f32 %v2659_v61, %v2440_v12 }
  0xf2   : > { %805 = vrot.lane.b32.xlu0 %v802_v22, %s2399_s28  ;;  %763 = vrot.lane.b32.xlu2 %v760_v18, %s2399_s28  ;;  %v290_v22 = vrot.slane %v283_v28, 3  ;;  %v293_v28 = vrot.slane %v285_v25, 3  ;;  %v885_v54 = vrot.slane %v2790_v48, 4  ;;  %v310_v4 = vrot.slane %v303_v42, 3 }
  0xf3   : > { %v843_v19 = vrot.slane %v2735_v63, 3  ;;  %v842_v27 = vrot.slane %v836_v10, 3  ;;  %v320_v7 = vmul.f32 %v2659_v61, %v2456_v17  ;;  %v325_v10 = vrot.slane %v318_v57, 4 }
  0xf4   : > { %v2714_v41 = vpop.permute.xlu2 %429  ;;  %v292_v29 = vsel %vm289_vm5, %v290_v22, %v291_v43  ;;  %v294_v8 = vsel %vm289_vm5, %v291_v43, %v293_v28  ;;  %v353_v58 = vmul.f32 %v352_v31, %v2440_v12  ;;  %v898_v13 = vstv %s2778_s5  ;;  %s2401_s5 = smov 124  }
  0xf5   : > { %v844_v32 = vsel %vm289_vm5, %v842_v27, %v843_v19  ;;  %v297_v51 = vadd.f32 %v292_v29, %v279_v20  ;;  %v298_v11 = vadd.f32 %v294_v8, %v280_v59  ;;  %v2825_v5 = vmul.f32 %v352_v31, %v2454_v16 }
  0xf6   : > { %v867_v36 = vsel %vm324_vm6, %v864_v23, %v866_v34  ;;  %v2829_v20 = vmul.f32 %v898_v13, %v2454_v16  ;;  %v919_v22 = vstv %s2784_s6  ;;  %v327_v61 = vsel %vm324_vm6, %v325_v10, %v326_v0  ;;  %s2280_s6 = sld [smem:[#allocation3 + $0x92]] }
  0xf7   : > { %v314_v6 = vadd.f32 %v309_v2, %v297_v51  ;;  %v2839_v24 = vmul.f32 %v919_v22, %v2452_v15  ;;  %v311_v23 = vsel %vm289_vm5, %v308_v14, %v310_v4  ;;  %v328_v26 = vrot.slane %v320_v7, 4 }
  0xf8   : > { %v899_v27 = vmul.f32 %v898_v13, %v2440_v12  ;;  %v338_v29 = vmul.f32 %v2647_v56, %v2478_v39  ;;  %v315_v30 = vadd.f32 %v311_v23, %v298_v11  ;;  %v920_v35 = vmul.f32 %v919_v22, %v2438_v9 }
  0xf9   : > { %807 = vrot.lane.b32.xlu1 %v804_v60, %s2399_s28  ;;  %v332_v25 = vadd.f32 %v327_v61, %v314_v6  ;;  %v878_v38 = vmul.f32 %v877_v45, %v2438_v9  ;;  %v344_v33 = vsel %vm324_vm6, %v342_v46, %v343_v52  ;;  %v371_v14 = vmul.f32 %v2811_v37, %v2438_v9 }
  0xfa   : > { %828 = vrot.lane.b32.xlu0 %v825_v1, %s2399_s28  ;;  %786 = vrot.lane.b32.xlu2 %v783_v3, %s2399_s28  ;;  %v887_v1 = vrot.slane %v880_v50, 4  ;;  %v845_v3 = vrot.slane %v838_v47, 3  ;;  %v906_v56 = vrot.slane %v2829_v20, 5  ;;  %v360_v45 = vrot.slane %v353_v58, 5 }
  0xfb   : > { %v927_v48 = vrot.slane %v2839_v24, 5  ;;  %v349_v50 = vadd.f32 %v344_v33, %v332_v25  ;;  %v355_v51 = vmul.f32 %v352_v31, %v2456_v17  ;;  %v329_v53 = vsel %vm324_vm6, %v326_v0, %v328_v26 }
  0xfc   : > { %v2766_v18 = vpop.permute.xlu2 %707  ;;  %v888_v43 = vsel %vm324_vm6, %v885_v54, %v887_v1  ;;  %v846_v21 = vsel %vm289_vm5, %v843_v19, %v845_v3  ;;  %v905_v28 = vrot.slane %v899_v27, 5  ;;  %v345_v42 = vrot.slane %v338_v29, 4 }
  0xfd   : > { %v333_v46 = vadd.f32 %v329_v53, %v315_v30  ;;  %v926_v57 = vrot.slane %v920_v35, 5  ;;  %v884_v59 = vrot.slane %v878_v38, 4  ;;  %v922_v34 = vmul.f32 %v919_v22, %v2478_v39 }
  0xfe   : > { %v907_v2 = vsel %vm359_vm7, %v905_v28, %v906_v56  ;;  %v940_v1 = vstv %s2832_s8  ;;  %v901_v3 = vmul.f32 %v898_v13, %v2456_v17  ;;  %v363_v11 = vrot.slane %v355_v51, 5  ;;  %s2282_s8 = sld [smem:[#allocation3 + $0x99]] }
  0xff   : > { %v928_v31 = vsel %vm359_vm7, %v926_v57, %v927_v48  ;;  %v886_v0 = vsel %vm324_vm6, %v884_v59, %v885_v54  ;;  %v2884_v6 = vmul.f32 %v940_v1, %v2454_v16  ;;  %v943_v4 = vmul.f32 %v940_v1, %v2456_v17 }
 0x100   : > { %v346_v54 = vsel %vm324_vm6, %v343_v52, %v345_v42  ;;  %v373_v13 = vmul.f32 %v2811_v37, %v2478_v39  ;;  %v405_v24 = vstv %s2868_s11  ;;  %v908_v52 = vrot.slane %v901_v3, 5  ;;  %s2283_s11 = sld [smem:[#allocation3 + $0x20]] }
 0x101   : > { %847 = vrot.lane.b32.xlu1 %v844_v32, %s2399_s28  ;;  %v387_v32 = vstv %s2813_s7  ;;  %v350_v22 = vadd.f32 %v346_v54, %v333_v46  ;;  %v948_v49 = vrot.slane %v2884_v6, 6  ;;  %v950_v25 = vrot.slane %v943_v4, 6  ;;  %s2281_s7 = sld [smem:[#allocation3 + $0x19]] }
 0x102   : > { %868 = vrot.lane.b32.xlu0 %v865_v55, %s2399_s28  ;;  %826 = vrot.lane.b32.xlu2 %v823_v40, %s2399_s28  ;;  %v2866_v55 = vmul.f32 %v2811_v37, %v2452_v15  ;;  %v361_v40 = vrot.slane %v2825_v5, 5  ;;  %v388_v8 = vmul.f32 %v387_v32, %v2440_v12  ;;  %v389_v10 = vmul.f32 %v387_v32, %v2454_v16 }
 0x103   : > { %v2804_v60 = vpop.permute.xlu0 %441  ;;  %v407_v23 = vmul.f32 %v405_v24, %v2452_v15  ;;  %v380_v29 = vrot.slane %v373_v13, 5  ;;  %v390_v30 = vmul.f32 %v387_v32, %v2456_v17  ;;  %v961_v38 = vstv %s2874_s12  ;;  %s2284_s12 = sld [smem:[#allocation3 + $0xa0]] }
 0x104   : > { %v2815_v63 = vpop.permute.xlu2 %723  ;;  %v378_v7 = vrot.slane %v2866_v55, 5  ;;  %v362_v58 = vsel %vm359_vm7, %v360_v45, %v361_v40  ;;  %v395_v26 = vrot.slane %v388_v8, 6  ;;  %v396_v27 = vrot.slane %v389_v10, 6 }
 0x105   : > { %v367_v20 = vadd.f32 %v362_v58, %v349_v50  ;;  %v364_v35 = vsel %vm359_vm7, %v361_v40, %v363_v11  ;;  %v963_v45 = vmul.f32 %v961_v38, %v2452_v15  ;;  %v406_v50 = vmul.f32 %v405_v24, %v2438_v9 }
 0x106   : > { %v951_v51 = vsel %vm394_vm8, %v948_v49, %v950_v25  ;;  %v909_v53 = vsel %vm359_vm7, %v906_v56, %v908_v52  ;;  %v413_v28 = vrot.slane %v407_v23, 6  ;;  %v397_v17 = vsel %vm394_vm8, %v395_v26, %v396_v27 }
 0x107   : > { %v962_v32 = vmul.f32 %v961_v38, %v2438_v9  ;;  %v381_v40 = vsel %vm359_vm7, %v378_v7, %v380_v29  ;;  %v408_v42 = vmul.f32 %v405_v24, %v2478_v39  ;;  %v941_v57 = vmul.f32 %v940_v1, %v2440_v12 }
 0x108   : > { %v969_v3 = vrot.slane %v963_v45, 6  ;;  %v964_v13 = vmul.f32 %v961_v38, %v2478_v39  ;;  %v996_v23 = vstv %s2929_s14  ;;  %v1031_v38 = vstv %s2264_s16  ;;  %s2286_s14 = sld [smem:[#allocation3 + $0xa7]] }
 0x109   : > { %870 = vrot.lane.b32.xlu1 %v867_v36, %s2399_s28  ;;  %v377_v36 = vrot.slane %v371_v14, 5  ;;  %v368_v14 = vadd.f32 %v364_v35, %v350_v22  ;;  %v968_v6 = vrot.slane %v962_v32, 6  ;;  %v415_v4 = vrot.slane %v408_v42, 6  ;;  %s2288_s16 = sld [smem:[#allocation3 + $0xae]] }
 0x10a   : > { %891 = vrot.lane.b32.xlu0 %v888_v43, %s2399_s28  ;;  %849 = vrot.lane.b32.xlu2 %v846_v21, %s2399_s28  ;;  %v929_v21 = vrot.slane %v922_v34, 5  ;;  %v947_v8 = vrot.slane %v941_v57, 6  ;;  %v971_v52 = vrot.slane %v964_v13, 6  ;;  %v998_v26 = vmul.f32 %v996_v23, %v2452_v15  ;;  %v2979_v13 = vld [vmem:[#allocation2 + $0x20] sm:$0xff] }
 0x10b   : > { %v2849_v19 = vpop.permute.xlu1 %443  ;;  %v379_v37 = vsel %vm359_vm7, %v377_v36, %v378_v7  ;;  %v385_v56 = vadd.f32 %v381_v40, %v368_v14  ;;  %v970_v58 = vsel %vm394_vm8, %v968_v6, %v969_v3  ;;  %v1034_v40 = vmul.f32 %v1031_v38, %v2478_v39 }
 0x10c   : > { %v2859_v44 = vpop.permute.xlu2 %462  ;;  %v2861_v47 = vpop.permute.xlu0 %709  ;;  %v384_v33 = vadd.f32 %v379_v37, %v367_v20  ;;  %v930_v55 = vsel %vm359_vm7, %v927_v48, %v929_v21  ;;  %v398_v48 = vrot.slane %v390_v30, 6  ;;  %v949_v11 = vsel %vm394_vm8, %v947_v8, %v948_v49 }
 0x10d   : > { %v416_v20 = vsel %vm394_vm8, %v413_v28, %v415_v4  ;;  %v1052_v57 = vstv %s2265_s18  ;;  %v1041_v4 = vrot.slane %v1034_v40, 1  ;;  %s2291_s18 = sld [smem:[#allocation3 + $0xc]] }
 0x10e   : > { %v402_v59 = vadd.f32 %v397_v17, %v384_v33  ;;  %v399_v7 = vsel %vm394_vm8, %v396_v27, %v398_v48  ;;  %v1010_v27 = vstv %s2263_s15  ;;  %v2956_v33 = vld [vmem:[#allocation2] sm:$0xff]  ;;  %s2287_s15 = sld [smem:[#allocation3 + $0x2e]] }
 0x10f   : > { %v403_v1 = vadd.f32 %v399_v7, %v385_v56  ;;  %v1012_v35 = vmul.f32 %v1010_v27, %v2454_v16  ;;  %v2969_v56 = vld [vmem:[#allocation2 + $0x8] sm:$0xff] }
 0x111   : > { %910 = vrot.lane.b32.xlu1 %v907_v2, %s2399_s28  ;;  %v420_v21 = vadd.f32 %v416_v20, %v403_v1  ;;  %v1094_v20 = vstv %s2267_s19  ;;  %s2292_s19 = sld [smem:[#allocation3 + $0x8c]] }
 0x112   : > { %931 = vrot.lane.b32.xlu0 %v928_v31, %s2399_s28  ;;  %889 = vrot.lane.b32.xlu2 %v886_v0, %s2399_s28  ;;  %v412_v31 = vrot.slane %v406_v50, 6  ;;  %v982_v0 = vstv %s2906_s13  ;;  %s2285_s13 = sld [smem:[#allocation3 + $0x27]] }
 0x113   : > { %v2898_v5 = vpop.permute.xlu1 %721  ;;  %v983_v54 = vmul.f32 %v982_v0, %v2440_v12  ;;  %v434_v49 = vadd.f32 %v2714_v41, %v420_v21  ;;  %v1033_v41 = vmul.f32 %v1031_v38, %v2452_v15 }
 0x114   : > { %v2900_v61 = vpop.permute.xlu2 %485  ;;  %v2902_v43 = vpop.permute.xlu0 %464  ;;  %v414_v9 = vsel %vm394_vm8, %v412_v31, %v413_v28 }
 0x115   : > { %v419_v10 = vadd.f32 %v414_v9, %v402_v59  ;;  %v448_v29 = vadd.f32 %v2849_v19, %v434_v49  ;;  %v1011_v19 = vmul.f32 %v2956_v33, %v1010_v27  ;;  %v1039_v15 = vrot.slane %v1033_v41, 1 }
 0x117   : > { %v433_v36 = vadd.f32 %v2661_v62, %v419_v10  ;;  %v984_v62 = vmul.f32 %v982_v0, %v2454_v16  ;;  %v2959_v16 = vld [vmem:[#allocation2 + $0x18] sm:$0xff]  ;;  %v1017_v28 = vrot.slane %v1011_v19, 1 }
 0x118   : > { %v997_v32 = vmul.f32 %v2959_v16, %v996_v23  ;;  %v1053_v23 = vmul.f32 %v2956_v33, %v1052_v57 }
 0x119   : > { %933 = vrot.lane.b32.xlu1 %v930_v55, %s2399_s28  ;;  %v447_v12 = vadd.f32 %v2804_v60, %v433_v36  ;;  %v972_v60 = vsel %vm394_vm8, %v969_v3, %v971_v52  ;;  %v1032_v55 = vmul.f32 %v2959_v16, %v1031_v38 }
 0x11a   : > { %954 = vrot.lane.b32.xlu0 %v951_v51, %s2399_s28  ;;  %912 = vrot.lane.b32.xlu2 %v909_v53, %s2399_s28  ;;  %v1018_v53 = vrot.slane %v1012_v35, 1 }
 0x11b   : > { %v484_v46 = vpop.permute.xlu1 %483  ;;  %v468_v37 = vadd.f32 %v2859_v44, %v447_v12  ;;  %v469_v44 = vadd.f32 %v2902_v43, %v448_v29  ;;  %v1038_v17 = vrot.slane %v1032_v55, 1  ;;  %v1096_v12 = vmul.f32 %v2969_v56, %v1094_v20 }
 0x11c   : > { %v2926_v2 = vpop.permute.xlu2 %525  ;;  %v505_v34 = vpop.permute.xlu0 %504 }
 0x11d   : > { %v489_v30 = vadd.f32 %v484_v46, %v468_v37  ;;  %v490_v43 = vadd.f32 %v2900_v61, %v469_v44  ;;  %v1019_v46 = vsel %vm219_vm3, %v1017_v28, %v1018_v53  ;;  %v1040_v59 = vsel %vm219_vm3, %v1038_v17, %v1039_v15 }
 0x11e   : > { %v1054_v61 = vmul.f32 %v2969_v56, %v1052_v57  ;;  %v1095_v37 = vmul.f32 %v2956_v33, %v1094_v20  ;;  %v1059_v44 = vrot.slane %v1053_v23, 2 }
 0x11f   : > { %v510_v45 = vadd.f32 %v505_v34, %v489_v30  ;;  %v2972_v34 = vld [vmem:[#allocation2 + $0x10] sm:$0x3f]  ;;  %v1102_v30 = vrot.slane %v1096_v12, 3 }
 0x120   : > { %v1055_v39 = vmul.f32 %v2972_v34, %v1052_v57  ;;  %v1013_v3 = vmul.f32 %v2972_v34, %v1010_v27  ;;  %v1060_v7 = vrot.slane %v1054_v61, 2  ;;  %v1101_v41 = vrot.slane %v1095_v37, 3 }
 0x121   : > { %973 = vrot.lane.b32.xlu1 %v970_v58, %s2399_s28  ;;  %v531_v48 = vadd.f32 %v2926_v2, %v510_v45  ;;  %v1097_v19 = vmul.f32 %v2972_v34, %v1094_v20  ;;  %v1115_v45 = vstv %s2268_s20  ;;  %s2402_s20 = smov 123  }
 0x122   : > { %987 = vrot.lane.b32.xlu0 %v983_v54, %s2400_s17  ;;  %952 = vrot.lane.b32.xlu2 %v949_v11, %s2399_s28  ;;  %v1062_v8 = vrot.slane %v1055_v39, 2  ;;  %v1020_v10 = vrot.slane %v1013_v3, 1  ;;  %v1042_v11 = vsel %vm219_vm3, %v1039_v15, %v1041_v4  ;;  %v1061_v15 = vsel %vm254_vm4, %v1059_v44, %v1060_v7 }
 0x123   : > { %v507_v22 = vpop.permute.xlu1 %506  ;;  %v1136_v3 = vstv %s2269_s21  ;;  %s2293_s21 = sld [smem:[#allocation3 + $0x13]] }
 0x124   : > { %v549_v24 = vpop.permute.xlu2 %548  ;;  %v528_v25 = vpop.permute.xlu0 %527  ;;  %v511_v42 = vadd.f32 %v507_v22, %v490_v43  ;;  %v1063_v22 = vsel %vm254_vm4, %v1060_v7, %v1062_v8  ;;  %v1021_v21 = vsel %vm219_vm3, %v1018_v53, %v1020_v10  ;;  %v1103_v53 = vsel %vm289_vm5, %v1101_v41, %v1102_v30 }
 0x125   : > { %v1117_v43 = vmul.f32 %v2979_v13, %v1115_v45  ;;  %v1137_v8 = vmul.f32 %v2956_v33, %v1136_v3  ;;  %v1116_v10 = vmul.f32 %v2959_v16, %v1115_v45 }
 0x126   : > { %v532_v0 = vadd.f32 %v528_v25, %v511_v42 }
 0x127   : > { %v1123_v57 = vrot.slane %v1117_v43, 3  ;;  %v1143_v12 = vrot.slane %v1137_v8, 4 }
 0x128   : > { %v553_v54 = vadd.f32 %v549_v24, %v532_v0  ;;  %v1138_v0 = vmul.f32 %v2969_v56, %v1136_v3 }
 0x129   : > { %989 = vrot.lane.b32.xlu1 %v984_v62, %s2400_s17 }
 0x12a   : > { %1003 = vrot.lane.b32.xlu0 %v998_v26, %s2400_s17  ;;  %975 = vrot.lane.b32.xlu2 %v972_v60, %s2399_s28  ;;  %s2266_s28 = sld [smem:[#allocation3 + $0x91]]  ;;  %v1144_v20 = vrot.slane %v1138_v0, 4 }
 0x12b   : > { %v547_v14 = vpop.permute.xlu1 %546 }
 0x12c   : > { %v589_v50 = vpop.permute.xlu2 %588  ;;  %v568_v51 = vpop.permute.xlu0 %567  ;;  %v552_v2 = vadd.f32 %v547_v14, %v531_v48  ;;  %v1145_v37 = vsel %vm324_vm6, %v1143_v12, %v1144_v20 }
 0x12e   : > { %v573_v1 = vadd.f32 %v568_v51, %v552_v2 }
 0x130   : > { %v1073_v58 = vstv %s2266_s28  ;;  %v594_v25 = vadd.f32 %v589_v50, %v573_v1  ;;  %v2993_v50 = vld [vmem:[#allocation2 + $0x28] sm:$0x3f]  ;;  %s3154_s28 = sld [smem:[#allocation3 + $0x85]] }
 0x131   : > { %1022 = vrot.lane.b32.xlu1 %v1019_v46, %s2400_s17  ;;  %v1075_v36 = vmul.f32 %v2979_v13, %v1073_v58  ;;  %v1074_v24 = vmul.f32 %v2959_v16, %v1073_v58  ;;  %v1076_v51 = vmul.f32 %v2993_v50, %v1073_v58  ;;  %v1118_v28 = vmul.f32 %v2993_v50, %v1115_v45 }
 0x132   : > { %1043 = vrot.lane.b32.xlu0 %v1040_v59, %s2400_s17  ;;  %1001 = vrot.lane.b32.xlu2 %v997_v32, %s2400_s17  ;;  %v1104_v46 = vrot.slane %v1097_v19, 3 }
 0x133   : > { %v570_v31 = vpop.permute.xlu1 %569  ;;  %v1081_v29 = vrot.slane %v1075_v36, 2  ;;  %v1080_v60 = vrot.slane %v1074_v24, 2  ;;  %v1125_v59 = vrot.slane %v1118_v28, 3  ;;  %v1083_v61 = vrot.slane %v1076_v51, 2 }
 0x134   : > { %v612_v6 = vpop.permute.xlu2 %611  ;;  %v591_v9 = vpop.permute.xlu0 %590  ;;  %v574_v52 = vadd.f32 %v570_v31, %v553_v54  ;;  %v1105_v31 = vsel %vm289_vm5, %v1102_v30, %v1104_v46  ;;  %v1139_v30 = vmul.f32 %v2972_v34, %v1136_v3  ;;  %v1220_v28 = vstv %s2273_s26  ;;  %s2297_s26 = sld [smem:[#allocation3 + $0x21]] }
 0x135   : > { %v1082_v55 = vsel %vm254_vm4, %v1080_v60, %v1081_v29  ;;  %v1084_v4 = vsel %vm254_vm4, %v1081_v29, %v1083_v61  ;;  %v1221_v46 = vmul.f32 %v2956_v33, %v1220_v28  ;;  %v1223_v8 = vmul.f32 %v2972_v34, %v1220_v28 }
 0x136   : > { %v595_v35 = vadd.f32 %v591_v9, %v574_v52  ;;  %v1126_v9 = vsel %vm289_vm5, %v1123_v57, %v1125_v59  ;;  %v1146_v45 = vrot.slane %v1139_v30, 4 }
 0x137   : > { %v1230_v12 = vrot.slane %v1223_v8, 6 }
 0x138   : > { %v616_v17 = vadd.f32 %v612_v6, %v595_v35  ;;  %v1157_v6 = vstv %s2270_s22  ;;  %s2294_s22 = sld [smem:[#allocation3 + $0x93]] }
 0x139   : > { %1045 = vrot.lane.b32.xlu1 %v1042_v11, %s2400_s17  ;;  %v1159_v7 = vmul.f32 %v2979_v13, %v1157_v6  ;;  %v1158_v58 = vmul.f32 %v2959_v16, %v1157_v6  ;;  %v1160_v24 = vmul.f32 %v2993_v50, %v1157_v6  ;;  %v1227_v6 = vrot.slane %v1221_v46, 6 }
 0x13a   : > { %1066 = vrot.lane.b32.xlu0 %v1063_v22, %s2400_s17  ;;  %1024 = vrot.lane.b32.xlu2 %v1021_v21, %s2400_s17 }
 0x13b   : > { %v610_v49 = vpop.permute.xlu1 %609  ;;  %v1165_v22 = vrot.slane %v1159_v7, 4  ;;  %v1164_v52 = vrot.slane %v1158_v58, 4  ;;  %v1167_v44 = vrot.slane %v1160_v24, 4 }
 0x13c   : > { %v615_v62 = vadd.f32 %v610_v49, %v594_v25  ;;  %v652_v26 = vpop.permute.xlu2 %651  ;;  %v631_v27 = vpop.permute.xlu0 %630  ;;  %v1122_v25 = vrot.slane %v1116_v10, 3 }
 0x13e   : > { %v636_v38 = vadd.f32 %v631_v27, %v615_v62  ;;  %v1124_v23 = vsel %vm289_vm5, %v1122_v25, %v1123_v57  ;;  %v1178_v62 = vstv %s2271_s23  ;;  %s2295_s23 = sld [smem:[#allocation3 + $0x1a]] }
 0x13f   : > { %v1180_v27 = vmul.f32 %v2969_v56, %v1178_v62  ;;  %v1181_v29 = vmul.f32 %v2972_v34, %v1178_v62  ;;  %v1179_v57 = vmul.f32 %v2956_v33, %v1178_v62 }
 0x140   : > { %v657_v14 = vadd.f32 %v652_v26, %v636_v38  ;;  %v1166_v26 = vsel %vm324_vm6, %v1164_v52, %v1165_v22 }
 0x141   : > { %1085 = vrot.lane.b32.xlu1 %v1082_v55, %s2400_s17  ;;  %v1188_v55 = vrot.slane %v1181_v29, 5 }
 0x142   : > { %1106 = vrot.lane.b32.xlu0 %v1103_v53, %s2400_s17  ;;  %1064 = vrot.lane.b32.xlu2 %v1061_v15, %s2400_s17  ;;  %v1199_v15 = vstv %s2272_s25  ;;  %s2296_s25 = sld [smem:[#allocation3 + $0x9a]] }
 0x143   : > { %v633_v32 = vpop.permute.xlu1 %632  ;;  %v1201_v43 = vmul.f32 %v2979_v13, %v1199_v15 }
 0x144   : > { %v637_v40 = vadd.f32 %v633_v32, %v616_v17  ;;  %v675_v48 = vpop.permute.xlu2 %674  ;;  %v654_v42 = vpop.permute.xlu0 %653  ;;  %v1147_v32 = vsel %vm324_vm6, %v1144_v20, %v1146_v45  ;;  %v1290_v45 = vstv %s2277_s30  ;;  %s2301_s30 = sld [smem:[#allocation3 + $0x2f]] }
 0x145   : > { %v1207_v3 = vrot.slane %v1201_v43, 5 }
 0x146   : > { %v658_v39 = vadd.f32 %v654_v42, %v637_v40  ;;  %v1222_v40 = vmul.f32 %v2969_v56, %v1220_v28 }
 0x148   : > { %v679_v2 = vadd.f32 %v675_v48, %v658_v39 }
 0x149   : > { %1108 = vrot.lane.b32.xlu1 %v1105_v31, %s2400_s17 }
 0x14a   : > { %1129 = vrot.lane.b32.xlu0 %v1126_v9, %s2400_s17  ;;  %1087 = vrot.lane.b32.xlu2 %v1084_v4, %s2400_s17  ;;  %v1241_v9 = vstv %s2274_s27  ;;  %s2298_s27 = sld [smem:[#allocation3 + $0xa1]] }
 0x14b   : > { %v673_v1 = vpop.permute.xlu1 %672  ;;  %v1243_v10 = vmul.f32 %v2979_v13, %v1241_v9  ;;  %v1242_v29 = vmul.f32 %v2959_v16, %v1241_v9 }
 0x14c   : > { %v678_v54 = vadd.f32 %v673_v1, %v657_v14  ;;  %v764_v11 = vpop.permute.xlu2 %763  ;;  %v694_v36 = vpop.permute.xlu0 %693  ;;  %v1186_v14 = vrot.slane %v1180_v27, 5 }
 0x14d   : > { %v1249_v25 = vrot.slane %v1243_v10, 6 }
 0x14e   : > { %v699_v21 = vadd.f32 %v694_v36, %v678_v54  ;;  %v1189_v17 = vsel %vm359_vm7, %v1186_v14, %v1188_v55  ;;  %v1244_v54 = vmul.f32 %v2993_v50, %v1241_v9 }
 0x150   : > { %v713_v49 = vadd.f32 %v2766_v18, %v699_v21  ;;  %v1251_v52 = vrot.slane %v1244_v54, 6 }
 0x151   : > { %1148 = vrot.lane.b32.xlu1 %v1145_v37, %s2400_s17 }
 0x152   : > { %v727_v35 = vadd.f32 %v2898_v5, %v713_v49  ;;  %1169 = vrot.lane.b32.xlu0 %v1166_v26, %s2400_s17  ;;  %1127 = vrot.lane.b32.xlu2 %v1124_v23, %s2400_s17  ;;  %v1168_v5 = vsel %vm324_vm6, %v1165_v22, %v1167_v44  ;;  %v1252_v62 = vsel %vm394_vm8, %v1249_v25, %v1251_v52 }
 0x153   : > { %v696_v18 = vpop.permute.xlu1 %695 }
 0x154   : > { %v700_v38 = vadd.f32 %v696_v18, %v679_v2  ;;  %v787_v60 = vpop.permute.xlu2 %786  ;;  %v743_v41 = vpop.permute.xlu0 %742  ;;  %v1228_v2 = vrot.slane %v1222_v40, 6 }
 0x155   : > { %v748_v19 = vadd.f32 %v743_v41, %v727_v35 }
 0x156   : > { %v714_v51 = vadd.f32 %v2861_v47, %v700_v38  ;;  %v1200_v47 = vmul.f32 %v2959_v16, %v1199_v15  ;;  %v1229_v1 = vsel %vm394_vm8, %v1227_v6, %v1228_v2  ;;  %v1231_v23 = vsel %vm394_vm8, %v1228_v2, %v1230_v12 }
 0x157   : > { %v769_v53 = vadd.f32 %v764_v11, %v748_v19  ;;  %v1202_v11 = vmul.f32 %v2993_v50, %v1199_v15  ;;  %v1262_v38 = vstv %s3049_s24  ;;  %v1248_v19 = vrot.slane %v1242_v29, 6  ;;  %s2299_s24 = sld [smem:[#allocation3 + $0x28]] }
 0x158   : > { %v728_v48 = vadd.f32 %v2815_v63, %v714_v51  ;;  %v1206_v0 = vrot.slane %v1200_v47, 5  ;;  %v1185_v63 = vrot.slane %v1179_v57, 5  ;;  %v1263_v44 = vmul.f32 %v2956_v33, %v1262_v38 }
 0x159   : > { %1171 = vrot.lane.b32.xlu1 %v1168_v5, %s2400_s17  ;;  %v1209_v24 = vrot.slane %v1202_v11, 5  ;;  %v1250_v51 = vsel %vm394_vm8, %v1248_v19, %v1249_v25  ;;  %v1293_v15 = vmul.f32 %v2972_v34, %v1290_v45  ;;  %v1264_v57 = vmul.f32 %v2969_v56, %v1262_v38 }
 0x15a   : > { %1192 = vrot.lane.b32.xlu0 %v1189_v17, %s2400_s17  ;;  %1150 = vrot.lane.b32.xlu2 %v1147_v32, %s2400_s17  ;;  %v1208_v7 = vsel %vm359_vm7, %v1206_v0, %v1207_v3  ;;  %v1187_v58 = vsel %vm359_vm7, %v1185_v63, %v1186_v14  ;;  %v1291_v6 = vmul.f32 %v2956_v33, %v1290_v45  ;;  %v1353_v11 = vstv %s2280_s6  ;;  %s2305_s6 = sld [smem:[#allocation3 + $0xd]] }
 0x15b   : > { %v745_v42 = vpop.permute.xlu1 %744  ;;  %v1210_v26 = vsel %vm359_vm7, %v1207_v3, %v1209_v24  ;;  %v1300_v40 = vrot.slane %v1293_v15, 1  ;;  %v1356_v52 = vmul.f32 %v2993_v50, %v1353_v11  ;;  %v1354_v15 = vmul.f32 %v2959_v16, %v1353_v11 }
 0x15c   : > { %v749_v59 = vadd.f32 %v745_v42, %v728_v48  ;;  %v827_v61 = vpop.permute.xlu2 %826  ;;  %v766_v39 = vpop.permute.xlu0 %765  ;;  %v1311_v42 = vstv %s2278_s3  ;;  %v1297_v54 = vrot.slane %v1291_v6, 1  ;;  %s2302_s3 = sld [smem:[#allocation3 + $0xaf]] }
 0x15d   : > { %v1312_v2 = vmul.f32 %v2959_v16, %v1311_v42  ;;  %v1314_v24 = vmul.f32 %v2993_v50, %v1311_v42  ;;  %v1363_v29 = vrot.slane %v1356_v52, 2 }
 0x15e   : > { %v770_v31 = vadd.f32 %v766_v39, %v749_v59  ;;  %v1313_v59 = vmul.f32 %v2979_v13, %v1311_v42  ;;  %v1360_v42 = vrot.slane %v1354_v15, 2 }
 0x160   : > { %v791_v4 = vadd.f32 %v787_v60, %v770_v31  ;;  %v1276_v60 = vstv %s3051_s29  ;;  %s2300_s29 = sld [smem:[#allocation3 + $0xa8]] }
 0x161   : > { %1211 = vrot.lane.b32.xlu1 %v1208_v7, %s2400_s17  ;;  %v1277_v55 = vmul.f32 %v2959_v16, %v1276_v60  ;;  %v1278_v47 = vmul.f32 %v2979_v13, %v1276_v60  ;;  %v1319_v7 = vrot.slane %v1313_v59, 1 }
 0x162   : > { %1232 = vrot.lane.b32.xlu0 %v1229_v1, %s2400_s17  ;;  %1190 = vrot.lane.b32.xlu2 %v1187_v58, %s2400_s17  ;;  %v1318_v1 = vrot.slane %v1312_v2, 1 }
 0x163   : > { %v785_v36 = vpop.permute.xlu1 %784 }
 0x164   : > { %v790_v20 = vadd.f32 %v785_v36, %v769_v53  ;;  %v850_v22 = vpop.permute.xlu2 %849  ;;  %v806_v21 = vpop.permute.xlu0 %805  ;;  %v1292_v53 = vmul.f32 %v2969_v56, %v1290_v45 }
 0x166   : > { %v811_v49 = vadd.f32 %v806_v21, %v790_v20  ;;  %v1298_v32 = vrot.slane %v1292_v53, 1  ;;  %v1320_v20 = vsel %vm219_vm3, %v1318_v1, %v1319_v7  ;;  %v1355_v21 = vmul.f32 %v2979_v13, %v1353_v11 }
 0x168   : > { %v832_v37 = vadd.f32 %v827_v61, %v811_v49  ;;  %v1332_v61 = vstv %s2279_s4  ;;  %v1301_v39 = vsel %vm219_vm3, %v1298_v32, %v1300_v40  ;;  %v1299_v25 = vsel %vm219_vm3, %v1297_v54, %v1298_v32  ;;  %s3248_s4 = sld [smem:[#allocation3 + $0x6]] }
 0x169   : > { %1234 = vrot.lane.b32.xlu1 %v1231_v23, %s2400_s17  ;;  %v1334_v3 = vmul.f32 %v2969_v56, %v1332_v61  ;;  %v1333_v0 = vmul.f32 %v2956_v33, %v1332_v61  ;;  %v1437_v54 = vstv %s2284_s12  ;;  %s2308_s12 = sld [smem:[#allocation3 + $0x94]] }
 0x16a   : > { %1255 = vrot.lane.b32.xlu0 %v1252_v62, %s2400_s17  ;;  %1213 = vrot.lane.b32.xlu2 %v1210_v26, %s2400_s17  ;;  %v1438_v52 = vmul.f32 %v2959_v16, %v1437_v54 }
 0x16b   : > { %v808_v27 = vpop.permute.xlu1 %807  ;;  %v1340_v8 = vrot.slane %v1334_v3, 2  ;;  %v1339_v58 = vrot.slane %v1333_v0, 2 }
 0x16c   : > { %v812_v30 = vadd.f32 %v808_v27, %v791_v4  ;;  %v890_v35 = vpop.permute.xlu2 %889  ;;  %v829_v18 = vpop.permute.xlu0 %828  ;;  %v1361_v27 = vrot.slane %v1355_v21, 2 }
 0x16d   : > { %v1341_v12 = vsel %vm254_vm4, %v1339_v58, %v1340_v8 }
 0x16e   : > { %v833_v41 = vadd.f32 %v829_v18, %v812_v30  ;;  %v1321_v30 = vrot.slane %v1314_v24, 1  ;;  %v1374_v18 = vstv %s2281_s7  ;;  %v1364_v19 = vsel %vm254_vm4, %v1361_v27, %v1363_v29  ;;  %s2306_s7 = sld [smem:[#allocation3 + $0x8d]] }
 0x16f   : > { %v1375_v45 = vmul.f32 %v2956_v33, %v1374_v18  ;;  %v1362_v2 = vsel %vm254_vm4, %v1360_v42, %v1361_v27  ;;  %v1377_v0 = vmul.f32 %v2972_v34, %v1374_v18  ;;  %v1500_v42 = vstv %s2287_s15  ;;  %s2311_s15 = sld [smem:[#allocation3 + $0x22]] }
 0x170   : > { %v854_v14 = vadd.f32 %v850_v22, %v833_v41  ;;  %v1335_v22 = vmul.f32 %v2972_v34, %v1332_v61  ;;  %v1376_v41 = vmul.f32 %v2969_v56, %v1374_v18 }
 0x171   : > { %1267 = vrot.lane.b32.xlu1 %v1263_v44, %s2401_s5  ;;  %v1395_v44 = vstv %s2282_s8  ;;  %v1384_v1 = vrot.slane %v1377_v0, 3  ;;  %s2403_s8 = smov 122  }
 0x172   : > { %1281 = vrot.lane.b32.xlu0 %v1277_v55, %s2401_s5  ;;  %1253 = vrot.lane.b32.xlu2 %v1250_v51, %s2400_s17  ;;  %v1342_v26 = vrot.slane %v1335_v22, 2  ;;  %v1397_v55 = vmul.f32 %v2979_v13, %v1395_v44  ;;  %v1396_v53 = vmul.f32 %v2959_v16, %v1395_v44  ;;  %v1398_v61 = vmul.f32 %v2993_v50, %v1395_v44  ;;  %s3144_s17 = sld [smem:[#allocation3 + $0x5]] }
 0x173   : > { %v848_v5 = vpop.permute.xlu1 %847  ;;  %v1458_v22 = vstv %s2285_s13  ;;  %s2309_s13 = sld [smem:[#allocation3 + $0x1b]] }
 0x174   : > { %v853_v43 = vadd.f32 %v848_v5, %v832_v37  ;;  %v913_v28 = vpop.permute.xlu2 %912  ;;  %v869_v17 = vpop.permute.xlu0 %868  ;;  %v1343_v60 = vsel %vm254_vm4, %v1340_v8, %v1342_v26  ;;  %v1403_v32 = vrot.slane %v1397_v55, 3 }
 0x176   : > { %v874_v48 = vadd.f32 %v869_v17, %v853_v43  ;;  %v1382_v17 = vrot.slane %v1376_v41, 3 }
 0x178   : > { %v895_v46 = vadd.f32 %v890_v35, %v874_v48  ;;  %v1381_v48 = vrot.slane %v1375_v45, 3 }
 0x179   : > { %1283 = vrot.lane.b32.xlu1 %v1278_v47, %s2401_s5  ;;  %v1402_v47 = vrot.slane %v1396_v53, 3 }
 0x17a   : > { %1304 = vrot.lane.b32.xlu0 %v1301_v39, %s2401_s5  ;;  %1269 = vrot.lane.b32.xlu2 %v1264_v57, %s2401_s5  ;;  %v1383_v59 = vsel %vm289_vm5, %v1381_v48, %v1382_v17 }
 0x17b   : > { %v871_v31 = vpop.permute.xlu1 %870  ;;  %v1404_v3 = vsel %vm289_vm5, %v1402_v47, %v1403_v32 }
 0x17c   : > { %v875_v63 = vadd.f32 %v871_v31, %v854_v14  ;;  %v953_v9 = vpop.permute.xlu2 %952  ;;  %v892_v4 = vpop.permute.xlu0 %891  ;;  %v1322_v14 = vsel %vm219_vm3, %v1319_v7, %v1321_v30  ;;  %v1405_v7 = vrot.slane %v1398_v61, 3  ;;  %v1521_v61 = vstv %s2288_s16  ;;  %s2312_s16 = sld [smem:[#allocation3 + $0xa2]] }
 0x17e   : > { %v896_v10 = vadd.f32 %v892_v4, %v875_v63 }
 0x180   : > { %v917_v36 = vadd.f32 %v913_v28, %v896_v10 }
 0x181   : > { %1323 = vrot.lane.b32.xlu1 %v1320_v20, %s2401_s5  ;;  %v1439_v20 = vmul.f32 %v2979_v13, %v1437_v54 }
 0x182   : > { %1344 = vrot.lane.b32.xlu0 %v1341_v12, %s2401_s5  ;;  %1302 = vrot.lane.b32.xlu2 %v1299_v25, %s2401_s5  ;;  %v1385_v12 = vsel %vm289_vm5, %v1382_v17, %v1384_v1  ;;  %v1460_v25 = vmul.f32 %v2969_v56, %v1458_v22 }
 0x183   : > { %v911_v49 = vpop.permute.xlu1 %910  ;;  %v1445_v27 = vrot.slane %v1439_v20, 4 }
 0x184   : > { %v916_v37 = vadd.f32 %v911_v49, %v895_v46  ;;  %v976_v23 = vpop.permute.xlu2 %975  ;;  %v932_v62 = vpop.permute.xlu0 %931  ;;  %v1416_v46 = vstv %s2283_s11  ;;  %v1459_v49 = vmul.f32 %v2956_v33, %v1458_v22  ;;  %v1466_v29 = vrot.slane %v1460_v25, 5  ;;  %s2307_s11 = sld [smem:[#allocation3 + $0x14]] }
 0x185   : > { %v1418_v39 = vmul.f32 %v2969_v56, %v1416_v46  ;;  %v1419_v31 = vmul.f32 %v2972_v34, %v1416_v46  ;;  %v1503_v25 = vmul.f32 %v2972_v34, %v1500_v42 }
 0x186   : > { %v937_v35 = vadd.f32 %v932_v62, %v916_v37  ;;  %v1417_v37 = vmul.f32 %v2956_v33, %v1416_v46  ;;  %v1465_v18 = vrot.slane %v1459_v49, 5 }
 0x187   : > { %v1424_v8 = vrot.slane %v1418_v39, 4  ;;  %v1426_v10 = vrot.slane %v1419_v31, 4  ;;  %v1501_v31 = vmul.f32 %v2956_v33, %v1500_v42 }
 0x188   : > { %v958_v38 = vadd.f32 %v953_v9, %v937_v35  ;;  %v1444_v35 = vrot.slane %v1438_v52, 4  ;;  %v1467_v55 = vsel %vm359_vm7, %v1465_v18, %v1466_v29  ;;  %v1570_v18 = vstv %s2291_s18  ;;  %s2314_s18 = sld [smem:[#allocation3 + $0xa9]] }
 0x189   : > { %1346 = vrot.lane.b32.xlu1 %v1343_v60, %s2401_s5  ;;  %v1427_v21 = vsel %vm324_vm6, %v1424_v8, %v1426_v10  ;;  %v1461_v60 = vmul.f32 %v2972_v34, %v1458_v22  ;;  %v1524_v22 = vmul.f32 %v2993_v50, %v1521_v61 }
 0x18a   : > { %1367 = vrot.lane.b32.xlu0 %v1364_v19, %s2401_s5  ;;  %1325 = vrot.lane.b32.xlu2 %v1322_v14, %s2401_s5  ;;  %v1446_v44 = vsel %vm324_vm6, %v1444_v35, %v1445_v27  ;;  %v1479_v19 = vstv %s2286_s14  ;;  %v1440_v14 = vmul.f32 %v2993_v50, %v1437_v54  ;;  %s2310_s14 = sld [smem:[#allocation3 + $0x9b]] }
 0x18b   : > { %v934_v51 = vpop.permute.xlu1 %933  ;;  %v1482_v53 = vmul.f32 %v2993_v50, %v1479_v19  ;;  %v1468_v17 = vrot.slane %v1461_v60, 5  ;;  %v1572_v60 = vmul.f32 %v2969_v56, %v1570_v18 }
 0x18c   : > { %v938_v5 = vadd.f32 %v934_v51, %v917_v36  ;;  %v1002_v43 = vpop.permute.xlu2 %1001  ;;  %v955_v28 = vpop.permute.xlu0 %954  ;;  %v1406_v36 = vsel %vm289_vm5, %v1403_v32, %v1405_v7  ;;  %v1481_v51 = vmul.f32 %v2979_v13, %v1479_v19  ;;  %v1447_v48 = vrot.slane %v1440_v14, 4 }
 0x18e   : > { %v959_v40 = vadd.f32 %v955_v28, %v938_v5  ;;  %v1487_v32 = vrot.slane %v1481_v51, 5  ;;  %v1578_v51 = vrot.slane %v1572_v60, 1 }
 0x190   : > { %v980_v57 = vadd.f32 %v976_v23, %v959_v40  ;;  %v1489_v40 = vrot.slane %v1482_v53, 5 }
 0x191   : > { %1386 = vrot.lane.b32.xlu1 %v1383_v59, %s2401_s5  ;;  %v1502_v59 = vmul.f32 %v2969_v56, %v1500_v42 }
 0x192   : > { %1407 = vrot.lane.b32.xlu0 %v1404_v3, %s2401_s5  ;;  %1365 = vrot.lane.b32.xlu2 %v1362_v2, %s2401_s5  ;;  %v1490_v39 = vsel %vm359_vm7, %v1487_v32, %v1489_v40  ;;  %v1448_v3 = vsel %vm324_vm6, %v1445_v27, %v1447_v48  ;;  %v1523_v2 = vmul.f32 %v2979_v13, %v1521_v61  ;;  %v1542_v27 = vstv %s3144_s17  ;;  %s2313_s17 = sld [smem:[#allocation3 + $0x29]] }
 0x193   : > { %v974_v6 = vpop.permute.xlu1 %973  ;;  %v1544_v35 = vmul.f32 %v2969_v56, %v1542_v27 }
 0x194   : > { %v979_v63 = vadd.f32 %v974_v6, %v958_v38  ;;  %v1025_v9 = vpop.permute.xlu2 %1024  ;;  %v988_v4 = vpop.permute.xlu0 %987  ;;  %v1423_v38 = vrot.slane %v1417_v37, 4  ;;  %v1522_v6 = vmul.f32 %v2959_v16, %v1521_v61  ;;  %v1529_v10 = vrot.slane %v1523_v2, 6 }
 0x196   : > { %v993_v58 = vadd.f32 %v988_v4, %v979_v63  ;;  %v1425_v45 = vsel %vm324_vm6, %v1423_v38, %v1424_v8  ;;  %v1480_v63 = vmul.f32 %v2959_v16, %v1479_v19  ;;  %v1508_v8 = vrot.slane %v1502_v59, 6 }
 0x197   : > { %v1528_v54 = vrot.slane %v1522_v6, 6 }
 0x198   : > { %v1007_v11 = vadd.f32 %v1002_v43, %v993_v58  ;;  %v1507_v58 = vrot.slane %v1501_v31, 6 }
 0x199   : > { %1409 = vrot.lane.b32.xlu1 %v1406_v36, %s2401_s5 }
 0x19a   : > { %1430 = vrot.lane.b32.xlu0 %v1427_v21, %s2401_s5  ;;  %1388 = vrot.lane.b32.xlu2 %v1385_v12, %s2401_s5  ;;  %v1509_v20 = vsel %vm394_vm8, %v1507_v58, %v1508_v8  ;;  %v1530_v21 = vsel %vm394_vm8, %v1528_v54, %v1529_v10 }
 0x19b   : > { %v990_v24 = vpop.permute.xlu1 %989 }
 0x19c   : > { %v994_v23 = vadd.f32 %v990_v24, %v980_v57  ;;  %v1065_v62 = vpop.permute.xlu2 %1064  ;;  %v1004_v26 = vpop.permute.xlu0 %1003  ;;  %v1469_v57 = vsel %vm359_vm7, %v1466_v29, %v1468_v17  ;;  %v1573_v17 = vmul.f32 %v2972_v34, %v1570_v18 }
 0x19e   : > { %v1008_v30 = vadd.f32 %v1004_v26, %v994_v23  ;;  %v1531_v23 = vrot.slane %v1524_v22, 6  ;;  %v1580_v61 = vrot.slane %v1573_v17, 1 }
 0x1a0   : > { %v1029_v41 = vadd.f32 %v1025_v9, %v1008_v30  ;;  %v1532_v30 = vsel %vm394_vm8, %v1529_v10, %v1531_v23  ;;  %v1581_v6 = vsel %vm219_vm3, %v1578_v51, %v1580_v61 }
 0x1a1   : > { %1449 = vrot.lane.b32.xlu1 %v1446_v44, %s2401_s5  ;;  %v1571_v44 = vmul.f32 %v2956_v33, %v1570_v18 }
 0x1a2   : > { %1470 = vrot.lane.b32.xlu0 %v1467_v55, %s2401_s5  ;;  %1428 = vrot.lane.b32.xlu2 %v1425_v45, %s2401_s5  ;;  %v1556_v45 = vstv %s3154_s28  ;;  %s2315_s28 = sld [smem:[#allocation3 + $0x30]] }
 0x1a3   : > { %v1023_v15 = vpop.permute.xlu1 %1022  ;;  %v1558_v31 = vmul.f32 %v2979_v13, %v1556_v45 }
 0x1a4   : > { %v1028_v5 = vadd.f32 %v1023_v15, %v1007_v11  ;;  %v1088_v43 = vpop.permute.xlu2 %1087  ;;  %v1044_v28 = vpop.permute.xlu0 %1043  ;;  %v1486_v11 = vrot.slane %v1480_v63, 5  ;;  %v1557_v15 = vmul.f32 %v2959_v16, %v1556_v45  ;;  %v1675_v45 = vstv %s2296_s25 }
 0x1a6   : > { %v1049_v47 = vadd.f32 %v1044_v28, %v1028_v5  ;;  %v1488_v12 = vsel %vm359_vm7, %v1486_v11, %v1487_v32  ;;  %v1577_v5 = vrot.slane %v1571_v44, 1  ;;  %v1543_v28 = vmul.f32 %v2956_v33, %v1542_v27 }
 0x1a7   : > { %v1591_v32 = vstv %s2292_s19  ;;  %s2316_s19 = sld [smem:[#allocation3 + $0xb0]] }
 0x1a8   : > { %v1070_v46 = vadd.f32 %v1065_v62, %v1049_v47  ;;  %v1510_v62 = vrot.slane %v1503_v25, 6  ;;  %v1579_v40 = vsel %vm219_vm3, %v1577_v5, %v1578_v51  ;;  %v1593_v48 = vmul.f32 %v2979_v13, %v1591_v32 }
 0x1a9   : > { %1472 = vrot.lane.b32.xlu1 %v1469_v57, %s2401_s5  ;;  %v1594_v47 = vmul.f32 %v2993_v50, %v1591_v32  ;;  %v1592_v54 = vmul.f32 %v2959_v16, %v1591_v32  ;;  %v1676_v32 = vmul.f32 %v2959_v16, %v1675_v45 }
 0x1aa   : > { %1493 = vrot.lane.b32.xlu0 %v1490_v39, %s2401_s5  ;;  %1451 = vrot.lane.b32.xlu2 %v1448_v3, %s2401_s5  ;;  %v1511_v38 = vsel %vm394_vm8, %v1508_v8, %v1510_v62  ;;  %v1599_v39 = vrot.slane %v1593_v48, 1  ;;  %v3205_v48 = vld [vmem:[#allocation2] sm:$0xff] }
 0x1ab   : > { %v1046_v0 = vpop.permute.xlu1 %1045  ;;  %v1601_v3 = vrot.slane %v1594_v47, 1 }
 0x1ac   : > { %v1050_v9 = vadd.f32 %v1046_v0, %v1029_v41  ;;  %v1128_v4 = vpop.permute.xlu2 %1127  ;;  %v1067_v7 = vpop.permute.xlu0 %1066  ;;  %v1612_v0 = vstv %s2293_s21 }
 0x1ad   : > { %v1614_v63 = vmul.f32 %v2969_v56, %v1612_v0  ;;  %v1613_v10 = vmul.f32 %v2956_v33, %v1612_v0 }
 0x1ae   : > { %v1071_v1 = vadd.f32 %v1067_v7, %v1050_v9  ;;  %v1633_v9 = vstv %s2294_s22  ;;  %v1602_v7 = vsel %vm219_vm3, %v1599_v39, %v1601_v3 }
 0x1af   : > { %v1635_v8 = vmul.f32 %v2979_v13, %v1633_v9  ;;  %v1634_v58 = vmul.f32 %v2959_v16, %v1633_v9  ;;  %v1620_v22 = vrot.slane %v1614_v63, 2  ;;  %v1619_v25 = vrot.slane %v1613_v10, 2 }
 0x1b0   : > { %v1092_v36 = vadd.f32 %v1088_v43, %v1071_v1  ;;  %v1636_v33 = vmul.f32 %v2993_v50, %v1633_v9  ;;  %v1678_v63 = vmul.f32 %v2993_v50, %v1675_v45 }
 0x1b1   : > { %1512 = vrot.lane.b32.xlu1 %v1509_v20, %s2401_s5 }
 0x1b2   : > { %1533 = vrot.lane.b32.xlu0 %v1530_v21, %s2401_s5  ;;  %1491 = vrot.lane.b32.xlu2 %v1488_v12, %s2401_s5  ;;  %v1641_v21 = vrot.slane %v1635_v8, 2 }
 0x1b3   : > { %v1086_v52 = vpop.permute.xlu1 %1085 }
 0x1b4   : > { %v1091_v24 = vadd.f32 %v1086_v52, %v1070_v46  ;;  %v1151_v49 = vpop.permute.xlu2 %1150  ;;  %v1107_v37 = vpop.permute.xlu0 %1106  ;;  %v1640_v52 = vrot.slane %v1634_v58, 2 }
 0x1b6   : > { %v1112_v26 = vadd.f32 %v1107_v37, %v1091_v24  ;;  %v1598_v24 = vrot.slane %v1592_v54, 1  ;;  %v1621_v37 = vsel %vm254_vm4, %v1619_v25, %v1620_v22 }
 0x1b8   : > { %v1133_v29 = vadd.f32 %v1128_v4, %v1112_v26  ;;  %v1642_v26 = vsel %vm254_vm4, %v1640_v52, %v1641_v21  ;;  %v1600_v27 = vsel %vm219_vm3, %v1598_v24, %v1599_v39  ;;  %v1759_v24 = vstv %s2300_s29 }
 0x1b9   : > { %1535 = vrot.lane.b32.xlu1 %v1532_v30, %s2401_s5  ;;  %v1615_v30 = vmul.f32 %v2972_v34, %v1612_v0 }
 0x1ba   : > { %1549 = vrot.lane.b32.xlu0 %v1544_v35, %s2402_s20  ;;  %1514 = vrot.lane.b32.xlu2 %v1511_v38, %s2401_s5  ;;  %s3260_s5 = sld [smem:[#allocation3 + $0x86]] }
 0x1bb   : > { %v1109_v41 = vpop.permute.xlu1 %1108 }
 0x1bc   : > { %v1113_v19 = vadd.f32 %v1109_v41, %v1092_v36  ;;  %v1191_v14 = vpop.permute.xlu2 %1190  ;;  %v1130_v55 = vpop.permute.xlu0 %1129  ;;  %v1643_v41 = vrot.slane %v1636_v33, 2 }
 0x1be   : > { %v1134_v53 = vadd.f32 %v1130_v55, %v1113_v19  ;;  %v1644_v51 = vsel %vm254_vm4, %v1641_v21, %v1643_v41 }
 0x1c0   : > { %v1155_v43 = vadd.f32 %v1151_v49, %v1134_v53  ;;  %v1654_v49 = vstv %s2295_s23  ;;  %v1677_v53 = vmul.f32 %v2979_v13, %v1675_v45 }
 0x1c1   : > { %1561 = vrot.lane.b32.xlu1 %v1557_v15, %s2402_s20  ;;  %v1656_v23 = vmul.f32 %v2969_v56, %v1654_v49  ;;  %v1696_v15 = vstv %s2297_s26 }
 0x1c2   : > { %1582 = vrot.lane.b32.xlu0 %v1579_v40, %s2402_s20  ;;  %1547 = vrot.lane.b32.xlu2 %v1543_v28, %s2402_s20  ;;  %v1698_v17 = vmul.f32 %v2969_v56, %v1696_v15  ;;  %v1697_v47 = vmul.f32 %v3205_v48, %v1696_v15  ;;  %v1683_v61 = vrot.slane %v1677_v53, 3  ;;  %v1682_v56 = vrot.slane %v1676_v32, 3  ;;  %v3242_v32 = vld [vmem:[#allocation2 + $0x10] sm:$0x3f] }
 0x1c3   : > { %v1149_v42 = vpop.permute.xlu1 %1148  ;;  %v1662_v44 = vrot.slane %v1656_v23, 3  ;;  %v1699_v0 = vmul.f32 %v2972_v34, %v1696_v15  ;;  %v3226_v23 = vld [vmem:[#allocation2 + $0x20] sm:$0xff]  ;;  %v1762_v15 = vmul.f32 %v2993_v50, %v1759_v24 }
 0x1c4   : > { %v1154_v46 = vadd.f32 %v1149_v42, %v1133_v29  ;;  %v1214_v57 = vpop.permute.xlu2 %1213  ;;  %v1170_v59 = vpop.permute.xlu0 %1169  ;;  %v1657_v29 = vmul.f32 %v2972_v34, %v1654_v49  ;;  %v1655_v42 = vmul.f32 %v3205_v48, %v1654_v49  ;;  %v1704_v39 = vrot.slane %v1698_v17, 4 }
 0x1c5   : > { %v1684_v16 = vsel %vm289_vm5, %v1682_v56, %v1683_v61 }
 0x1c6   : > { %v1175_v2 = vadd.f32 %v1170_v59, %v1154_v46  ;;  %v1664_v19 = vrot.slane %v1657_v29, 3  ;;  %v3232_v29 = vld [vmem:[#allocation2 + $0x18] sm:$0xff] }
 0x1c8   : > { %v1196_v4 = vadd.f32 %v1191_v14, %v1175_v2  ;;  %v1622_v14 = vrot.slane %v1615_v30, 2  ;;  %v1703_v2 = vrot.slane %v1697_v47, 4  ;;  %v1760_v30 = vmul.f32 %v3232_v29, %v1759_v24 }
 0x1c9   : > { %1584 = vrot.lane.b32.xlu1 %v1581_v6, %s2402_s20  ;;  %v1717_v6 = vstv %s2298_s27 }
 0x1ca   : > { %1605 = vrot.lane.b32.xlu0 %v1602_v7, %s2402_s20  ;;  %1563 = vrot.lane.b32.xlu2 %v1558_v31, %s2402_s20  ;;  %v1623_v28 = vsel %vm254_vm4, %v1620_v22, %v1622_v14  ;;  %v1661_v31 = vrot.slane %v1655_v42, 3  ;;  %v1719_v8 = vmul.f32 %v2979_v13, %v1717_v6  ;;  %v1720_v10 = vmul.f32 %v2993_v50, %v1717_v6  ;;  %v3220_v13 = vld [vmem:[#allocation2 + $0x8] sm:$0xff] }
 0x1cb   : > { %v1172_v1 = vpop.permute.xlu1 %1171  ;;  %v1685_v22 = vrot.slane %v1678_v63, 3 }
 0x1cc   : > { %v1176_v11 = vadd.f32 %v1172_v1, %v1155_v43  ;;  %v1254_v36 = vpop.permute.xlu2 %1253  ;;  %v1193_v20 = vpop.permute.xlu0 %1192  ;;  %v1665_v43 = vsel %vm289_vm5, %v1662_v44, %v1664_v19  ;;  %v1663_v7 = vsel %vm289_vm5, %v1661_v31, %v1662_v44 }
 0x1cd   : > { %v1686_v33 = vsel %vm289_vm5, %v1683_v61, %v1685_v22 }
 0x1ce   : > { %v1197_v12 = vadd.f32 %v1193_v20, %v1176_v11  ;;  %v1706_v11 = vrot.slane %v1699_v0, 4  ;;  %v1727_v20 = vrot.slane %v1720_v10, 4 }
 0x1d0   : > { %v1218_v62 = vadd.f32 %v1214_v57, %v1197_v12  ;;  %v1738_v12 = vstv %s2299_s24  ;;  %v1707_v25 = vsel %vm324_vm6, %v1704_v39, %v1706_v11 }
 0x1d1   : > { %1624 = vrot.lane.b32.xlu1 %v1621_v37, %s2402_s20  ;;  %v1740_v52 = vmul.f32 %v3220_v13, %v1738_v12  ;;  %v1741_v47 = vmul.f32 %v3242_v32, %v1738_v12 }
 0x1d2   : > { %1645 = vrot.lane.b32.xlu0 %v1642_v26, %s2402_s20  ;;  %1603 = vrot.lane.b32.xlu2 %v1600_v27, %s2402_s20  ;;  %v1739_v26 = vmul.f32 %v3205_v48, %v1738_v12 }
 0x1d3   : > { %v1212_v35 = vpop.permute.xlu1 %1211  ;;  %v1746_v41 = vrot.slane %v1740_v52, 5 }
 0x1d4   : > { %v1217_v18 = vadd.f32 %v1212_v35, %v1196_v4  ;;  %v1270_v38 = vpop.permute.xlu2 %1269  ;;  %v1233_v60 = vpop.permute.xlu0 %1232  ;;  %v1705_v4 = vsel %vm324_vm6, %v1703_v2, %v1704_v39  ;;  %v1718_v35 = vmul.f32 %v3232_v29, %v1717_v6  ;;  %v1745_v14 = vrot.slane %v1739_v26, 5 }
 0x1d5   : > { %v1801_v2 = vstv %s2302_s3 }
 0x1d6   : > { %v1238_v55 = vadd.f32 %v1233_v60, %v1217_v18  ;;  %v1724_v45 = vrot.slane %v1718_v35, 4  ;;  %v1747_v53 = vsel %vm359_vm7, %v1745_v14, %v1746_v41  ;;  %v1803_v0 = vmul.f32 %v3226_v23, %v1801_v2 }
 0x1d7   : > { %v1850_v35 = vstv %s2305_s6 }
 0x1d8   : > { %v1259_v5 = vadd.f32 %v1254_v36, %v1238_v55  ;;  %v1725_v36 = vrot.slane %v1719_v8, 4  ;;  %v1766_v55 = vrot.slane %v1760_v30, 5  ;;  %v1836_v30 = vstv %s3260_s5 }
 0x1d9   : > { %1647 = vrot.lane.b32.xlu1 %v1644_v51, %s2402_s20  ;;  %v1780_v51 = vstv %s2301_s30  ;;  %v1851_v14 = vmul.f32 %v3205_v48, %v1850_v35 }
 0x1da   : > { %1668 = vrot.lane.b32.xlu0 %v1665_v43, %s2402_s20  ;;  %1626 = vrot.lane.b32.xlu2 %v1623_v28, %s2402_s20  ;;  %v1728_v37 = vsel %vm324_vm6, %v1725_v36, %v1727_v20  ;;  %v1726_v17 = vsel %vm324_vm6, %v1724_v45, %v1725_v36 }
 0x1db   : > { %v1235_v40 = vpop.permute.xlu1 %1234 }
 0x1dc   : > { %v1239_v46 = vadd.f32 %v1235_v40, %v1218_v62  ;;  %v1303_v57 = vpop.permute.xlu2 %1302  ;;  %v1256_v59 = vpop.permute.xlu0 %1255  ;;  %v1761_v62 = vmul.f32 %v3226_v23, %v1759_v24  ;;  %v1783_v40 = vmul.f32 %v3242_v32, %v1780_v51 }
 0x1de   : > { %v1260_v3 = vadd.f32 %v1256_v59, %v1239_v46  ;;  %v1767_v44 = vrot.slane %v1761_v62, 5  ;;  %v1769_v59 = vrot.slane %v1762_v15, 5  ;;  %v1790_v39 = vrot.slane %v1783_v40, 6 }
 0x1e0   : > { %v1274_v9 = vadd.f32 %v1270_v38, %v1260_v3  ;;  %v1768_v28 = vsel %vm359_vm7, %v1766_v55, %v1767_v44  ;;  %v1748_v3 = vrot.slane %v1741_v47, 5  ;;  %v1770_v31 = vsel %vm359_vm7, %v1767_v44, %v1769_v59 }
 0x1e1   : > { %1687 = vrot.lane.b32.xlu1 %v1684_v16, %s2402_s20  ;;  %v1837_v47 = vmul.f32 %v3232_v29, %v1836_v30 }
 0x1e2   : > { %1708 = vrot.lane.b32.xlu0 %v1705_v4, %s2402_s20  ;;  %1666 = vrot.lane.b32.xlu2 %v1663_v7, %s2402_s20  ;;  %v1749_v63 = vsel %vm359_vm7, %v1746_v41, %v1748_v3  ;;  %v1781_v7 = vmul.f32 %v3205_v48, %v1780_v51 }
 0x1e3   : > { %v1268_v34 = vpop.permute.xlu1 %1267 }
 0x1e4   : > { %v1273_v1 = vadd.f32 %v1268_v34, %v1259_v5  ;;  %v1326_v58 = vpop.permute.xlu2 %1325  ;;  %v1282_v54 = vpop.permute.xlu0 %1281  ;;  %v1782_v5 = vmul.f32 %v3220_v13, %v1780_v51  ;;  %v1787_v36 = vrot.slane %v1781_v7, 6  ;;  %v1913_v7 = vstv %s2308_s12 }
 0x1e6   : > { %v1287_v21 = vadd.f32 %v1282_v54, %v1273_v1  ;;  %v1788_v61 = vrot.slane %v1782_v5, 6  ;;  %v1809_v1 = vrot.slane %v1803_v0, 6 }
 0x1e8   : > { %v1308_v49 = vadd.f32 %v1303_v57, %v1287_v21  ;;  %v1791_v6 = vsel %vm394_vm8, %v1788_v61, %v1790_v39  ;;  %v1789_v12 = vsel %vm394_vm8, %v1787_v36, %v1788_v61  ;;  %v1853_v61 = vmul.f32 %v3242_v32, %v1850_v35 }
 0x1e9   : > { %1710 = vrot.lane.b32.xlu1 %v1707_v25, %s2402_s20  ;;  %v3266_v25 = vld [vmem:[#allocation2 + $0x28] sm:$0x3f]  ;;  %v1914_v36 = vmul.f32 %v3232_v29, %v1913_v7 }
 0x1ea   : > { %1731 = vrot.lane.b32.xlu0 %v1728_v37, %s2402_s20  ;;  %1689 = vrot.lane.b32.xlu2 %v1686_v33, %s2402_s20  ;;  %v1804_v52 = vmul.f32 %v3266_v25, %v1801_v2 }
 0x1eb   : > { %v1284_v27 = vpop.permute.xlu1 %1283 }
 0x1ec   : > { %v1288_v18 = vadd.f32 %v1284_v27, %v1274_v9  ;;  %v1366_v38 = vpop.permute.xlu2 %1365  ;;  %v1305_v60 = vpop.permute.xlu0 %1304  ;;  %v1802_v9 = vmul.f32 %v3232_v29, %v1801_v2  ;;  %v1811_v62 = vrot.slane %v1804_v52, 6 }
 0x1ee   : > { %v1309_v19 = vadd.f32 %v1305_v60, %v1288_v18  ;;  %v1808_v11 = vrot.slane %v1802_v9, 6  ;;  %v1838_v18 = vmul.f32 %v3226_v23, %v1836_v30  ;;  %v1871_v60 = vstv %s2306_s7 }
 0x1ef   : > { %v1812_v44 = vsel %vm394_vm8, %v1809_v1, %v1811_v62  ;;  %v1872_v45 = vmul.f32 %v3232_v29, %v1871_v60  ;;  %v1920_v62 = vrot.slane %v1914_v36, 2  ;;  %v1916_v30 = vmul.f32 %v3266_v25, %v1913_v7 }
 0x1f0   : > { %v1330_v43 = vadd.f32 %v1326_v58, %v1309_v19  ;;  %v1822_v58 = vstv %s3248_s4  ;;  %v1810_v20 = vsel %vm394_vm8, %v1808_v11, %v1809_v1  ;;  %v1873_v19 = vmul.f32 %v3226_v23, %v1871_v60 }
 0x1f1   : > { %1750 = vrot.lane.b32.xlu1 %v1747_v53, %s2402_s20  ;;  %v1823_v22 = vmul.f32 %v3205_v48, %v1822_v58  ;;  %v1824_v27 = vmul.f32 %v3220_v13, %v1822_v58  ;;  %v1878_v40 = vrot.slane %v1872_v45, 1 }
 0x1f2   : > { %1771 = vrot.lane.b32.xlu0 %v1768_v28, %s2402_s20  ;;  %1729 = vrot.lane.b32.xlu2 %v1726_v17, %s2402_s20  ;;  %v1857_v17 = vrot.slane %v1851_v14, 1 }
 0x1f3   : > { %v1324_v50 = vpop.permute.xlu1 %1323 }
 0x1f4   : > { %v1329_v42 = vadd.f32 %v1324_v50, %v1308_v49  ;;  %v1389_v46 = vpop.permute.xlu2 %1388  ;;  %v1345_v57 = vpop.permute.xlu0 %1344 }
 0x1f6   : > { %v1350_v56 = vadd.f32 %v1345_v57, %v1329_v42  ;;  %v1874_v42 = vmul.f32 %v3266_v25, %v1871_v60 }
 0x1f8   : > { %v1371_v16 = vadd.f32 %v1366_v38, %v1350_v56  ;;  %v1852_v38 = vmul.f32 %v3220_v13, %v1850_v35 }
 0x1f9   : > { %1773 = vrot.lane.b32.xlu1 %v1770_v31, %s2402_s20 }
 0x1fa   : > { %1794 = vrot.lane.b32.xlu0 %v1791_v6, %s2402_s20  ;;  %1752 = vrot.lane.b32.xlu2 %v1749_v63, %s2402_s20  ;;  %v1858_v5 = vrot.slane %v1852_v38, 1  ;;  %v1860_v6 = vrot.slane %v1853_v61, 1  ;;  %v1955_v38 = vstv %s2310_s14 }
 0x1fb   : > { %v1347_v4 = vpop.permute.xlu1 %1346  ;;  %v1958_v14 = vmul.f32 %v3266_v25, %v1955_v38 }
 0x1fc   : > { %v1351_v8 = vadd.f32 %v1347_v4, %v1330_v43  ;;  %v1429_v10 = vpop.permute.xlu2 %1428  ;;  %v1368_v34 = vpop.permute.xlu0 %1367  ;;  %v1879_v43 = vrot.slane %v1873_v19, 1  ;;  %v1859_v50 = vsel %vm219_vm3, %v1857_v17, %v1858_v5  ;;  %v1861_v58 = vsel %vm219_vm3, %v1858_v5, %v1860_v6 }
 0x1fd   : > { %v1957_v19 = vmul.f32 %v3226_v23, %v1955_v38  ;;  %v1923_v5 = vrot.slane %v1916_v30, 2 }
 0x1fe   : > { %v1372_v54 = vadd.f32 %v1368_v34, %v1351_v8  ;;  %v1880_v59 = vsel %vm219_vm3, %v1878_v40, %v1879_v43  ;;  %v1934_v34 = vstv %s2309_s13  ;;  %v1976_v40 = vstv %s2311_s15 }
 0x1ff   : > { %v1936_v11 = vmul.f32 %v3220_v13, %v1934_v34 }
 0x200   : > { %v1393_v21 = vadd.f32 %v1389_v46, %v1372_v54  ;;  %v1892_v46 = vstv %s2307_s11 }
 0x201   : > { %1813 = vrot.lane.b32.xlu1 %v1810_v20, %s2402_s20  ;;  %v1894_v39 = vmul.f32 %v3220_v13, %v1892_v46  ;;  %v1895_v3 = vmul.f32 %v3242_v32, %v1892_v46 }
 0x202   : > { %1827 = vrot.lane.b32.xlu0 %v1823_v22, %s2403_s8  ;;  %1792 = vrot.lane.b32.xlu2 %v1789_v12, %s2402_s20  ;;  %v1893_v22 = vmul.f32 %v3205_v48, %v1892_v46 }
 0x203   : > { %v1387_v24 = vpop.permute.xlu1 %1386  ;;  %v1900_v63 = vrot.slane %v1894_v39, 2  ;;  %v1902_v9 = vrot.slane %v1895_v3, 2  ;;  %v1977_v39 = vmul.f32 %v3205_v48, %v1976_v40 }
 0x204   : > { %v1392_v49 = vadd.f32 %v1387_v24, %v1371_v16  ;;  %v1452_v37 = vpop.permute.xlu2 %1451  ;;  %v1408_v33 = vpop.permute.xlu0 %1407  ;;  %v1881_v16 = vrot.slane %v1874_v42, 1  ;;  %v1997_v42 = vstv %s2312_s16 }
 0x205   : > { %v1903_v54 = vsel %vm254_vm4, %v1900_v63, %v1902_v9  ;;  %v1999_v61 = vmul.f32 %v3226_v23, %v1997_v42 }
 0x206   : > { %v1413_v26 = vadd.f32 %v1408_v33, %v1392_v49  ;;  %v1882_v8 = vsel %vm219_vm3, %v1879_v43, %v1881_v16  ;;  %v1963_v43 = vrot.slane %v1957_v19, 3 }
 0x208   : > { %v1434_v41 = vadd.f32 %v1429_v10, %v1413_v26  ;;  %v1915_v10 = vmul.f32 %v3226_v23, %v1913_v7  ;;  %v1899_v26 = vrot.slane %v1893_v22, 2 }
 0x209   : > { %1829 = vrot.lane.b32.xlu1 %v1824_v27, %s2403_s8 }
 0x20a   : > { %1843 = vrot.lane.b32.xlu0 %v1838_v18, %s2403_s8  ;;  %1815 = vrot.lane.b32.xlu2 %v1812_v44, %s2402_s20  ;;  %v1921_v49 = vrot.slane %v1915_v10, 2  ;;  %v1937_v18 = vmul.f32 %v3242_v32, %v1934_v34  ;;  %v1979_v10 = vmul.f32 %v3242_v32, %v1976_v40  ;;  %s2320_s20 = sshll.u32 %s3377_s10, 4 }
 0x20b   : > { %v1410_v55 = vpop.permute.xlu1 %1409  ;;  %s157_s23 = scalar_lea.vmem %s3375_s2, %s2320_s20 }
 0x20c   : > { %v1414_v51 = vadd.f32 %v1410_v55, %v1393_v21  ;;  %v1492_v53 = vpop.permute.xlu2 %1491  ;;  %v1431_v15 = vpop.permute.xlu0 %1430  ;;  %v1935_v21 = vmul.f32 %v3205_v48, %v1934_v34  ;;  %v1922_v35 = vsel %vm254_vm4, %v1920_v62, %v1921_v49 }
 0x20e   : > { %v1435_v28 = vadd.f32 %v1431_v15, %v1414_v51  ;;  %v1941_v27 = vrot.slane %v1935_v21, 3  ;;  %v1944_v15 = vrot.slane %v1937_v18, 3  ;;  %v2060_v18 = vstv %s2315_s28 }
 0x210   : > { %v1456_v57 = vadd.f32 %v1452_v37, %v1435_v28  ;;  %v1942_v37 = vrot.slane %v1936_v11, 3  ;;  %v1965_v28 = vrot.slane %v1958_v14, 3 }
 0x211   : > { %1862 = vrot.lane.b32.xlu1 %v1859_v50, %s2403_s8  ;;  %v1978_v50 = vmul.f32 %v3220_v13, %v1976_v40 }
 0x212   : > { %1883 = vrot.lane.b32.xlu0 %v1880_v59, %s2403_s8  ;;  %1841 = vrot.lane.b32.xlu2 %v1837_v47, %s2403_s8  ;;  %v1943_v44 = vsel %vm289_vm5, %v1941_v27, %v1942_v37  ;;  %v1945_v47 = vsel %vm289_vm5, %v1942_v37, %v1944_v15  ;;  %v1966_v59 = vsel %vm289_vm5, %v1963_v43, %v1965_v28  ;;  %v1986_v37 = vrot.slane %v1979_v10, 4 }
 0x213   : > { %v1450_v56 = vpop.permute.xlu1 %1449  ;;  %v1984_v6 = vrot.slane %v1978_v50, 4  ;;  %v2039_v27 = vstv %s2314_s18 }
 0x214   : > { %v1455_v2 = vadd.f32 %v1450_v56, %v1434_v41  ;;  %v1515_v31 = vpop.permute.xlu2 %1514  ;;  %v1471_v0 = vpop.permute.xlu0 %1470  ;;  %v1901_v41 = vsel %vm254_vm4, %v1899_v26, %v1900_v63  ;;  %v1956_v56 = vmul.f32 %v3232_v29, %v1955_v38  ;;  %v2005_v63 = vrot.slane %v1999_v61, 4 }
 0x215   : > { %v2040_v19 = vmul.f32 %v3232_v29, %v2039_v27 }
 0x216   : > { %v1476_v4 = vadd.f32 %v1471_v0, %v1455_v2  ;;  %v1998_v2 = vmul.f32 %v3232_v29, %v1997_v42  ;;  %v1962_v7 = vrot.slane %v1956_v56, 3 }
 0x218   : > { %v1497_v1 = vadd.f32 %v1492_v53, %v1476_v4  ;;  %v1983_v4 = vrot.slane %v1977_v39, 4  ;;  %v1964_v11 = vsel %vm289_vm5, %v1962_v7, %v1963_v43 }
 0x219   : > { %1885 = vrot.lane.b32.xlu1 %v1882_v8, %s2403_s8  ;;  %v2004_v8 = vrot.slane %v1998_v2, 4 }
 0x21a   : > { %1864 = vrot.lane.b32.xlu2 %v1861_v58, %s2403_s8  ;;  %1906 = vrot.lane.b32.xlu0 %v1903_v54, %s2403_s8  ;;  %v1985_v34 = vsel %vm324_vm6, %v1983_v4, %v1984_v6  ;;  %v2018_v58 = vstv %s2313_s17 }
 0x21b   : > { %v1473_v20 = vpop.permute.xlu1 %1472  ;;  %v2006_v36 = vsel %vm324_vm6, %v2004_v8, %v2005_v63  ;;  %v2021_v22 = vmul.f32 %v3242_v32, %v2018_v58 }
 0x21c   : > { %v1477_v12 = vadd.f32 %v1473_v20, %v1456_v57  ;;  %v1548_v52 = vpop.permute.xlu2 %1547  ;;  %v1494_v24 = vpop.permute.xlu0 %1493  ;;  %v1924_v57 = vsel %vm254_vm4, %v1921_v49, %v1923_v5  ;;  %v2020_v20 = vmul.f32 %v3220_v13, %v2018_v58 }
 0x21d   : > { %v2028_v62 = vrot.slane %v2021_v22, 5 }
 0x21e   : > { %v1498_v33 = vadd.f32 %v1494_v24, %v1477_v12 }
 0x220   : > { %v1519_v60 = vadd.f32 %v1515_v31, %v1498_v33  ;;  %v2026_v33 = vrot.slane %v2020_v20, 5 }
 0x221   : > { %1925 = vrot.lane.b32.xlu1 %v1922_v35, %s2403_s8  ;;  %v2041_v35 = vmul.f32 %v3226_v23, %v2039_v27 }
 0x222   : > { %1904 = vrot.lane.b32.xlu2 %v1901_v41, %s2403_s8  ;;  %1946 = vrot.lane.b32.xlu0 %v1943_v44, %s2403_s8  ;;  %v2029_v41 = vsel %vm359_vm7, %v2026_v33, %v2028_v62  ;;  %v2062_v44 = vmul.f32 %v3220_v13, %v2060_v18 }
 0x223   : > { %v1513_v55 = vpop.permute.xlu1 %1512  ;;  %v2047_v5 = vrot.slane %v2041_v35, 5 }
 0x224   : > { %v1518_v45 = vadd.f32 %v1513_v55, %v1497_v1  ;;  %v1564_v51 = vpop.permute.xlu2 %1563  ;;  %v1534_v53 = vpop.permute.xlu0 %1533  ;;  %v2000_v1 = vmul.f32 %v3266_v25, %v1997_v42  ;;  %v2019_v55 = vmul.f32 %v3205_v48, %v2018_v58  ;;  %v2068_v43 = vrot.slane %v2062_v44, 6 }
 0x225   : > { %v2063_v42 = vmul.f32 %v3242_v32, %v2060_v18 }
 0x226   : > { %v1539_v17 = vadd.f32 %v1534_v53, %v1518_v45  ;;  %v2007_v49 = vrot.slane %v2000_v1, 4  ;;  %v2061_v45 = vmul.f32 %v3205_v48, %v2060_v18  ;;  %v2025_v40 = vrot.slane %v2019_v55, 5 }
 0x228   : > { %v1553_v46 = vadd.f32 %v1548_v52, %v1539_v17  ;;  %v2008_v30 = vsel %vm324_vm6, %v2005_v63, %v2007_v49  ;;  %v2046_v17 = vrot.slane %v2040_v19, 5  ;;  %v2067_v13 = vrot.slane %v2061_v45, 6 }
 0x229   : > { %1948 = vrot.lane.b32.xlu1 %v1945_v47, %s2403_s8  ;;  %v2042_v47 = vmul.f32 %v3266_v25, %v2039_v27  ;;  %v2027_v48 = vsel %vm359_vm7, %v2025_v40, %v2026_v33 }
 0x22a   : > { %1927 = vrot.lane.b32.xlu2 %v1924_v57, %s2403_s8  ;;  %1969 = vrot.lane.b32.xlu0 %v1966_v59, %s2403_s8  ;;  %v2048_v50 = vsel %vm359_vm7, %v2046_v17, %v2047_v5  ;;  %v2069_v59 = vsel %vm394_vm8, %v2067_v13, %v2068_v43 }
 0x22b   : > { %v1536_v3 = vpop.permute.xlu1 %1535 }
 0x22c   : > { %v1540_v31 = vadd.f32 %v1536_v3, %v1519_v60  ;;  %v1604_v0 = vpop.permute.xlu2 %1603  ;;  %v1550_v16 = vpop.permute.xlu0 %1549  ;;  %v1987_v60 = vsel %vm324_vm6, %v1984_v6, %v1986_v37 }
 0x22e   : > { %v1554_v9 = vadd.f32 %v1550_v16, %v1540_v31  ;;  %v2070_v31 = vrot.slane %v2063_v42, 6 }
 0x230   : > { %v1568_v54 = vadd.f32 %v1564_v51, %v1554_v9  ;;  %v2071_v9 = vsel %vm394_vm8, %v2068_v43, %v2070_v31 }
 0x231   : > { %1988 = vrot.lane.b32.xlu1 %v1985_v34, %s2403_s8 }
 0x232   : > { %1967 = vrot.lane.b32.xlu2 %v1964_v11, %s2403_s8  ;;  %2009 = vrot.lane.b32.xlu0 %v2006_v36, %s2403_s8 }
 0x233   : > { %v1562_v21 = vpop.permute.xlu1 %1561 }
 0x234   : > { %v1567_v12 = vadd.f32 %v1562_v21, %v1553_v46  ;;  %v1627_v52 = vpop.permute.xlu2 %1626  ;;  %v1583_v24 = vpop.permute.xlu0 %1582  ;;  %v2081_v46 = vstv %s2316_s19 }
 0x235   : > { %v2083_v61 = vmul.f32 %v3226_v23, %v2081_v46  ;;  %v2084_v39 = vmul.f32 %v3266_v25, %v2081_v46  ;;  %v2082_v8 = vmul.f32 %v3232_v29, %v2081_v46 }
 0x236   : > { %v1588_v26 = vadd.f32 %v1583_v24, %v1567_v12 }
 0x237   : > { %v2089_v16 = vrot.slane %v2083_v61, 6  ;;  %v2091_v6 = vrot.slane %v2084_v39, 6 }
 0x238   : > { %v1609_v38 = vadd.f32 %v1604_v0, %v1588_v26  ;;  %v2049_v0 = vrot.slane %v2042_v47, 5 }
 0x239   : > { %2011 = vrot.lane.b32.xlu1 %v2008_v30, %s2403_s8  ;;  %v2092_v25 = vsel %vm394_vm8, %v2089_v16, %v2091_v6 }
 0x23a   : > { %1990 = vrot.lane.b32.xlu2 %v1987_v60, %s2403_s8  ;;  %2032 = vrot.lane.b32.xlu0 %v2029_v41, %s2403_s8  ;;  %v2050_v23 = vsel %vm359_vm7, %v2047_v5, %v2049_v0 }
 0x23b   : > { %v1585_v14 = vpop.permute.xlu1 %1584 }
 0x23c   : > { %v1589_v51 = vadd.f32 %v1585_v14, %v1568_v54  ;;  %v1667_v53 = vpop.permute.xlu2 %1666  ;;  %v1606_v15 = vpop.permute.xlu0 %1605  ;;  %v2088_v54 = vrot.slane %v2082_v8, 6 }
 0x23e   : > { %v1610_v28 = vadd.f32 %v1606_v15, %v1589_v51  ;;  %v2090_v36 = vsel %vm394_vm8, %v2088_v54, %v2089_v16 }
 0x240   : > { %v1631_v57 = vadd.f32 %v1627_v52, %v1610_v28 }
 0x241   : > { %2051 = vrot.lane.b32.xlu1 %v2048_v50, %s2403_s8 }
 0x242   : > { %2030 = vrot.lane.b32.xlu2 %v2027_v48, %s2403_s8  ;;  %2072 = vrot.lane.b32.xlu0 %v2069_v59, %s2403_s8 }
 0x243   : > { %v1625_v3 = vpop.permute.xlu1 %1624 }
 0x244   : > { %v1630_v56 = vadd.f32 %v1625_v3, %v1609_v38  ;;  %v1690_v2 = vpop.permute.xlu2 %1689  ;;  %v1646_v32 = vpop.permute.xlu0 %1645 }
 0x246   : > { %v1651_v63 = vadd.f32 %v1646_v32, %v1630_v56 }
 0x248   : > { %v1672_v4 = vadd.f32 %v1667_v53, %v1651_v63 }
 0x249   : > { %2074 = vrot.lane.b32.xlu1 %v2071_v9, %s2403_s8 }
 0x24a   : > { %2053 = vrot.lane.b32.xlu2 %v2050_v23, %s2403_s8  ;;  %2095 = vrot.lane.b32.xlu0 %v2092_v25, %s2403_s8 }
 0x24b   : > { %v1648_v7 = vpop.permute.xlu1 %1647 }
 0x24c   : > { %v1652_v10 = vadd.f32 %v1648_v7, %v1631_v57  ;;  %v1730_v34 = vpop.permute.xlu2 %1729  ;;  %v1669_v1 = vpop.permute.xlu0 %1668 }
 0x24e   : > { %v1673_v58 = vadd.f32 %v1669_v1, %v1652_v10 }
 0x250   : > { %v1694_v11 = vadd.f32 %v1690_v2, %v1673_v58 }
 0x252   : > { %2093 = vrot.lane.b32.xlu2 %v2090_v36, %s2403_s8 }
 0x253   : > { %v1688_v20 = vpop.permute.xlu1 %1687 }
 0x254   : > { %v1753_v22 = vpop.permute.xlu2 %1752  ;;  %v1709_v21 = vpop.permute.xlu0 %1708  ;;  %v1693_v18 = vadd.f32 %v1688_v20, %v1672_v4 }
 0x256   : > { %v1714_v60 = vadd.f32 %v1709_v21, %v1693_v18 }
 0x258   : > { %v1735_v14 = vadd.f32 %v1730_v34, %v1714_v60 }
 0x25b   : > { %v1711_v12 = vpop.permute.xlu1 %1710 }
 0x25c   : > { %v1793_v52 = vpop.permute.xlu2 %1792  ;;  %v1732_v24 = vpop.permute.xlu0 %1731  ;;  %v1715_v19 = vadd.f32 %v1711_v12, %v1694_v11 }
 0x25e   : > { %v1736_v51 = vadd.f32 %v1732_v24, %v1715_v19 }
 0x260   : > { %v1757_v43 = vadd.f32 %v1753_v22, %v1736_v51 }
 0x263   : > { %v1751_v49 = vpop.permute.xlu1 %1750 }
 0x264   : > { %v1816_v37 = vpop.permute.xlu2 %1815  ;;  %v1772_v33 = vpop.permute.xlu0 %1771  ;;  %v1756_v55 = vadd.f32 %v1751_v49, %v1735_v14 }
 0x266   : > { %v1777_v5 = vadd.f32 %v1772_v33, %v1756_v55 }
 0x268   : > { %v1798_v17 = vadd.f32 %v1793_v52, %v1777_v5 }
 0x26b   : > { %v1774_v29 = vpop.permute.xlu1 %1773 }
 0x26c   : > { %v1842_v62 = vpop.permute.xlu2 %1841  ;;  %v1795_v26 = vpop.permute.xlu0 %1794  ;;  %v1778_v28 = vadd.f32 %v1774_v29, %v1757_v43 }
 0x26e   : > { %v1799_v50 = vadd.f32 %v1795_v26, %v1778_v28 }
 0x270   : > { %v1820_v57 = vadd.f32 %v1816_v37, %v1799_v50 }
 0x273   : > { %v1814_v27 = vpop.permute.xlu1 %1813 }
 0x274   : > { %v1865_v30 = vpop.permute.xlu2 %1864  ;;  %v1828_v35 = vpop.permute.xlu0 %1827  ;;  %v1819_v13 = vadd.f32 %v1814_v27, %v1798_v17 }
 0x276   : > { %v1833_v46 = vadd.f32 %v1828_v35, %v1819_v13 }
 0x278   : > { %v1847_v61 = vadd.f32 %v1842_v62, %v1833_v46 }
 0x27b   : > { %v1830_v38 = vpop.permute.xlu1 %1829 }
 0x27c   : > { %v1905_v41 = vpop.permute.xlu2 %1904  ;;  %v1844_v44 = vpop.permute.xlu0 %1843  ;;  %v1834_v59 = vadd.f32 %v1830_v38, %v1820_v57 }
 0x27e   : > { %v1848_v56 = vadd.f32 %v1844_v44, %v1834_v59 }
 0x280   : > { %v1869_v0 = vadd.f32 %v1865_v30, %v1848_v56 }
 0x283   : > { %v1863_v45 = vpop.permute.xlu1 %1862 }
 0x284   : > { %v1884_v53 = vpop.permute.xlu0 %1883  ;;  %v1928_v15 = vpop.permute.xlu2 %1927  ;;  %v1868_v3 = vadd.f32 %v1863_v45, %v1847_v61 }
 0x286   : > { %v1889_v32 = vadd.f32 %v1884_v53, %v1868_v3 }
 0x288   : > { %v1910_v63 = vadd.f32 %v1905_v41, %v1889_v32 }
 0x28b   : > { %v1886_v40 = vpop.permute.xlu1 %1885 }
 0x28c   : > { %v1907_v47 = vpop.permute.xlu0 %1906  ;;  %v1968_v42 = vpop.permute.xlu2 %1967  ;;  %v1890_v6 = vadd.f32 %v1886_v40, %v1869_v0 }
 0x28e   : > { %v1911_v4 = vadd.f32 %v1907_v47, %v1890_v6 }
 0x290   : > { %v1932_v10 = vadd.f32 %v1928_v15, %v1911_v4 }
 0x293   : > { %v1926_v48 = vpop.permute.xlu1 %1925 }
 0x294   : > { %v1947_v39 = vpop.permute.xlu0 %1946  ;;  %v1991_v2 = vpop.permute.xlu2 %1990  ;;  %v1931_v9 = vadd.f32 %v1926_v48, %v1910_v63 }
 0x296   : > { %v1952_v7 = vadd.f32 %v1947_v39, %v1931_v9 }
 0x298   : > { %v1973_v1 = vadd.f32 %v1968_v42, %v1952_v7 }
 0x29b   : > { %v1949_v31 = vpop.permute.xlu1 %1948 }
 0x29c   : > { %v1970_v16 = vpop.permute.xlu0 %1969  ;;  %v2031_v23 = vpop.permute.xlu2 %2030  ;;  %v1953_v34 = vadd.f32 %v1949_v31, %v1932_v10 }
 0x29e   : > { %v1974_v11 = vadd.f32 %v1970_v16, %v1953_v34 }
 0x2a0   : > { %v1995_v21 = vadd.f32 %v1991_v2, %v1974_v11 }
 0x2a3   : > { %v1989_v25 = vpop.permute.xlu1 %1988 }
 0x2a4   : > { %v2010_v8 = vpop.permute.xlu0 %2009  ;;  %v1994_v58 = vadd.f32 %v1989_v25, %v1973_v1  ;;  %v2054_v20 = vpop.permute.xlu2 %2053 }
 0x2a6   : > { %v2015_v22 = vadd.f32 %v2010_v8, %v1994_v58 }
 0x2a8   : > { %v2036_v52 = vadd.f32 %v2031_v23, %v2015_v22 }
 0x2ab   : > { %v2012_v54 = vpop.permute.xlu1 %2011 }
 0x2ac   : > { %v2033_v36 = vpop.permute.xlu0 %2032  ;;  %v2016_v12 = vadd.f32 %v2012_v54, %v1995_v21  ;;  %v2094_v62 = vpop.permute.xlu2 %2093 }
 0x2ae   : > { %v2037_v33 = vadd.f32 %v2033_v36, %v2016_v12 }
 0x2b0   : > { %v2058_v30 = vadd.f32 %v2054_v20, %v2037_v33 }
 0x2b3   : > { %v2052_v24 = vpop.permute.xlu1 %2051 }
 0x2b4   : > { %v2057_v49 = vadd.f32 %v2052_v24, %v2036_v52  ;;  %v2073_v37 = vpop.permute.xlu0 %2072 }
 0x2b6   : > { %v2078_v29 = vadd.f32 %v2073_v37, %v2057_v49 }
 0x2b8   : > { %v2099_v26 = vadd.f32 %v2094_v62, %v2078_v29 }
 0x2ba   : > { %v2101_v27 = vsub.f32 0.0, %v2099_v26 }
 0x2bb   : > { %v2075_v35 = vpop.permute.xlu1 %2074 }
 0x2bc   : > { %v2103_v18 = vmul.f32 1.442695, %v2101_v27  ;;  %v2079_v38 = vadd.f32 %v2075_v35, %v2058_v30  ;;  %v2096_v60 = vpop.permute.xlu0 %2095 }
 0x2be   : > { %2348 = vpow2.f32 %v2103_v18  ;;  %v2100_v41 = vadd.f32 %v2096_v60, %v2079_v38 }
 0x2c0   : > { %v2102_v44 = vsub.f32 0.0, %v2100_v41 }
 0x2c2   : > { %v2105_v19 = vmul.f32 1.442695, %v2102_v44 }
 0x2c4   : > { %v2349_v14 = vpop.eup %2348  ;;  %2350 = vpow2.f32 %v2105_v19 }
 0x2c5   : > { %v2107_v55 = vadd.f32 1.0, %v2349_v14 }
 0x2c7   : > { %2352 = vrcp.f32 %v2107_v55  ;;  %v2120_v43 = vand.u32 2147483648, %v2107_v55  ;;  %v2118_v17 = vand.u32 2147483647, %v2107_v55  ;;  %vm2114_vm10 = vweird.f32 %v2107_v55 }
 0x2c9   : > { %v2121_v50 = vor.u32 1.1754944e-38, %v2120_v43  ;;  %vm2119_vm13 = vcmp.eq.f32.partialorder %v2118_v17, 8.507059e+37 }
 0x2ca   : > { %v2351_v45 = vpop.eup %2350 }
 0x2cb   : > { %v2108_v51 = vadd.f32 1.0, %v2351_v45 }
 0x2cd   : > { %v2353_v53 = vpop.eup %2352  ;;  %2354 = vrcp.f32 %v2108_v51  ;;  %v2134_v48 = vand.u32 2147483648, %v2108_v51  ;;  %v2132_v61 = vand.u32 2147483647, %v2108_v51  ;;  %vm2128_vm15 = vweird.f32 %v2108_v51 }
 0x2ce   : > { %v2110_v15 = vmul.f32 %v2353_v53, %v2107_v55  ;;  %vm2115_vm9 = vweird.f32 %v2353_v53 }
 0x2cf   : > { %vm2116_vm12 = vmor %vm2114_vm10, %vm2115_vm9  ;;  %v2135_v3 = vor.u32 1.1754944e-38, %v2134_v48  ;;  %vm2133_vm1 = vcmp.eq.f32.partialorder %v2132_v61, 8.507059e+37 }
 0x2d0   : > { %v2111_v5 = vsub.f32 1.0, %v2110_v15 }
 0x2d2   : > { %v2112_v28 = vmul.f32 %v2353_v53, %v2111_v5 }
 0x2d3   : > { %v2355_v40 = vpop.eup %2354 }
 0x2d4   : > { %v2113_v13 = vadd.f32 %v2353_v53, %v2112_v28  ;;  %v2124_v47 = vmul.f32 %v2355_v40, %v2108_v51  ;;  %vm2129_vm14 = vweird.f32 %v2355_v40 }
 0x2d5   : > { %vm2130_vm0 = vmor %vm2128_vm15, %vm2129_vm14 }
 0x2d6   : > { %v2117_v42 = vsel %vm2116_vm12, %v2353_v53, %v2113_v13  ;;  %v2125_v46 = vsub.f32 1.0, %v2124_v47 }
 0x2d7   : > { %v2122_v57 = vsel %vm2119_vm13, %v2121_v50, %v2117_v42 }
 0x2d8   : > { %2138 = vst.msk [vmem:[%s157_s23] sm:$0xff] %vm2137_vm11, %v2122_v57  ;;  %v2126_v59 = vmul.f32 %v2355_v40, %v2125_v46 }
 0x2da   : > { %v2127_v39 = vadd.f32 %v2355_v40, %v2126_v59 }
 0x2dc   : > { %v2131_v56 = vsel %vm2130_vm0, %v2355_v40, %v2127_v39 }
 0x2dd   : > { %v2136_v2 = vsel %vm2133_vm1, %v2135_v3, %v2131_v56 }
 0x2de   : > { %2139 = vst.msk [vmem:[%s157_s23 + $0x8] sm:$0xff] %vm2137_vm11, %v2136_v2 }
 0x2df PF: > { %s13_s9 = sadd.s32 1, %s2393_s9  }
 0x2e0   : > { %p10_p7 = scmp.ge.s32.totalorder %s13_s9, 4  }
 0x2e2   :  { %12 = sbr.rel (!%p10_p7) target bundleno = 1 (0x1), region = 65 }
 0x2e7   :  { %2161 = vsyncpa [#allocation4], 1 }
 0x2e8   :  { %2163 = vsyncpa [#allocation4 + $0x1], 1 }

</bundles_post_ra>
